<compile_context>
chip_gen: v7x
topology: tpu7x:2x2x1
jax: 0.10.0
libtpu: 0.0.40
codegen_flags: <defaults>
</compile_context>

<pallas_src>
import functools

import numpy as np
import jax
import jax.numpy as jnp
from jax.experimental import pallas as pl
from jax.experimental.pallas import tpu as pltpu

BN_EPS = 1e-5


def _round_up(v, m):
    return (v + m - 1) // m * m


@functools.lru_cache(maxsize=None)
def _build_tfc_call(B, T, F, C0, gr, L, KH, KW, PH, PW):
    """Fused all-layers TFC kernel: Conv2d + BN(batch stats) + ReLU, channel-major."""
    To = T + 2 * PH - KH + 1
    Fo = F + 2 * PW - KW + 1
    if L > 1:
        # Dense concat (as in the PyTorch module) requires spatial preservation.
        assert To == T and Fo == F, (To, Fo, T, F)
    Tp, Fp = T + 2 * PH, F + 2 * PW
    C0p = _round_up(C0, 8)                 # 8-align the x0 slab (f32 sublane tile)
    Cbuf = C0p + (L - 1) * gr              # x0 + every layer's output except the last
    NPB = Tp * Fp                          # flattened padded positions per batch
    Npos = B * NPB                         # flattened padded positions, all batches
    EXTRA = (KH - 1) * Fp + (KW - 1)       # right halo so tap slices stay in bounds
    Ntot = Npos + EXTRA                    # buffer width (zero tail)
    D = PH * Fp + PW                       # interior shift for the writeback
    Mvalid = B * To * Fo                   # BN population size
    inv_m = 1.0 / float(Mvalid)

    def kernel(*refs):
        x_ref = refs[0]                    # (C0p, Ntot)  f32  padded, channel-major
        mask_ref = refs[1]                 # (1, Npos)    f32  1.0 at valid output pos
        w_refs = refs[2:2 + L]             # layer i: (KH*KW, gr, C0p+i*gr) f32
        g_ref = refs[2 + L]                # (L, gr, 1)   f32  BN gamma
        be_ref = refs[3 + L]               # (L, gr, 1)   f32  BN beta
        o_ref = refs[4 + L]                # (B, gr, NPB) f32  last layer, padded layout
        buf_ref = refs[5 + L]              # (Cbuf, Ntot) f32  dense activation stack

        # Input channels (already spatially padded + zero tail in the wrapper).
        # No other zeroing needed: rows beyond K_i are never read before written.
        buf_ref[0:C0p, :] = x_ref[...]
        mask = mask_ref[...]               # (1, Npos)

        for i in range(L):                 # static unroll over layers
            k_i = C0p + i * gr             # per-layer static contraction size
            xin = buf_ref[0:k_i, :]        # (k_i, Ntot) -- loaded once per layer

            # ---- Conv2d: KH*KW per-tap matmuls, lane-shifted accumulation ----
            acc = None
            for kh in range(KH):
                for kw in range(KW):
                    tap = kh * KW + kw
                    d = kh * Fp + kw
                    # (gr, k_i) @ (k_i, Ntot) -> (gr, Ntot), lane-dense MXU result.
                    y = jnp.dot(w_refs[i][tap], xin,
                                preferred_element_type=jnp.float32)
                    sl = y[:, d:d + Npos]  # static lane-offset slice (XLU shift)
                    acc = sl if acc is None else acc + sl

            # ---- BatchNorm2d (training-mode batch stats), fused reduction ----
            stats = jnp.concatenate([acc, acc * acc], axis=0) * mask   # (2gr, Npos)
            sums = jnp.sum(stats, axis=1, keepdims=True)               # (2gr, 1)
            mean = sums[0:gr] * inv_m
            var = jnp.maximum(sums[gr:2 * gr] * inv_m - mean * mean, 0.0)
            scale = g_ref[i] * jax.lax.rsqrt(var + BN_EPS)             # (gr, 1)
            shift = be_ref[i] - mean * scale
            # ReLU, then mask so halo / tail positions are exactly zero.
            act = jnp.maximum(acc * scale + shift, 0.0) * mask         # (gr, Npos)

            if i + 1 < L:
                # Dense connectivity: place the activation at interior (padded)
                # coordinates and store full lane-dense rows (no offset store).
                pieces = []
                if D > 0:
                    pieces.append(jnp.zeros((gr, D), jnp.float32))
                pieces.append(act)
                tail = Ntot - Npos - D
                if tail > 0:
                    pieces.append(jnp.zeros((gr, tail), jnp.float32))
                c_lo = C0p + i * gr
                buf_ref[c_lo:c_lo + gr, :] = jnp.concatenate(pieces, axis=1)
            else:
                # Channel-major output; wrapper only reshapes + crops (no transpose).
                for b in range(B):
                    o_ref[b, :, :] = act[:, b * NPB:(b + 1) * NPB]

    # ---- VMEM budget derived from the shapes (review: no fixed 48 MiB) ------
    def _pad2(r, c, itemsize=4):
        return _round_up(max(r, 1), 8) * _round_up(max(c, 1), 128) * itemsize

    est = (_pad2(Cbuf, Ntot) + _pad2(C0p, Ntot) + _pad2(1, Npos)
           + B * _pad2(gr, NPB)
           + sum(KH * KW * _pad2(gr, C0p + i * gr) for i in range(L))
           + 2 * L * _pad2(gr, 1))
    vmem_limit = int(min(40 * 2**20, max(8 * 2**20, 4 * est)))

    return pl.pallas_call(
        kernel,
        out_shape=jax.ShapeDtypeStruct((B, gr, NPB), jnp.float32),
        in_specs=[pl.BlockSpec(memory_space=pltpu.MemorySpace.VMEM)] * (L + 4),
        out_specs=pl.BlockSpec(memory_space=pltpu.MemorySpace.VMEM),
        scratch_shapes=[pltpu.VMEM((Cbuf, Ntot), jnp.float32)],
        compiler_params=pltpu.CompilerParams(vmem_limit_bytes=vmem_limit),
    )


def _prepare_params(params, C0, C0p, gr, L, KH, KW):
    """Per-layer conv weights -> (KH*KW, gr, K_i) in the kernel's buffer order.

    Buffer channel order is [x0 (padded to C0p), out_0, out_1, ...]; the PyTorch
    dense-concat order for layer i is [out_{i-1}, ..., out_0, x0].  Conv biases
    are dropped (they cancel exactly against the training-mode BN batch mean).
    """
    Ws, Gs, Bs = [], [], []
    for i, (w, b, gamma, beta) in enumerate(params):
        C_in = C0 + i * gr
        K_i = C0p + i * gr
        assert w.shape == (KH, KW, C_in, gr), w.shape
        # Extra zero input-channel row used for the C0 -> C0p alignment pad.
        w_ext = jnp.concatenate([w, jnp.zeros((KH, KW, 1, gr), w.dtype)], axis=2)
        idx = []
        for k in range(K_i):
            if k < C0:
                idx.append(i * gr + k)                 # x0 channel k
            elif k < C0p:
                idx.append(C_in)                       # zero pad channel
            else:
                m, r = divmod(k - C0p, gr)
                idx.append((i - 1 - m) * gr + r)       # out_m channel r
        w_buf = w_ext[:, :, jnp.asarray(idx, jnp.int32), :]          # (KH,KW,K_i,gr)
        Wk = jnp.transpose(w_buf, (0, 1, 3, 2)).reshape(KH * KW, gr, K_i)
        Ws.append(Wk.astype(jnp.float32))
        Gs.append(jnp.reshape(gamma, (gr, 1)).astype(jnp.float32))
        Bs.append(jnp.reshape(beta, (gr, 1)).astype(jnp.float32))
        del b  # conv bias cancels against the training-mode BN batch mean
    return Ws, jnp.stack(Gs), jnp.stack(Bs)


def tfc_forward(x_nchw, params, *, gr, kt, kf):
    """[B, in_channels, T, F] => [B, gr, T, F] (matches TFC.forward, isatt=False)."""
    B, C0, T, F = x_nchw.shape
    L = len(params)
    # nn.Conv2d(kernel_size=(kf, kt), padding=(kt//2, kf//2)) on NCHW [B,C,T,F]:
    # kernel over T is kf, over F is kt; padding over T is kt//2, over F is kf//2
    # (exactly what the PyTorch module specifies).
    KH, KW = kf, kt
    PH, PW = kt // 2, kf // 2
    To, Fo = T + 2 * PH - KH + 1, F + 2 * PW - KW + 1
    Tp, Fp = T + 2 * PH, F + 2 * PW
    C0p = _round_up(C0, 8)
    NPB = Tp * Fp
    Npos = B * NPB
    EXTRA = (KH - 1) * Fp + (KW - 1)
    Ntot = Npos + EXTRA

    # Input prep touches only the raw C0 channels: spatial+channel zero pad,
    # channel-major permute, flatten; no NHWC transpose of the dense stack and
    # no dtype round trip.
    xp = jnp.pad(x_nchw.astype(jnp.float32),
                 ((0, 0), (0, C0p - C0), (PH, PH), (PW, PW)))
    xp = jnp.transpose(xp, (1, 0, 2, 3)).reshape(C0p, Npos)
    xp = jnp.pad(xp, ((0, 0), (0, EXTRA)))                          # (C0p, Ntot)

    # Valid-output-position mask (constant, built host-side).
    q = np.arange(Npos) % NPB
    tq, fq = q // Fp, q % Fp
    mask = jnp.asarray(((tq < To) & (fq < Fo)).astype(np.float32).reshape(1, Npos))

    Ws, G, Bt = _prepare_params(params, C0, C0p, gr, L, KH, KW)
    call = _build_tfc_call(B, T, F, C0, gr, L, KH, KW, PH, PW)
    out = call(xp, mask, *Ws, G, Bt)                                # (B, gr, NPB)
    # Channel-major already; only a free reshape + crop of the halo columns.
    return out.reshape(B, gr, Tp, Fp)[:, :, :To, :Fo]               # NCHW


# ---------------- pure-JAX reference (for correctness check) ----------------
def _ref_layer(x_nhwc, w, b, gamma, beta, PH, PW):
    out = jax.lax.conv_general_dilated(
        x_nhwc, w, window_strides=(1, 1),
        padding=((PH, PH), (PW, PW)),
        dimension_numbers=('NHWC', 'HWIO', 'NHWC'))
    out = out + b.reshape(1, 1, 1, -1)
    mean = out.mean(axis=(0, 1, 2), keepdims=True)
    var = ((out - mean) ** 2).mean(axis=(0, 1, 2), keepdims=True)
    y = (out - mean) / jnp.sqrt(var + BN_EPS)
    y = y * gamma.reshape(1, 1, 1, -1) + beta.reshape(1, 1, 1, -1)
    return jnp.maximum(y, 0.0)


def tfc_forward_ref(x_nchw, params, *, gr, kt, kf):
    PH, PW = kt // 2, kf // 2
    x = jnp.transpose(x_nchw, (0, 2, 3, 1)).astype(jnp.float32)
    x_ = None
    for i, (w, b, gamma, beta) in enumerate(params):
        if i == 0:
            x_ = _ref_layer(x, w, b, gamma, beta, PH, PW)
        else:
            x = jnp.concatenate([x_, x], axis=-1)
            x_ = _ref_layer(x, w, b, gamma, beta, PH, PW)
    return jnp.transpose(x_, (0, 3, 1, 2))


if __name__ == "__main__":
    # Small config consistent with TFC(in_channels, num_layers, gr, kt, kf, ReLU, f)
    B, in_channels, T, F = 2, 4, 16, 16
    num_layers, gr, kt, kf = 3, 8, 3, 3
    KH, KW = kf, kt

    key = jax.random.PRNGKey(0)
    key, xkey = jax.random.split(key)
    x = jax.random.normal(xkey, (B, in_channels, T, F), dtype=jnp.float32)

    # Deterministic synthetic parameters (shapes match nn.Conv2d/BatchNorm2d,
    # conv weights kept in HWIO layout).
    params = []
    c = in_channels
    for i in range(num_layers):
        key, kw_, kb_, kg_, kbe_ = jax.random.split(key, 5)
        fan_in = c * KH * KW
        w = jax.random.normal(kw_, (KH, KW, c, gr), jnp.float32) / jnp.sqrt(fan_in)
        b = 0.1 * jax.random.normal(kb_, (1, gr), jnp.float32)
        gamma = 1.0 + 0.1 * jax.random.normal(kg_, (1, gr), jnp.float32)
        beta = 0.1 * jax.random.normal(kbe_, (1, gr), jnp.float32)
        params.append((w, b, gamma, beta))
        c += gr

    out = jax.block_until_ready(tfc_forward(x, params, gr=gr, kt=kt, kf=kf))
    ref = jax.block_until_ready(tfc_forward_ref(x, params, gr=gr, kt=kt, kf=kf))

    assert out.shape == (B, gr, T, F), out.shape
    max_err = float(jnp.max(jnp.abs(out - ref)))
    assert jnp.allclose(out, ref, atol=1e-2, rtol=1e-2), max_err
    print("KERNEL_OK")
</pallas_src>

<mosaic_0001>
module attributes {stable_mosaic.version = 11 : i64} {
  func.func @kernel(%arg0: memref<8x686xf32, #tpu.memory_space<vmem>>, %arg1: memref<1x648xf32, #tpu.memory_space<vmem>>, %arg2: memref<9x8x8xf32, #tpu.memory_space<vmem>>, %arg3: memref<9x8x16xf32, #tpu.memory_space<vmem>>, %arg4: memref<9x8x24xf32, #tpu.memory_space<vmem>>, %arg5: memref<3x8x1xf32, #tpu.memory_space<vmem>>, %arg6: memref<3x8x1xf32, #tpu.memory_space<vmem>>, %arg7: memref<2x8x324xf32, #tpu.memory_space<vmem>>, %arg8: memref<24x686xf32, #tpu.memory_space<vmem>>) attributes {dimension_semantics = [], scalar_prefetch = 0 : i64, scratch_operands = 1 : i64, tpu.core_type = #tpu.core_type<tc>} {
    %c0 = arith.constant 0 : index
    %c0_0 = arith.constant 0 : index
    %0 = vector.load %arg0[%c0, %c0_0] : memref<8x686xf32, #tpu.memory_space<vmem>>, vector<8x686xf32>
    %c0_1 = arith.constant 0 : index
    %c0_2 = arith.constant 0 : index
    %1 = vector.load %arg8[%c0_1, %c0_2] : memref<24x686xf32, #tpu.memory_space<vmem>>, vector<8x686xf32>
    tpu.vector_store %arg8[%c0_1, %c0_2], %0 {strides = array<i32>} : memref<24x686xf32, #tpu.memory_space<vmem>>, vector<8x686xf32>,
    %c0_3 = arith.constant 0 : index
    %c0_4 = arith.constant 0 : index
    %2 = vector.load %arg1[%c0_3, %c0_4] : memref<1x648xf32, #tpu.memory_space<vmem>>, vector<1x648xf32>
    %c0_5 = arith.constant 0 : index
    %c0_6 = arith.constant 0 : index
    %3 = vector.load %arg8[%c0_5, %c0_6] : memref<24x686xf32, #tpu.memory_space<vmem>>, vector<8x686xf32>
    %c0_7 = arith.constant 0 : index
    %c0_8 = arith.constant 0 : index
    %c0_9 = arith.constant 0 : index
    %4 = vector.load %arg2[%c0_7, %c0_8, %c0_9] : memref<9x8x8xf32, #tpu.memory_space<vmem>>, vector<1x8x8xf32>
    %5 = vector.shape_cast %4 : vector<1x8x8xf32> to vector<8x8xf32>
    %cst = arith.constant dense<0.000000e+00> : vector<8x686xf32>
    %6 = tpu.matmul %5, %3, %cst {dimension_numbers = #tpu.dot_dimension_numbers<[1], [0], [0], [1], [0, 0, 1, 1], [], []>} : vector<8x8xf32>, vector<8x686xf32>, vector<8x686xf32> -> vector<8x686xf32>
    %7 = vector.extract_strided_slice %6 {offsets = [0, 0], sizes = [8, 648], strides = [1, 1]} : vector<8x686xf32> to vector<8x648xf32>
    %c1 = arith.constant 1 : index
    %c0_10 = arith.constant 0 : index
    %c0_11 = arith.constant 0 : index
    %8 = vector.load %arg2[%c1, %c0_10, %c0_11] : memref<9x8x8xf32, #tpu.memory_space<vmem>>, vector<1x8x8xf32>
    %9 = vector.shape_cast %8 : vector<1x8x8xf32> to vector<8x8xf32>
    %cst_12 = arith.constant dense<0.000000e+00> : vector<8x686xf32>
    %10 = tpu.matmul %9, %3, %cst_12 {dimension_numbers = #tpu.dot_dimension_numbers<[1], [0], [0], [1], [0, 0, 1, 1], [], []>} : vector<8x8xf32>, vector<8x686xf32>, vector<8x686xf32> -> vector<8x686xf32>
    %11 = vector.extract_strided_slice %10 {offsets = [0, 1], sizes = [8, 648], strides = [1, 1]} : vector<8x686xf32> to vector<8x648xf32>
    %12 = arith.addf %7, %11 : vector<8x648xf32>
    %c2 = arith.constant 2 : index
    %c0_13 = arith.constant 0 : index
    %c0_14 = arith.constant 0 : index
    %13 = vector.load %arg2[%c2, %c0_13, %c0_14] : memref<9x8x8xf32, #tpu.memory_space<vmem>>, vector<1x8x8xf32>
    %14 = vector.shape_cast %13 : vector<1x8x8xf32> to vector<8x8xf32>
    %cst_15 = arith.constant dense<0.000000e+00> : vector<8x686xf32>
    %15 = tpu.matmul %14, %3, %cst_15 {dimension_numbers = #tpu.dot_dimension_numbers<[1], [0], [0], [1], [0, 0, 1, 1], [], []>} : vector<8x8xf32>, vector<8x686xf32>, vector<8x686xf32> -> vector<8x686xf32>
    %16 = vector.extract_strided_slice %15 {offsets = [0, 2], sizes = [8, 648], strides = [1, 1]} : vector<8x686xf32> to vector<8x648xf32>
    %17 = arith.addf %12, %16 : vector<8x648xf32>
    %c3 = arith.constant 3 : index
    %c0_16 = arith.constant 0 : index
    %c0_17 = arith.constant 0 : index
    %18 = vector.load %arg2[%c3, %c0_16, %c0_17] : memref<9x8x8xf32, #tpu.memory_space<vmem>>, vector<1x8x8xf32>
    %19 = vector.shape_cast %18 : vector<1x8x8xf32> to vector<8x8xf32>
    %cst_18 = arith.constant dense<0.000000e+00> : vector<8x686xf32>
    %20 = tpu.matmul %19, %3, %cst_18 {dimension_numbers = #tpu.dot_dimension_numbers<[1], [0], [0], [1], [0, 0, 1, 1], [], []>} : vector<8x8xf32>, vector<8x686xf32>, vector<8x686xf32> -> vector<8x686xf32>
    %21 = vector.extract_strided_slice %20 {offsets = [0, 18], sizes = [8, 648], strides = [1, 1]} : vector<8x686xf32> to vector<8x648xf32>
    %22 = arith.addf %17, %21 : vector<8x648xf32>
    %c4 = arith.constant 4 : index
    %c0_19 = arith.constant 0 : index
    %c0_20 = arith.constant 0 : index
    %23 = vector.load %arg2[%c4, %c0_19, %c0_20] : memref<9x8x8xf32, #tpu.memory_space<vmem>>, vector<1x8x8xf32>
    %24 = vector.shape_cast %23 : vector<1x8x8xf32> to vector<8x8xf32>
    %cst_21 = arith.constant dense<0.000000e+00> : vector<8x686xf32>
    %25 = tpu.matmul %24, %3, %cst_21 {dimension_numbers = #tpu.dot_dimension_numbers<[1], [0], [0], [1], [0, 0, 1, 1], [], []>} : vector<8x8xf32>, vector<8x686xf32>, vector<8x686xf32> -> vector<8x686xf32>
    %26 = vector.extract_strided_slice %25 {offsets = [0, 19], sizes = [8, 648], strides = [1, 1]} : vector<8x686xf32> to vector<8x648xf32>
    %27 = arith.addf %22, %26 : vector<8x648xf32>
    %c5 = arith.constant 5 : index
    %c0_22 = arith.constant 0 : index
    %c0_23 = arith.constant 0 : index
    %28 = vector.load %arg2[%c5, %c0_22, %c0_23] : memref<9x8x8xf32, #tpu.memory_space<vmem>>, vector<1x8x8xf32>
    %29 = vector.shape_cast %28 : vector<1x8x8xf32> to vector<8x8xf32>
    %cst_24 = arith.constant dense<0.000000e+00> : vector<8x686xf32>
    %30 = tpu.matmul %29, %3, %cst_24 {dimension_numbers = #tpu.dot_dimension_numbers<[1], [0], [0], [1], [0, 0, 1, 1], [], []>} : vector<8x8xf32>, vector<8x686xf32>, vector<8x686xf32> -> vector<8x686xf32>
    %31 = vector.extract_strided_slice %30 {offsets = [0, 20], sizes = [8, 648], strides = [1, 1]} : vector<8x686xf32> to vector<8x648xf32>
    %32 = arith.addf %27, %31 : vector<8x648xf32>
    %c6 = arith.constant 6 : index
    %c0_25 = arith.constant 0 : index
    %c0_26 = arith.constant 0 : index
    %33 = vector.load %arg2[%c6, %c0_25, %c0_26] : memref<9x8x8xf32, #tpu.memory_space<vmem>>, vector<1x8x8xf32>
    %34 = vector.shape_cast %33 : vector<1x8x8xf32> to vector<8x8xf32>
    %cst_27 = arith.constant dense<0.000000e+00> : vector<8x686xf32>
    %35 = tpu.matmul %34, %3, %cst_27 {dimension_numbers = #tpu.dot_dimension_numbers<[1], [0], [0], [1], [0, 0, 1, 1], [], []>} : vector<8x8xf32>, vector<8x686xf32>, vector<8x686xf32> -> vector<8x686xf32>
    %36 = vector.extract_strided_slice %35 {offsets = [0, 36], sizes = [8, 648], strides = [1, 1]} : vector<8x686xf32> to vector<8x648xf32>
    %37 = arith.addf %32, %36 : vector<8x648xf32>
    %c7 = arith.constant 7 : index
    %c0_28 = arith.constant 0 : index
    %c0_29 = arith.constant 0 : index
    %38 = vector.load %arg2[%c7, %c0_28, %c0_29] : memref<9x8x8xf32, #tpu.memory_space<vmem>>, vector<1x8x8xf32>
    %39 = vector.shape_cast %38 : vector<1x8x8xf32> to vector<8x8xf32>
    %cst_30 = arith.constant dense<0.000000e+00> : vector<8x686xf32>
    %40 = tpu.matmul %39, %3, %cst_30 {dimension_numbers = #tpu.dot_dimension_numbers<[1], [0], [0], [1], [0, 0, 1, 1], [], []>} : vector<8x8xf32>, vector<8x686xf32>, vector<8x686xf32> -> vector<8x686xf32>
    %41 = vector.extract_strided_slice %40 {offsets = [0, 37], sizes = [8, 648], strides = [1, 1]} : vector<8x686xf32> to vector<8x648xf32>
    %42 = arith.addf %37, %41 : vector<8x648xf32>
    %c8 = arith.constant 8 : index
    %c0_31 = arith.constant 0 : index
    %c0_32 = arith.constant 0 : index
    %43 = vector.load %arg2[%c8, %c0_31, %c0_32] : memref<9x8x8xf32, #tpu.memory_space<vmem>>, vector<1x8x8xf32>
    %44 = vector.shape_cast %43 : vector<1x8x8xf32> to vector<8x8xf32>
    %cst_33 = arith.constant dense<0.000000e+00> : vector<8x686xf32>
    %45 = tpu.matmul %44, %3, %cst_33 {dimension_numbers = #tpu.dot_dimension_numbers<[1], [0], [0], [1], [0, 0, 1, 1], [], []>} : vector<8x8xf32>, vector<8x686xf32>, vector<8x686xf32> -> vector<8x686xf32>
    %46 = vector.extract_strided_slice %45 {offsets = [0, 38], sizes = [8, 648], strides = [1, 1]} : vector<8x686xf32> to vector<8x648xf32>
    %47 = arith.addf %42, %46 : vector<8x648xf32>
    %48 = arith.mulf %47, %47 : vector<8x648xf32>
    %49 = tpu.concatenate %47, %48 in 0 : vector<8x648xf32>, vector<8x648xf32> -> vector<16x648xf32>
    %50 = vector.broadcast %2 : vector<1x648xf32> to vector<16x648xf32>
    %51 = arith.mulf %49, %50 : vector<16x648xf32>
    %cst_34 = arith.constant dense<0.000000e+00> : vector<16xf32>
    %52 = vector.multi_reduction <add>, %51, %cst_34 [1] : vector<16x648xf32> to vector<16xf32>
    %53 = vector.shape_cast %52 : vector<16xf32> to vector<16x1xf32>
    %54 = vector.extract_strided_slice %53 {offsets = [0, 0], sizes = [8, 1], strides = [1, 1]} : vector<16x1xf32> to vector<8x1xf32>
    %cst_35 = arith.constant 0.001953125 : f32
    %55 = vector.broadcast %cst_35 : f32 to vector<8x1xf32>
    %56 = arith.mulf %54, %55 : vector<8x1xf32>
    %57 = vector.extract_strided_slice %53 {offsets = [8, 0], sizes = [8, 1], strides = [1, 1]} : vector<16x1xf32> to vector<8x1xf32>
    %cst_36 = arith.constant 0.001953125 : f32
    %58 = vector.broadcast %cst_36 : f32 to vector<8x1xf32>
    %59 = arith.mulf %57, %58 : vector<8x1xf32>
    %60 = arith.mulf %56, %56 : vector<8x1xf32>
    %61 = arith.subf %59, %60 : vector<8x1xf32>
    %cst_37 = arith.constant 0.000000e+00 : f32
    %62 = vector.broadcast %cst_37 : f32 to vector<8x1xf32>
    %63 = arith.maximumf %61, %62 : vector<8x1xf32>
    %c0_38 = arith.constant 0 : index
    %c0_39 = arith.constant 0 : index
    %c0_40 = arith.constant 0 : index
    %64 = vector.load %arg5[%c0_38, %c0_39, %c0_40] : memref<3x8x1xf32, #tpu.memory_space<vmem>>, vector<1x8x1xf32>
    %65 = vector.shape_cast %64 : vector<1x8x1xf32> to vector<8x1xf32>
    %cst_41 = arith.constant 9.99999974E-6 : f32
    %66 = vector.broadcast %cst_41 : f32 to vector<8x1xf32>
    %67 = arith.addf %63, %66 : vector<8x1xf32>
    %68 = math.rsqrt %67 : vector<8x1xf32>
    %69 = arith.mulf %65, %68 : vector<8x1xf32>
    %c0_42 = arith.constant 0 : index
    %c0_43 = arith.constant 0 : index
    %c0_44 = arith.constant 0 : index
    %70 = vector.load %arg6[%c0_42, %c0_43, %c0_44] : memref<3x8x1xf32, #tpu.memory_space<vmem>>, vector<1x8x1xf32>
    %71 = vector.shape_cast %70 : vector<1x8x1xf32> to vector<8x1xf32>
    %72 = arith.mulf %56, %69 : vector<8x1xf32>
    %73 = arith.subf %71, %72 : vector<8x1xf32>
    %74 = vector.broadcast %69 : vector<8x1xf32> to vector<8x648xf32>
    %75 = arith.mulf %47, %74 : vector<8x648xf32>
    %76 = vector.broadcast %73 : vector<8x1xf32> to vector<8x648xf32>
    %77 = arith.addf %75, %76 : vector<8x648xf32>
    %cst_45 = arith.constant 0.000000e+00 : f32
    %78 = vector.broadcast %cst_45 : f32 to vector<8x648xf32>
    %79 = arith.maximumf %77, %78 : vector<8x648xf32>
    %80 = vector.broadcast %2 : vector<1x648xf32> to vector<8x648xf32>
    %81 = arith.mulf %79, %80 : vector<8x648xf32>
    %cst_46 = arith.constant 0.000000e+00 : f32
    %82 = vector.broadcast %cst_46 : f32 to vector<8x19xf32>
    %cst_47 = arith.constant 0.000000e+00 : f32
    %83 = vector.broadcast %cst_47 : f32 to vector<8x19xf32>
    %84 = tpu.concatenate %82, %81, %83 in 1 : vector<8x19xf32>, vector<8x648xf32>, vector<8x19xf32> -> vector<8x686xf32>
    %c8_48 = arith.constant 8 : index
    %c0_49 = arith.constant 0 : index
    %85 = vector.load %arg8[%c8_48, %c0_49] : memref<24x686xf32, #tpu.memory_space<vmem>>, vector<8x686xf32>
    tpu.vector_store %arg8[%c8_48, %c0_49], %84 {strides = array<i32>} : memref<24x686xf32, #tpu.memory_space<vmem>>, vector<8x686xf32>,
    %c0_50 = arith.constant 0 : index
    %c0_51 = arith.constant 0 : index
    %86 = vector.load %arg8[%c0_50, %c0_51] : memref<24x686xf32, #tpu.memory_space<vmem>>, vector<16x686xf32>
    %c0_52 = arith.constant 0 : index
    %c0_53 = arith.constant 0 : index
    %c0_54 = arith.constant 0 : index
    %87 = vector.load %arg3[%c0_52, %c0_53, %c0_54] : memref<9x8x16xf32, #tpu.memory_space<vmem>>, vector<1x8x16xf32>
    %88 = vector.shape_cast %87 : vector<1x8x16xf32> to vector<8x16xf32>
    %cst_55 = arith.constant dense<0.000000e+00> : vector<8x686xf32>
    %89 = tpu.matmul %88, %86, %cst_55 {dimension_numbers = #tpu.dot_dimension_numbers<[1], [0], [0], [1], [0, 0, 1, 1], [], []>} : vector<8x16xf32>, vector<16x686xf32>, vector<8x686xf32> -> vector<8x686xf32>
    %90 = vector.extract_strided_slice %89 {offsets = [0, 0], sizes = [8, 648], strides = [1, 1]} : vector<8x686xf32> to vector<8x648xf32>
    %c1_56 = arith.constant 1 : index
    %c0_57 = arith.constant 0 : index
    %c0_58 = arith.constant 0 : index
    %91 = vector.load %arg3[%c1_56, %c0_57, %c0_58] : memref<9x8x16xf32, #tpu.memory_space<vmem>>, vector<1x8x16xf32>
    %92 = vector.shape_cast %91 : vector<1x8x16xf32> to vector<8x16xf32>
    %cst_59 = arith.constant dense<0.000000e+00> : vector<8x686xf32>
    %93 = tpu.matmul %92, %86, %cst_59 {dimension_numbers = #tpu.dot_dimension_numbers<[1], [0], [0], [1], [0, 0, 1, 1], [], []>} : vector<8x16xf32>, vector<16x686xf32>, vector<8x686xf32> -> vector<8x686xf32>
    %94 = vector.extract_strided_slice %93 {offsets = [0, 1], sizes = [8, 648], strides = [1, 1]} : vector<8x686xf32> to vector<8x648xf32>
    %95 = arith.addf %90, %94 : vector<8x648xf32>
    %c2_60 = arith.constant 2 : index
    %c0_61 = arith.constant 0 : index
    %c0_62 = arith.constant 0 : index
    %96 = vector.load %arg3[%c2_60, %c0_61, %c0_62] : memref<9x8x16xf32, #tpu.memory_space<vmem>>, vector<1x8x16xf32>
    %97 = vector.shape_cast %96 : vector<1x8x16xf32> to vector<8x16xf32>
    %cst_63 = arith.constant dense<0.000000e+00> : vector<8x686xf32>
    %98 = tpu.matmul %97, %86, %cst_63 {dimension_numbers = #tpu.dot_dimension_numbers<[1], [0], [0], [1], [0, 0, 1, 1], [], []>} : vector<8x16xf32>, vector<16x686xf32>, vector<8x686xf32> -> vector<8x686xf32>
    %99 = vector.extract_strided_slice %98 {offsets = [0, 2], sizes = [8, 648], strides = [1, 1]} : vector<8x686xf32> to vector<8x648xf32>
    %100 = arith.addf %95, %99 : vector<8x648xf32>
    %c3_64 = arith.constant 3 : index
    %c0_65 = arith.constant 0 : index
    %c0_66 = arith.constant 0 : index
    %101 = vector.load %arg3[%c3_64, %c0_65, %c0_66] : memref<9x8x16xf32, #tpu.memory_space<vmem>>, vector<1x8x16xf32>
    %102 = vector.shape_cast %101 : vector<1x8x16xf32> to vector<8x16xf32>
    %cst_67 = arith.constant dense<0.000000e+00> : vector<8x686xf32>
    %103 = tpu.matmul %102, %86, %cst_67 {dimension_numbers = #tpu.dot_dimension_numbers<[1], [0], [0], [1], [0, 0, 1, 1], [], []>} : vector<8x16xf32>, vector<16x686xf32>, vector<8x686xf32> -> vector<8x686xf32>
    %104 = vector.extract_strided_slice %103 {offsets = [0, 18], sizes = [8, 648], strides = [1, 1]} : vector<8x686xf32> to vector<8x648xf32>
    %105 = arith.addf %100, %104 : vector<8x648xf32>
    %c4_68 = arith.constant 4 : index
    %c0_69 = arith.constant 0 : index
    %c0_70 = arith.constant 0 : index
    %106 = vector.load %arg3[%c4_68, %c0_69, %c0_70] : memref<9x8x16xf32, #tpu.memory_space<vmem>>, vector<1x8x16xf32>
    %107 = vector.shape_cast %106 : vector<1x8x16xf32> to vector<8x16xf32>
    %cst_71 = arith.constant dense<0.000000e+00> : vector<8x686xf32>
    %108 = tpu.matmul %107, %86, %cst_71 {dimension_numbers = #tpu.dot_dimension_numbers<[1], [0], [0], [1], [0, 0, 1, 1], [], []>} : vector<8x16xf32>, vector<16x686xf32>, vector<8x686xf32> -> vector<8x686xf32>
    %109 = vector.extract_strided_slice %108 {offsets = [0, 19], sizes = [8, 648], strides = [1, 1]} : vector<8x686xf32> to vector<8x648xf32>
    %110 = arith.addf %105, %109 : vector<8x648xf32>
    %c5_72 = arith.constant 5 : index
    %c0_73 = arith.constant 0 : index
    %c0_74 = arith.constant 0 : index
    %111 = vector.load %arg3[%c5_72, %c0_73, %c0_74] : memref<9x8x16xf32, #tpu.memory_space<vmem>>, vector<1x8x16xf32>
    %112 = vector.shape_cast %111 : vector<1x8x16xf32> to vector<8x16xf32>
    %cst_75 = arith.constant dense<0.000000e+00> : vector<8x686xf32>
    %113 = tpu.matmul %112, %86, %cst_75 {dimension_numbers = #tpu.dot_dimension_numbers<[1], [0], [0], [1], [0, 0, 1, 1], [], []>} : vector<8x16xf32>, vector<16x686xf32>, vector<8x686xf32> -> vector<8x686xf32>
    %114 = vector.extract_strided_slice %113 {offsets = [0, 20], sizes = [8, 648], strides = [1, 1]} : vector<8x686xf32> to vector<8x648xf32>
    %115 = arith.addf %110, %114 : vector<8x648xf32>
    %c6_76 = arith.constant 6 : index
    %c0_77 = arith.constant 0 : index
    %c0_78 = arith.constant 0 : index
    %116 = vector.load %arg3[%c6_76, %c0_77, %c0_78] : memref<9x8x16xf32, #tpu.memory_space<vmem>>, vector<1x8x16xf32>
    %117 = vector.shape_cast %116 : vector<1x8x16xf32> to vector<8x16xf32>
    %cst_79 = arith.constant dense<0.000000e+00> : vector<8x686xf32>
    %118 = tpu.matmul %117, %86, %cst_79 {dimension_numbers = #tpu.dot_dimension_numbers<[1], [0], [0], [1], [0, 0, 1, 1], [], []>} : vector<8x16xf32>, vector<16x686xf32>, vector<8x686xf32> -> vector<8x686xf32>
    %119 = vector.extract_strided_slice %118 {offsets = [0, 36], sizes = [8, 648], strides = [1, 1]} : vector<8x686xf32> to vector<8x648xf32>
    %120 = arith.addf %115, %119 : vector<8x648xf32>
    %c7_80 = arith.constant 7 : index
    %c0_81 = arith.constant 0 : index
    %c0_82 = arith.constant 0 : index
    %121 = vector.load %arg3[%c7_80, %c0_81, %c0_82] : memref<9x8x16xf32, #tpu.memory_space<vmem>>, vector<1x8x16xf32>
    %122 = vector.shape_cast %121 : vector<1x8x16xf32> to vector<8x16xf32>
    %cst_83 = arith.constant dense<0.000000e+00> : vector<8x686xf32>
    %123 = tpu.matmul %122, %86, %cst_83 {dimension_numbers = #tpu.dot_dimension_numbers<[1], [0], [0], [1], [0, 0, 1, 1], [], []>} : vector<8x16xf32>, vector<16x686xf32>, vector<8x686xf32> -> vector<8x686xf32>
    %124 = vector.extract_strided_slice %123 {offsets = [0, 37], sizes = [8, 648], strides = [1, 1]} : vector<8x686xf32> to vector<8x648xf32>
    %125 = arith.addf %120, %124 : vector<8x648xf32>
    %c8_84 = arith.constant 8 : index
    %c0_85 = arith.constant 0 : index
    %c0_86 = arith.constant 0 : index
    %126 = vector.load %arg3[%c8_84, %c0_85, %c0_86] : memref<9x8x16xf32, #tpu.memory_space<vmem>>, vector<1x8x16xf32>
    %127 = vector.shape_cast %126 : vector<1x8x16xf32> to vector<8x16xf32>
    %cst_87 = arith.constant dense<0.000000e+00> : vector<8x686xf32>
    %128 = tpu.matmul %127, %86, %cst_87 {dimension_numbers = #tpu.dot_dimension_numbers<[1], [0], [0], [1], [0, 0, 1, 1], [], []>} : vector<8x16xf32>, vector<16x686xf32>, vector<8x686xf32> -> vector<8x686xf32>
    %129 = vector.extract_strided_slice %128 {offsets = [0, 38], sizes = [8, 648], strides = [1, 1]} : vector<8x686xf32> to vector<8x648xf32>
    %130 = arith.addf %125, %129 : vector<8x648xf32>
    %131 = arith.mulf %130, %130 : vector<8x648xf32>
    %132 = tpu.concatenate %130, %131 in 0 : vector<8x648xf32>, vector<8x648xf32> -> vector<16x648xf32>
    %133 = vector.broadcast %2 : vector<1x648xf32> to vector<16x648xf32>
    %134 = arith.mulf %132, %133 : vector<16x648xf32>
    %cst_88 = arith.constant dense<0.000000e+00> : vector<16xf32>
    %135 = vector.multi_reduction <add>, %134, %cst_88 [1] : vector<16x648xf32> to vector<16xf32>
    %136 = vector.shape_cast %135 : vector<16xf32> to vector<16x1xf32>
    %137 = vector.extract_strided_slice %136 {offsets = [0, 0], sizes = [8, 1], strides = [1, 1]} : vector<16x1xf32> to vector<8x1xf32>
    %cst_89 = arith.constant 0.001953125 : f32
    %138 = vector.broadcast %cst_89 : f32 to vector<8x1xf32>
    %139 = arith.mulf %137, %138 : vector<8x1xf32>
    %140 = vector.extract_strided_slice %136 {offsets = [8, 0], sizes = [8, 1], strides = [1, 1]} : vector<16x1xf32> to vector<8x1xf32>
    %cst_90 = arith.constant 0.001953125 : f32
    %141 = vector.broadcast %cst_90 : f32 to vector<8x1xf32>
    %142 = arith.mulf %140, %141 : vector<8x1xf32>
    %143 = arith.mulf %139, %139 : vector<8x1xf32>
    %144 = arith.subf %142, %143 : vector<8x1xf32>
    %cst_91 = arith.constant 0.000000e+00 : f32
    %145 = vector.broadcast %cst_91 : f32 to vector<8x1xf32>
    %146 = arith.maximumf %144, %145 : vector<8x1xf32>
    %c1_92 = arith.constant 1 : index
    %c0_93 = arith.constant 0 : index
    %c0_94 = arith.constant 0 : index
    %147 = vector.load %arg5[%c1_92, %c0_93, %c0_94] : memref<3x8x1xf32, #tpu.memory_space<vmem>>, vector<1x8x1xf32>
    %148 = vector.shape_cast %147 : vector<1x8x1xf32> to vector<8x1xf32>
    %cst_95 = arith.constant 9.99999974E-6 : f32
    %149 = vector.broadcast %cst_95 : f32 to vector<8x1xf32>
    %150 = arith.addf %146, %149 : vector<8x1xf32>
    %151 = math.rsqrt %150 : vector<8x1xf32>
    %152 = arith.mulf %148, %151 : vector<8x1xf32>
    %c1_96 = arith.constant 1 : index
    %c0_97 = arith.constant 0 : index
    %c0_98 = arith.constant 0 : index
    %153 = vector.load %arg6[%c1_96, %c0_97, %c0_98] : memref<3x8x1xf32, #tpu.memory_space<vmem>>, vector<1x8x1xf32>
    %154 = vector.shape_cast %153 : vector<1x8x1xf32> to vector<8x1xf32>
    %155 = arith.mulf %139, %152 : vector<8x1xf32>
    %156 = arith.subf %154, %155 : vector<8x1xf32>
    %157 = vector.broadcast %152 : vector<8x1xf32> to vector<8x648xf32>
    %158 = arith.mulf %130, %157 : vector<8x648xf32>
    %159 = vector.broadcast %156 : vector<8x1xf32> to vector<8x648xf32>
    %160 = arith.addf %158, %159 : vector<8x648xf32>
    %cst_99 = arith.constant 0.000000e+00 : f32
    %161 = vector.broadcast %cst_99 : f32 to vector<8x648xf32>
    %162 = arith.maximumf %160, %161 : vector<8x648xf32>
    %163 = vector.broadcast %2 : vector<1x648xf32> to vector<8x648xf32>
    %164 = arith.mulf %162, %163 : vector<8x648xf32>
    %cst_100 = arith.constant 0.000000e+00 : f32
    %165 = vector.broadcast %cst_100 : f32 to vector<8x19xf32>
    %cst_101 = arith.constant 0.000000e+00 : f32
    %166 = vector.broadcast %cst_101 : f32 to vector<8x19xf32>
    %167 = tpu.concatenate %165, %164, %166 in 1 : vector<8x19xf32>, vector<8x648xf32>, vector<8x19xf32> -> vector<8x686xf32>
    %c16 = arith.constant 16 : index
    %c0_102 = arith.constant 0 : index
    %168 = vector.load %arg8[%c16, %c0_102] : memref<24x686xf32, #tpu.memory_space<vmem>>, vector<8x686xf32>
    tpu.vector_store %arg8[%c16, %c0_102], %167 {strides = array<i32>} : memref<24x686xf32, #tpu.memory_space<vmem>>, vector<8x686xf32>,
    %c0_103 = arith.constant 0 : index
    %c0_104 = arith.constant 0 : index
    %169 = vector.load %arg8[%c0_103, %c0_104] : memref<24x686xf32, #tpu.memory_space<vmem>>, vector<24x686xf32>
    %c0_105 = arith.constant 0 : index
    %c0_106 = arith.constant 0 : index
    %c0_107 = arith.constant 0 : index
    %170 = vector.load %arg4[%c0_105, %c0_106, %c0_107] : memref<9x8x24xf32, #tpu.memory_space<vmem>>, vector<1x8x24xf32>
    %171 = vector.shape_cast %170 : vector<1x8x24xf32> to vector<8x24xf32>
    %cst_108 = arith.constant dense<0.000000e+00> : vector<8x686xf32>
    %172 = tpu.matmul %171, %169, %cst_108 {dimension_numbers = #tpu.dot_dimension_numbers<[1], [0], [0], [1], [0, 0, 1, 1], [], []>} : vector<8x24xf32>, vector<24x686xf32>, vector<8x686xf32> -> vector<8x686xf32>
    %173 = vector.extract_strided_slice %172 {offsets = [0, 0], sizes = [8, 648], strides = [1, 1]} : vector<8x686xf32> to vector<8x648xf32>
    %c1_109 = arith.constant 1 : index
    %c0_110 = arith.constant 0 : index
    %c0_111 = arith.constant 0 : index
    %174 = vector.load %arg4[%c1_109, %c0_110, %c0_111] : memref<9x8x24xf32, #tpu.memory_space<vmem>>, vector<1x8x24xf32>
    %175 = vector.shape_cast %174 : vector<1x8x24xf32> to vector<8x24xf32>
    %cst_112 = arith.constant dense<0.000000e+00> : vector<8x686xf32>
    %176 = tpu.matmul %175, %169, %cst_112 {dimension_numbers = #tpu.dot_dimension_numbers<[1], [0], [0], [1], [0, 0, 1, 1], [], []>} : vector<8x24xf32>, vector<24x686xf32>, vector<8x686xf32> -> vector<8x686xf32>
    %177 = vector.extract_strided_slice %176 {offsets = [0, 1], sizes = [8, 648], strides = [1, 1]} : vector<8x686xf32> to vector<8x648xf32>
    %178 = arith.addf %173, %177 : vector<8x648xf32>
    %c2_113 = arith.constant 2 : index
    %c0_114 = arith.constant 0 : index
    %c0_115 = arith.constant 0 : index
    %179 = vector.load %arg4[%c2_113, %c0_114, %c0_115] : memref<9x8x24xf32, #tpu.memory_space<vmem>>, vector<1x8x24xf32>
    %180 = vector.shape_cast %179 : vector<1x8x24xf32> to vector<8x24xf32>
    %cst_116 = arith.constant dense<0.000000e+00> : vector<8x686xf32>
    %181 = tpu.matmul %180, %169, %cst_116 {dimension_numbers = #tpu.dot_dimension_numbers<[1], [0], [0], [1], [0, 0, 1, 1], [], []>} : vector<8x24xf32>, vector<24x686xf32>, vector<8x686xf32> -> vector<8x686xf32>
    %182 = vector.extract_strided_slice %181 {offsets = [0, 2], sizes = [8, 648], strides = [1, 1]} : vector<8x686xf32> to vector<8x648xf32>
    %183 = arith.addf %178, %182 : vector<8x648xf32>
    %c3_117 = arith.constant 3 : index
    %c0_118 = arith.constant 0 : index
    %c0_119 = arith.constant 0 : index
    %184 = vector.load %arg4[%c3_117, %c0_118, %c0_119] : memref<9x8x24xf32, #tpu.memory_space<vmem>>, vector<1x8x24xf32>
    %185 = vector.shape_cast %184 : vector<1x8x24xf32> to vector<8x24xf32>
    %cst_120 = arith.constant dense<0.000000e+00> : vector<8x686xf32>
    %186 = tpu.matmul %185, %169, %cst_120 {dimension_numbers = #tpu.dot_dimension_numbers<[1], [0], [0], [1], [0, 0, 1, 1], [], []>} : vector<8x24xf32>, vector<24x686xf32>, vector<8x686xf32> -> vector<8x686xf32>
    %187 = vector.extract_strided_slice %186 {offsets = [0, 18], sizes = [8, 648], strides = [1, 1]} : vector<8x686xf32> to vector<8x648xf32>
    %188 = arith.addf %183, %187 : vector<8x648xf32>
    %c4_121 = arith.constant 4 : index
    %c0_122 = arith.constant 0 : index
    %c0_123 = arith.constant 0 : index
    %189 = vector.load %arg4[%c4_121, %c0_122, %c0_123] : memref<9x8x24xf32, #tpu.memory_space<vmem>>, vector<1x8x24xf32>
    %190 = vector.shape_cast %189 : vector<1x8x24xf32> to vector<8x24xf32>
    %cst_124 = arith.constant dense<0.000000e+00> : vector<8x686xf32>
    %191 = tpu.matmul %190, %169, %cst_124 {dimension_numbers = #tpu.dot_dimension_numbers<[1], [0], [0], [1], [0, 0, 1, 1], [], []>} : vector<8x24xf32>, vector<24x686xf32>, vector<8x686xf32> -> vector<8x686xf32>
    %192 = vector.extract_strided_slice %191 {offsets = [0, 19], sizes = [8, 648], strides = [1, 1]} : vector<8x686xf32> to vector<8x648xf32>
    %193 = arith.addf %188, %192 : vector<8x648xf32>
    %c5_125 = arith.constant 5 : index
    %c0_126 = arith.constant 0 : index
    %c0_127 = arith.constant 0 : index
    %194 = vector.load %arg4[%c5_125, %c0_126, %c0_127] : memref<9x8x24xf32, #tpu.memory_space<vmem>>, vector<1x8x24xf32>
    %195 = vector.shape_cast %194 : vector<1x8x24xf32> to vector<8x24xf32>
    %cst_128 = arith.constant dense<0.000000e+00> : vector<8x686xf32>
    %196 = tpu.matmul %195, %169, %cst_128 {dimension_numbers = #tpu.dot_dimension_numbers<[1], [0], [0], [1], [0, 0, 1, 1], [], []>} : vector<8x24xf32>, vector<24x686xf32>, vector<8x686xf32> -> vector<8x686xf32>
    %197 = vector.extract_strided_slice %196 {offsets = [0, 20], sizes = [8, 648], strides = [1, 1]} : vector<8x686xf32> to vector<8x648xf32>
    %198 = arith.addf %193, %197 : vector<8x648xf32>
    %c6_129 = arith.constant 6 : index
    %c0_130 = arith.constant 0 : index
    %c0_131 = arith.constant 0 : index
    %199 = vector.load %arg4[%c6_129, %c0_130, %c0_131] : memref<9x8x24xf32, #tpu.memory_space<vmem>>, vector<1x8x24xf32>
    %200 = vector.shape_cast %199 : vector<1x8x24xf32> to vector<8x24xf32>
    %cst_132 = arith.constant dense<0.000000e+00> : vector<8x686xf32>
    %201 = tpu.matmul %200, %169, %cst_132 {dimension_numbers = #tpu.dot_dimension_numbers<[1], [0], [0], [1], [0, 0, 1, 1], [], []>} : vector<8x24xf32>, vector<24x686xf32>, vector<8x686xf32> -> vector<8x686xf32>
    %202 = vector.extract_strided_slice %201 {offsets = [0, 36], sizes = [8, 648], strides = [1, 1]} : vector<8x686xf32> to vector<8x648xf32>
    %203 = arith.addf %198, %202 : vector<8x648xf32>
    %c7_133 = arith.constant 7 : index
    %c0_134 = arith.constant 0 : index
    %c0_135 = arith.constant 0 : index
    %204 = vector.load %arg4[%c7_133, %c0_134, %c0_135] : memref<9x8x24xf32, #tpu.memory_space<vmem>>, vector<1x8x24xf32>
    %205 = vector.shape_cast %204 : vector<1x8x24xf32> to vector<8x24xf32>
    %cst_136 = arith.constant dense<0.000000e+00> : vector<8x686xf32>
    %206 = tpu.matmul %205, %169, %cst_136 {dimension_numbers = #tpu.dot_dimension_numbers<[1], [0], [0], [1], [0, 0, 1, 1], [], []>} : vector<8x24xf32>, vector<24x686xf32>, vector<8x686xf32> -> vector<8x686xf32>
    %207 = vector.extract_strided_slice %206 {offsets = [0, 37], sizes = [8, 648], strides = [1, 1]} : vector<8x686xf32> to vector<8x648xf32>
    %208 = arith.addf %203, %207 : vector<8x648xf32>
    %c8_137 = arith.constant 8 : index
    %c0_138 = arith.constant 0 : index
    %c0_139 = arith.constant 0 : index
    %209 = vector.load %arg4[%c8_137, %c0_138, %c0_139] : memref<9x8x24xf32, #tpu.memory_space<vmem>>, vector<1x8x24xf32>
    %210 = vector.shape_cast %209 : vector<1x8x24xf32> to vector<8x24xf32>
    %cst_140 = arith.constant dense<0.000000e+00> : vector<8x686xf32>
    %211 = tpu.matmul %210, %169, %cst_140 {dimension_numbers = #tpu.dot_dimension_numbers<[1], [0], [0], [1], [0, 0, 1, 1], [], []>} : vector<8x24xf32>, vector<24x686xf32>, vector<8x686xf32> -> vector<8x686xf32>
    %212 = vector.extract_strided_slice %211 {offsets = [0, 38], sizes = [8, 648], strides = [1, 1]} : vector<8x686xf32> to vector<8x648xf32>
    %213 = arith.addf %208, %212 : vector<8x648xf32>
    %214 = arith.mulf %213, %213 : vector<8x648xf32>
    %215 = tpu.concatenate %213, %214 in 0 : vector<8x648xf32>, vector<8x648xf32> -> vector<16x648xf32>
    %216 = vector.broadcast %2 : vector<1x648xf32> to vector<16x648xf32>
    %217 = arith.mulf %215, %216 : vector<16x648xf32>
    %cst_141 = arith.constant dense<0.000000e+00> : vector<16xf32>
    %218 = vector.multi_reduction <add>, %217, %cst_141 [1] : vector<16x648xf32> to vector<16xf32>
    %219 = vector.shape_cast %218 : vector<16xf32> to vector<16x1xf32>
    %220 = vector.extract_strided_slice %219 {offsets = [0, 0], sizes = [8, 1], strides = [1, 1]} : vector<16x1xf32> to vector<8x1xf32>
    %cst_142 = arith.constant 0.001953125 : f32
    %221 = vector.broadcast %cst_142 : f32 to vector<8x1xf32>
    %222 = arith.mulf %220, %221 : vector<8x1xf32>
    %223 = vector.extract_strided_slice %219 {offsets = [8, 0], sizes = [8, 1], strides = [1, 1]} : vector<16x1xf32> to vector<8x1xf32>
    %cst_143 = arith.constant 0.001953125 : f32
    %224 = vector.broadcast %cst_143 : f32 to vector<8x1xf32>
    %225 = arith.mulf %223, %224 : vector<8x1xf32>
    %226 = arith.mulf %222, %222 : vector<8x1xf32>
    %227 = arith.subf %225, %226 : vector<8x1xf32>
    %cst_144 = arith.constant 0.000000e+00 : f32
    %228 = vector.broadcast %cst_144 : f32 to vector<8x1xf32>
    %229 = arith.maximumf %227, %228 : vector<8x1xf32>
    %c2_145 = arith.constant 2 : index
    %c0_146 = arith.constant 0 : index
    %c0_147 = arith.constant 0 : index
    %230 = vector.load %arg5[%c2_145, %c0_146, %c0_147] : memref<3x8x1xf32, #tpu.memory_space<vmem>>, vector<1x8x1xf32>
    %231 = vector.shape_cast %230 : vector<1x8x1xf32> to vector<8x1xf32>
    %cst_148 = arith.constant 9.99999974E-6 : f32
    %232 = vector.broadcast %cst_148 : f32 to vector<8x1xf32>
    %233 = arith.addf %229, %232 : vector<8x1xf32>
    %234 = math.rsqrt %233 : vector<8x1xf32>
    %235 = arith.mulf %231, %234 : vector<8x1xf32>
    %c2_149 = arith.constant 2 : index
    %c0_150 = arith.constant 0 : index
    %c0_151 = arith.constant 0 : index
    %236 = vector.load %arg6[%c2_149, %c0_150, %c0_151] : memref<3x8x1xf32, #tpu.memory_space<vmem>>, vector<1x8x1xf32>
    %237 = vector.shape_cast %236 : vector<1x8x1xf32> to vector<8x1xf32>
    %238 = arith.mulf %222, %235 : vector<8x1xf32>
    %239 = arith.subf %237, %238 : vector<8x1xf32>
    %240 = vector.broadcast %235 : vector<8x1xf32> to vector<8x648xf32>
    %241 = arith.mulf %213, %240 : vector<8x648xf32>
    %242 = vector.broadcast %239 : vector<8x1xf32> to vector<8x648xf32>
    %243 = arith.addf %241, %242 : vector<8x648xf32>
    %cst_152 = arith.constant 0.000000e+00 : f32
    %244 = vector.broadcast %cst_152 : f32 to vector<8x648xf32>
    %245 = arith.maximumf %243, %244 : vector<8x648xf32>
    %246 = vector.broadcast %2 : vector<1x648xf32> to vector<8x648xf32>
    %247 = arith.mulf %245, %246 : vector<8x648xf32>
    %248 = vector.extract_strided_slice %247 {offsets = [0, 0], sizes = [8, 324], strides = [1, 1]} : vector<8x648xf32> to vector<8x324xf32>
    %c0_153 = arith.constant 0 : index
    %c0_154 = arith.constant 0 : index
    %c0_155 = arith.constant 0 : index
    %249 = vector.load %arg7[%c0_153, %c0_154, %c0_155] : memref<2x8x324xf32, #tpu.memory_space<vmem>>, vector<1x8x324xf32>
    %250 = vector.shape_cast %249 : vector<1x8x324xf32> to vector<8x324xf32>
    %251 = vector.shape_cast %248 : vector<8x324xf32> to vector<1x8x324xf32>
    tpu.vector_store %arg7[%c0_153, %c0_154, %c0_155], %251 {strides = array<i32>} : memref<2x8x324xf32, #tpu.memory_space<vmem>>, vector<1x8x324xf32>,
    %252 = vector.extract_strided_slice %247 {offsets = [0, 324], sizes = [8, 324], strides = [1, 1]} : vector<8x648xf32> to vector<8x324xf32>
    %c1_156 = arith.constant 1 : index
    %c0_157 = arith.constant 0 : index
    %c0_158 = arith.constant 0 : index
    %253 = vector.load %arg7[%c1_156, %c0_157, %c0_158] : memref<2x8x324xf32, #tpu.memory_space<vmem>>, vector<1x8x324xf32>
    %254 = vector.shape_cast %253 : vector<1x8x324xf32> to vector<8x324xf32>
    %255 = vector.shape_cast %252 : vector<8x324xf32> to vector<1x8x324xf32>
    tpu.vector_store %arg7[%c1_156, %c0_157, %c0_158], %255 {strides = array<i32>} : memref<2x8x324xf32, #tpu.memory_space<vmem>>, vector<1x8x324xf32>,
    return
  }
}

</mosaic_0001>

<bundles_post_ra>
// kernel: tpu_custom_call.1
= control target key start
LH: loop header
LB: loop body
LE: loop exit
PB: predicated region body
PF: predicated region fallthrough
CT: control target
= control target key end

     0   :  { %12 = vsyncpa [#allocation4], 0  ;;  %s9019_s0 = inlined_call_operand.hbm [shape: f32[8,686], index: 0, kind: input, shape index: {}]   ;;  %s9020_s1 = inlined_call_operand.vmem [shape: f32[1,648], index: 1, kind: input, shape index: {}]   ;;  %s9021_s2 = inlined_call_operand.vmem [shape: f32[9,8,8], index: 2, kind: input, shape index: {}]   ;;  %s9022_s3 = inlined_call_operand.vmem [shape: f32[9,8,16], index: 3, kind: input, shape index: {}]   ;;  %s9023_s4 = inlined_call_operand.vmem [shape: f32[9,8,24], index: 4, kind: input, shape index: {}]   ;;  %s9024_s5 = inlined_call_operand.vmem [shape: f32[3,8,1], index: 5, kind: input, shape index: {}]   ;;  %s9025_s6 = inlined_call_operand.vmem [shape: f32[3,8,1], index: 6, kind: input, shape index: {}]   ;;  %s9026_s7 = inlined_call_operand.hbm [shape: f32[2,8,324], index: 7, kind: output, shape index: {}]  }
   0x1   :  { %13 = vsyncpa [#allocation5], 0  ;;  %s7705_s24 = smov [#allocation3]   ;;  %s7657_s28 = scalar_lea.hbm %s9019_s0, 768 }
   0x2   :  { %s20_s25 = sshll.u32 %s7705_s24, 4  ;;  %p7658_p0 = scmp.ne.s32.totalorder %s9019_s0, %s7657_s28  ;;  %s21_s25 = int_to_ptr.vmem [resolvable:$true] %s20_s25 }
   0x3   :  { %p7661_p1 = scmp.lt.u32.totalorder %s7657_s28, %s9019_s0 }
   0x5   :  { %p7663_p2 = pnand %p7661_p1, %p7658_p0 }
   0x7   :  { %7666 = shalt.err (!%p7663_p2)
}
   0x8   :  { %s7667_s10 = scalar_lea.vmem %s21_s25, 768  ;;  %p7672_p4 = scmp.lt.s32.totalorder %s21_s25, %s21_s25 }
   0x9   :  { %p7668_p3 = scmp.ne.s32.totalorder %s21_s25, %s7667_s10  ;;  %p7673_p5 = scmp.lt.s32.totalorder %s7667_s10, %s7667_s10 }
   0xb   :  { %p7674_p6 = por %p7673_p5, %p7672_p4 }
   0xd   :  { %p7675_p7 = pnand %p7674_p6, %p7668_p3 }
   0xf   :  { %7678 = shalt.err (!%p7675_p7)
}
  0x10   :  { %23 = dma.hbm_to_vmem [thread:$0]  %s9019_s0, 768, %s21_s25, [#allocation4]  }
  0x11   :  { %7701 = dma.done.wait [#allocation4], 768  }
  0x12   :  { %7702 = vsyncadd [#allocation4], 4294966528  ;;  %v9027_v0 = vmov 0.0   ;;  %vm50_vm0 = vcmask 375808   ;;  %v7776_v1 = vld [vmem:[#allocation3 + $0x8] sm:$0xff]  ;;  %v7778_v3 = vld [vmem:[#allocation3] sm:$0xff] }
  0x13   :  { %128 = vmatprep.mubr.f32.mxu1 %v9027_v0  ;;  %270 = vmatprep.mubr.f32.mxu0 %v9027_v0  ;;  %v44_v2 = vld [vmem:[#allocation3 + $0x28] sm:$0xff]  ;;  %vm60_vm1 = vcmask 64512   ;;  %v7782_v4 = vld [vmem:[#allocation3 + $0x20] sm:$0xff]  ;;  %v59_v5 = vld [vmem:[%s9021_s2] sm:$0xff]  ;;  %s7708_s30 = smov 126   ;;  %s7709_s8 = smov 110  }
  0x14   :  { %64 = vmatprep.subr.mxu1 %v7776_v1  ;;  %51 = vst.msk [vmem:[#allocation2 + $0x28] sm:$0xff] %vm50_vm0, %v44_v2  ;;  %v7787_v6 = vld [vmem:[#allocation3 + $0x18] sm:$0xff]  ;;  %49 = vst [vmem:[#allocation2 + $0x20] sm:$0xff] %v7782_v4  ;;  %v7791_v7 = vld [vmem:[#allocation3 + $0x10] sm:$0xff]  ;;  %s7710_s9 = smov 109   ;;  %s7711_s10 = smov 108  }
  0x15   :  { %65 = vmatpush1.msra.mxu1 %v7778_v3  ;;  %v7221_v9 = vld [vmem:[%s9021_s2 + $0x8] sm:$0xff]  ;;  %v7225_v10 = vld [vmem:[%s9021_s2 + $0x10] sm:$0xff]  ;;  %v7229_v11 = vld [vmem:[%s9021_s2 + $0x18] sm:$0xff]  ;;  %s7712_s11 = smov 92   ;;  %s7713_s12 = smov 91   ;;  %vm513_vm2 = vcmask 1039360  }
  0x16   :  { %7218 = vmatmul.mubr.msk.f32.vlgmr.msra.gmra.mrb[0].mxu1 %vm60_vm1, %v59_v5  ;;  %135 = vmatprep.subr.mxu1 %v7787_v6  ;;  %v7233_v12 = vld [vmem:[%s9021_s2 + $0x20] sm:$0xff]  ;;  %v7237_v13 = vld [vmem:[%s9021_s2 + $0x28] sm:$0xff]  ;;  %v7241_v14 = vld [vmem:[%s9021_s2 + $0x30] sm:$0xff]  ;;  %s7714_s0 = smov 90   ;;  %vm767_vm3 = vcmask 1031168   ;;  %vm1021_vm4 = vcmask 900096  }
  0x17   :  { %136 = vmatpush1.msra.mxu1 %v7791_v7  ;;  %199 = vmatprep.mubr.f32.mxu1 %v9027_v0  ;;  %v7245_v15 = vld [vmem:[%s9021_s2 + $0x38] sm:$0xff]  ;;  %v7249_v16 = vld [vmem:[%s9021_s2 + $0x40] sm:$0xff]  ;;  %s7707_s2 = smov 127   ;;  %vm1275_vm5 = vcmask 891904   ;;  %vm1529_vm6 = vcmask 883712   ;;  %vm1783_vm7 = vcmask 752640  }
  0x18   :  { %282 = vmatprep.subr.mxu1 %v7776_v1  ;;  %vm2037_vm8 = vcmask 744448   ;;  %vm2291_vm9 = vcmask 736256   ;;  %s7716_s18 = smov 19   ;;  %vm2438_vm10 = vcmask 154624   ;;  %vm7717_vm12 = vmmov 1  }
  0x19   :  { %vm8232_vm11 = vmneg %vm2438_vm10  ;;  %vm2472_vm14 = vcmask 130048   ;;  %vm2451_vm15 = vcmask 220160  }
  0x1a   :  { %7219 = vmatmul.mubr.msk.f32.vlgmr.msra.gmra.mrb[2].mxu1 %vm60_vm1, %v59_v5  ;;  %vm8238_vm13 = vmpackc.low %vm8232_vm11, %vm7717_vm12  ;;  %vm4851_vm12 = vcmask 195584  }
  0x1b   :  { %v7799_v8 = vld [vmem:[#allocation2 + $0x28] sm:$0xff]  ;;  %283 = vmatpush1.msra.mxu1 %v7778_v3  ;;  %346 = vmatprep.mubr.f32.mxu1 %v9027_v0 }
  0x1c   :  { %206 = vmatprep.subr.mxu0 %v7799_v8  ;;  %424 = vmatprep.subr.mxu1 %v7799_v8 }
  0x1d   :  { %207 = vmatpush1.msra.mxu0 %v7782_v4 }
  0x1e   :  { %7220 = vmatmul.mubr.msk.f32.vlgmr.msra.gmra.mrb[0].mxu0 %vm60_vm1, %v59_v5  ;;  %353 = vmatprep.subr.mxu0 %v7787_v6 }
  0x1f   :  { %354 = vmatpush1.msra.mxu0 %v7791_v7  ;;  %417 = vmatprep.mubr.f32.mxu0 %v9027_v0 }
  0x20   :  { %7222 = vmatmul.mubr.msk.f32.vlgmr.msra.gmra.mrb[4].mxu1 %vm60_vm1, %v7221_v9  ;;  %536 = vmatprep.subr.mxu0 %v7776_v1 }
  0x21   :  { %425 = vmatpush1.msra.mxu1 %v7782_v4  ;;  %488 = vmatprep.mubr.f32.mxu1 %v9027_v0 }
  0x22   :  { %7223 = vmatmul.mubr.msk.f32.vlgmr.msra.gmra.mrb[2].mxu0 %vm60_vm1, %v7221_v9  ;;  %607 = vmatprep.subr.mxu1 %v7787_v6 }
  0x23   :  { %537 = vmatpush1.msra.mxu0 %v7778_v3  ;;  %600 = vmatprep.mubr.f32.mxu0 %v9027_v0 }
  0x24   :  { %7224 = vmatmul.mubr.msk.f32.vlgmr.msra.gmra.mrb[6].mxu1 %vm60_vm1, %v7221_v9  ;;  %678 = vmatprep.subr.mxu0 %v7799_v8 }
  0x25   :  { %608 = vmatpush1.msra.mxu1 %v7791_v7  ;;  %671 = vmatprep.mubr.f32.mxu1 %v9027_v0 }
  0x26   :  { %7226 = vmatmul.mubr.msk.f32.vlgmr.msra.gmra.mrb[4].mxu0 %vm60_vm1, %v7225_v10  ;;  %790 = vmatprep.subr.mxu1 %v7776_v1 }
  0x27   :  { %679 = vmatpush1.msra.mxu0 %v7782_v4  ;;  %742 = vmatprep.mubr.f32.mxu0 %v9027_v0 }
  0x28   :  { %861 = vmatprep.subr.mxu0 %v7787_v6  ;;  %7227 = vmatmul.mubr.msk.f32.vlgmr.msra.gmra.mrb[8].mxu1 %vm60_vm1, %v7225_v10 }
  0x29   :  { %791 = vmatpush1.msra.mxu1 %v7778_v3  ;;  %854 = vmatprep.mubr.f32.mxu1 %v9027_v0 }
  0x2a   :  { %7228 = vmatmul.mubr.msk.f32.vlgmr.msra.gmra.mrb[6].mxu0 %vm60_vm1, %v7225_v10  ;;  %932 = vmatprep.subr.mxu1 %v7799_v8 }
  0x2b   :  { %862 = vmatpush1.msra.mxu0 %v7791_v7  ;;  %925 = vmatprep.mubr.f32.mxu0 %v9027_v0 }
  0x2c   :  { %7230 = vmatmul.mubr.msk.f32.vlgmr.msra.gmra.mrb[10].mxu1 %vm60_vm1, %v7229_v11  ;;  %1044 = vmatprep.subr.mxu0 %v7776_v1 }
  0x2d   :  { %933 = vmatpush1.msra.mxu1 %v7782_v4  ;;  %996 = vmatprep.mubr.f32.mxu1 %v9027_v0 }
  0x2e   :  { %7231 = vmatmul.mubr.msk.f32.vlgmr.msra.gmra.mrb[8].mxu0 %vm60_vm1, %v7229_v11  ;;  %1115 = vmatprep.subr.mxu1 %v7787_v6 }
  0x2f   :  { %1045 = vmatpush1.msra.mxu0 %v7778_v3  ;;  %1108 = vmatprep.mubr.f32.mxu0 %v9027_v0 }
  0x30   :  { %7232 = vmatmul.mubr.msk.f32.vlgmr.msra.gmra.mrb[12].mxu1 %vm60_vm1, %v7229_v11  ;;  %1186 = vmatprep.subr.mxu0 %v7799_v8 }
  0x31   :  { %1116 = vmatpush1.msra.mxu1 %v7791_v7  ;;  %1179 = vmatprep.mubr.f32.mxu1 %v9027_v0 }
  0x32   :  { %7234 = vmatmul.mubr.msk.f32.vlgmr.msra.gmra.mrb[10].mxu0 %vm60_vm1, %v7233_v12  ;;  %1298 = vmatprep.subr.mxu1 %v7776_v1 }
  0x33   :  { %1187 = vmatpush1.msra.mxu0 %v7782_v4  ;;  %1250 = vmatprep.mubr.f32.mxu0 %v9027_v0 }
  0x34   :  { %7235 = vmatmul.mubr.msk.f32.vlgmr.msra.gmra.mrb[14].mxu1 %vm60_vm1, %v7233_v12  ;;  %1369 = vmatprep.subr.mxu0 %v7787_v6 }
  0x35   :  { %1299 = vmatpush1.msra.mxu1 %v7778_v3  ;;  %1362 = vmatprep.mubr.f32.mxu1 %v9027_v0 }
  0x36   :  { %7236 = vmatmul.mubr.msk.f32.vlgmr.msra.gmra.mrb[12].mxu0 %vm60_vm1, %v7233_v12  ;;  %1440 = vmatprep.subr.mxu1 %v7799_v8 }
  0x37   :  { %1370 = vmatpush1.msra.mxu0 %v7791_v7  ;;  %1433 = vmatprep.mubr.f32.mxu0 %v9027_v0 }
  0x38   :  { %7238 = vmatmul.mubr.msk.f32.vlgmr.msra.gmra.mrb[16].mxu1 %vm60_vm1, %v7237_v13  ;;  %1552 = vmatprep.subr.mxu0 %v7776_v1 }
  0x39   :  { %1441 = vmatpush1.msra.mxu1 %v7782_v4  ;;  %1504 = vmatprep.mubr.f32.mxu1 %v9027_v0 }
  0x3a   :  { %7239 = vmatmul.mubr.msk.f32.vlgmr.msra.gmra.mrb[14].mxu0 %vm60_vm1, %v7237_v13  ;;  %1623 = vmatprep.subr.mxu1 %v7787_v6 }
  0x3b   :  { %1553 = vmatpush1.msra.mxu0 %v7778_v3  ;;  %1616 = vmatprep.mubr.f32.mxu0 %v9027_v0 }
  0x3c   :  { %7240 = vmatmul.mubr.msk.f32.vlgmr.msra.gmra.mrb[18].mxu1 %vm60_vm1, %v7237_v13  ;;  %1694 = vmatprep.subr.mxu0 %v7799_v8 }
  0x3d   :  { %1624 = vmatpush1.msra.mxu1 %v7791_v7  ;;  %1687 = vmatprep.mubr.f32.mxu1 %v9027_v0 }
  0x3e   :  { %7242 = vmatmul.mubr.msk.f32.vlgmr.msra.gmra.mrb[16].mxu0 %vm60_vm1, %v7241_v14  ;;  %1806 = vmatprep.subr.mxu1 %v7776_v1 }
  0x3f   :  { %1695 = vmatpush1.msra.mxu0 %v7782_v4  ;;  %1758 = vmatprep.mubr.f32.mxu0 %v9027_v0 }
  0x40   :  { %7243 = vmatmul.mubr.msk.f32.vlgmr.msra.gmra.mrb[20].mxu1 %vm60_vm1, %v7241_v14  ;;  %1877 = vmatprep.subr.mxu0 %v7787_v6 }
  0x41   :  { %1807 = vmatpush1.msra.mxu1 %v7778_v3  ;;  %1870 = vmatprep.mubr.f32.mxu1 %v9027_v0 }
  0x42   :  { %7244 = vmatmul.mubr.msk.f32.vlgmr.msra.gmra.mrb[18].mxu0 %vm60_vm1, %v7241_v14  ;;  %1948 = vmatprep.subr.mxu1 %v7799_v8 }
  0x43   :  { %1878 = vmatpush1.msra.mxu0 %v7791_v7  ;;  %1941 = vmatprep.mubr.f32.mxu0 %v9027_v0 }
  0x44   :  { %7246 = vmatmul.mubr.msk.f32.vlgmr.msra.gmra.mrb[22].mxu1 %vm60_vm1, %v7245_v15  ;;  %2060 = vmatprep.subr.mxu0 %v7776_v1 }
  0x45   :  { %1949 = vmatpush1.msra.mxu1 %v7782_v4  ;;  %2012 = vmatprep.mubr.f32.mxu1 %v9027_v0 }
  0x46   :  { %7247 = vmatmul.mubr.msk.f32.vlgmr.msra.gmra.mrb[20].mxu0 %vm60_vm1, %v7245_v15  ;;  %2131 = vmatprep.subr.mxu1 %v7787_v6 }
  0x47   :  { %2061 = vmatpush1.msra.mxu0 %v7778_v3  ;;  %2124 = vmatprep.mubr.f32.mxu0 %v9027_v0 }
  0x48   :  { %7248 = vmatmul.mubr.msk.f32.vlgmr.msra.gmra.mrb[24].mxu1 %vm60_vm1, %v7245_v15  ;;  %2202 = vmatprep.subr.mxu0 %v7799_v8 }
  0x49   :  { %2132 = vmatpush1.msra.mxu1 %v7791_v7  ;;  %2195 = vmatprep.mubr.f32.mxu1 %v9027_v0 }
  0x4a   :  { %7250 = vmatmul.mubr.msk.f32.vlgmr.msra.gmra.mrb[22].mxu0 %vm60_vm1, %v7249_v16 }
  0x4b   :  { %2203 = vmatpush1.msra.mxu0 %v7782_v4  ;;  %2266 = vmatprep.mubr.f32.mxu0 %v9027_v0 }
  0x4c   :  { %7251 = vmatmul.mubr.msk.f32.vlgmr.msra.gmra.mrb[26].mxu1 %vm60_vm1, %v7249_v16 }
  0x4d   :  { %2540 = vmatprep.mubr.f32.mxu1 %v9027_v0 }
  0x4e   :  { %7252 = vmatmul.mubr.msk.f32.vlgmr.msra.gmra.mrb[24].mxu0 %vm60_vm1, %v7249_v16 }
  0x4f   :  { %2611 = vmatprep.mubr.f32.mxu0 %v9027_v0 }
  0xe9   :  { %v7925_v17 = vpop.f32.mrb[0].mxu1 }
  0xea   :  { %v7927_v18 = vpop.f32.mrb[1].mxu1 }
  0xed   :  { %v7929_v19 = vpop.f32.mrb[2].mxu1 }
  0xee   :  { %v7931_v20 = vpop.f32.mrb[3].mxu1 }
  0xf1   :  { %v7933_v21 = vpop.f32.mrb[0].mxu0 }
  0xf2   :  { %v7935_v22 = vpop.f32.mrb[1].mxu0 }
  0xf3   :  { %v348_v23 = vpop.f32.mrb[4].mxu1 }
  0xf4   :  { %501 = vrot.lane.b32.xlu0 %v348_v23, %s7707_s2  ;;  %v350_v24 = vpop.f32.mrb[5].mxu1 }
  0xf5   :  { %v419_v25 = vpop.f32.mrb[2].mxu0 }
  0xf6   :  { %505 = vrot.lane.b32.xlu1 %v419_v25, %s7707_s2  ;;  %v421_v26 = vpop.f32.mrb[3].mxu0 }
  0xf7   :  { %v490_v27 = vpop.f32.mrb[6].mxu1 }
  0xf8   :  { %v492_v28 = vpop.f32.mrb[7].mxu1 }
  0xf9   :  { %v602_v29 = vpop.f32.mrb[4].mxu0 }
  0xfa   :  { %507 = vrot.lane.b32.xlu1 %v421_v26, %s7707_s2  ;;  %v604_v30 = vpop.f32.mrb[5].mxu0  ;;  %755 = vrot.lane.b32.xlu0 %v602_v29, %s7708_s30 }
  0xfb   :  { %v673_v31 = vpop.f32.mrb[8].mxu1 }
  0xfc   :  { %v675_v32 = vpop.f32.mrb[9].mxu1 }
  0xfd   :  { %v744_v33 = vpop.f32.mrb[6].mxu0 }
  0xfe   :  { %757 = vrot.lane.b32.xlu1 %v604_v30, %s7708_s30  ;;  %503 = vrot.lane.b32.xlu0 %v350_v24, %s7707_s2  ;;  %v746_v34 = vpop.f32.mrb[7].mxu0 }
  0xff   :  { %v856_v35 = vpop.f32.mrb[10].mxu1 }
 0x100   :  { %v858_v36 = vpop.f32.mrb[11].mxu1 }
 0x101   :  { %v927_v37 = vpop.f32.mrb[8].mxu0 }
 0x102   :  { %509 = vrot.lane.b32.xlu1 %v490_v27, %s7707_s2  ;;  %511 = vrot.lane.b32.xlu0 %v492_v28, %s7707_s2  ;;  %v929_v38 = vpop.f32.mrb[9].mxu0 }
 0x103   :  { %v998_v39 = vpop.f32.mrb[12].mxu1 }
 0x104   :  { %v1000_v40 = vpop.f32.mrb[13].mxu1 }
 0x105   :  { %v1110_v41 = vpop.f32.mrb[10].mxu0 }
 0x106   :  { %763 = vrot.lane.b32.xlu1 %v744_v33, %s7708_s30  ;;  %765 = vrot.lane.b32.xlu0 %v746_v34, %s7708_s30  ;;  %v1112_v42 = vpop.f32.mrb[11].mxu0 }
 0x107   :  { %v1181_v43 = vpop.f32.mrb[14].mxu1 }
 0x108   :  { %v1183_v44 = vpop.f32.mrb[15].mxu1 }
 0x109   :  { %v1252_v45 = vpop.f32.mrb[12].mxu0 }
 0x10a   :  { %1013 = vrot.lane.b32.xlu1 %v927_v37, %s7709_s8  ;;  %759 = vrot.lane.b32.xlu0 %v673_v31, %s7708_s30  ;;  %v1254_v46 = vpop.f32.mrb[13].mxu0 }
 0x10b   :  { %v1364_v47 = vpop.f32.mrb[16].mxu1 }
 0x10c   :  { %v1366_v48 = vpop.f32.mrb[17].mxu1 }
 0x10d   :  { %v1435_v49 = vpop.f32.mrb[14].mxu0 }
 0x10e   :  { %1009 = vrot.lane.b32.xlu1 %v856_v35, %s7709_s8  ;;  %761 = vrot.lane.b32.xlu0 %v675_v32, %s7708_s30  ;;  %v1437_v50 = vpop.f32.mrb[15].mxu0 }
 0x10f   :  { %v1506_v51 = vpop.f32.mrb[18].mxu1 }
 0x110   :  { %v1508_v52 = vpop.f32.mrb[19].mxu1 }
 0x111   :  { %v1618_v53 = vpop.f32.mrb[16].mxu0 }
 0x112   :  { %1263 = vrot.lane.b32.xlu1 %v1110_v41, %s7710_s9  ;;  %1015 = vrot.lane.b32.xlu0 %v929_v38, %s7709_s8  ;;  %v1620_v54 = vpop.f32.mrb[17].mxu0 }
 0x113   :  { %v1689_v55 = vpop.f32.mrb[20].mxu1 }
 0x114   :  { %v1691_v56 = vpop.f32.mrb[21].mxu1 }
 0x115   :  { %v1760_v57 = vpop.f32.mrb[18].mxu0 }
 0x116   :  { %1017 = vrot.lane.b32.xlu1 %v998_v39, %s7709_s8  ;;  %1011 = vrot.lane.b32.xlu0 %v858_v36, %s7709_s8  ;;  %v1762_v58 = vpop.f32.mrb[19].mxu0 }
 0x117   :  { %v1872_v59 = vpop.f32.mrb[22].mxu1 }
 0x118   :  { %v1874_v60 = vpop.f32.mrb[23].mxu1 }
 0x119   :  { %v1943_v61 = vpop.f32.mrb[20].mxu0 }
 0x11a   :  { %1271 = vrot.lane.b32.xlu1 %v1252_v45, %s7710_s9  ;;  %1265 = vrot.lane.b32.xlu0 %v1112_v42, %s7710_s9  ;;  %v1945_v62 = vpop.f32.mrb[21].mxu0 }
 0x11b   :  { %v2014_v63 = vpop.f32.mrb[24].mxu1 }
 0x11c   :  { %v2016_v2 = vpop.f32.mrb[25].mxu1 }
 0x11d   :  { %v2126_v4 = vpop.f32.mrb[22].mxu0 }
 0x11e   :  { %1267 = vrot.lane.b32.xlu1 %v1181_v43, %s7710_s9  ;;  %1019 = vrot.lane.b32.xlu0 %v1000_v40, %s7709_s8  ;;  %v2128_v5 = vpop.f32.mrb[23].mxu0 }
 0x11f   :  { %v2197_v8 = vpop.f32.mrb[26].mxu1 }
 0x120   :  { %v2199_v9 = vpop.f32.mrb[27].mxu1 }
 0x121   :  { %v2268_v10 = vpop.f32.mrb[24].mxu0 }
 0x122   :  { %1521 = vrot.lane.b32.xlu1 %v1435_v49, %s7711_s10  ;;  %1273 = vrot.lane.b32.xlu0 %v1254_v46, %s7710_s9  ;;  %v2270_v11 = vpop.f32.mrb[25].mxu0 }
 0x126   :  { %1517 = vrot.lane.b32.xlu1 %v1364_v47, %s7711_s10  ;;  %1269 = vrot.lane.b32.xlu0 %v1183_v44, %s7710_s9 }
 0x12a   :  { %1771 = vrot.lane.b32.xlu1 %v1618_v53, %s7712_s11  ;;  %1523 = vrot.lane.b32.xlu0 %v1437_v50, %s7711_s10 }
 0x12e   :  { %1525 = vrot.lane.b32.xlu1 %v1506_v51, %s7711_s10  ;;  %1519 = vrot.lane.b32.xlu0 %v1366_v48, %s7711_s10  ;;  %v2316_v48 = vlaneseq }
 0x130   :  { %v8025_v51 = vshrl.u32 %v2316_v48, 7 }
 0x132   :  { %1779 = vrot.lane.b32.xlu1 %v1760_v57, %s7712_s11  ;;  %1773 = vrot.lane.b32.xlu0 %v1620_v54, %s7712_s11  ;;  %v2326_v57 = vsub.s32 2, %v8025_v51 }
 0x136   :  { %1775 = vrot.lane.b32.xlu1 %v1689_v55, %s7712_s11  ;;  %1527 = vrot.lane.b32.xlu0 %v1508_v52, %s7711_s10  ;;  %v2318_v55 = vsub.s32 0, %v8025_v51 }
 0x13a   :  { %2029 = vrot.lane.b32.xlu1 %v1943_v61, %s7713_s12  ;;  %1781 = vrot.lane.b32.xlu0 %v1762_v58, %s7712_s11  ;;  %v8038_v58 = vld [vmem:[%s9020_s1] sm:$0x3f] }
 0x13e   :  { %2025 = vrot.lane.b32.xlu1 %v1872_v59, %s7713_s12  ;;  %1777 = vrot.lane.b32.xlu0 %v1691_v56, %s7712_s11  ;;  %v2322_v56 = vsub.s32 1, %v8025_v51 }
 0x142   :  { %2279 = vrot.lane.b32.xlu1 %v2126_v4, %s7714_s0  ;;  %2031 = vrot.lane.b32.xlu0 %v1945_v62, %s7713_s12  ;;  %v8051_v4 = vrot.slane %v8038_v58, %v2322_v56 }
 0x146   :  { %2033 = vrot.lane.b32.xlu1 %v2014_v63, %s7713_s12  ;;  %2027 = vrot.lane.b32.xlu0 %v1874_v60, %s7713_s12 }
 0x14a   :  { %2283 = vrot.lane.b32.xlu1 %v2197_v8, %s7714_s0  ;;  %2281 = vrot.lane.b32.xlu0 %v2128_v5, %s7714_s0  ;;  %v8054_v5 = vrot.slane %v8038_v58, %v2326_v57 }
 0x14e   :  { %2035 = vrot.lane.b32.xlu1 %v2016_v2, %s7713_s12  ;;  %2285 = vrot.lane.b32.xlu0 %v2199_v9, %s7714_s0  ;;  %v8048_v2 = vrot.slane %v8038_v58, %v2318_v55  ;;  %v2330_v9 = vsub.s32 3, %v8025_v51 }
 0x152   :  { %2289 = vrot.lane.b32.xlu1 %v2270_v11, %s7714_s0  ;;  %2287 = vrot.lane.b32.xlu0 %v2268_v10, %s7714_s0  ;;  %v2338_v10 = vsub.s32 5, %v8025_v51 }
 0x166   :  { %v502_v12 = vpop.permute.xlu0 %501 }
 0x168   :  { %v506_v13 = vpop.permute.xlu1 %505 }
 0x16c   :  { %v508_v14 = vpop.permute.xlu1 %507  ;;  %v756_v15 = vpop.permute.xlu0 %755 }
 0x16d   :  { %v516_v59 = vsel %vm513_vm2, %v506_v13, %v508_v14 }
 0x16e   :  { %v527_v8 = vadd.f32 %v516_v59, %v7929_v19 }
 0x170   :  { %v758_v16 = vpop.permute.xlu1 %757  ;;  %v504_v23 = vpop.permute.xlu0 %503 }
 0x171   :  { %v514_v54 = vsel %vm513_vm2, %v502_v12, %v504_v23  ;;  %v515_v60 = vsel %vm513_vm2, %v504_v23, %v506_v13  ;;  %v768_v11 = vsel %vm767_vm3, %v756_v15, %v758_v16 }
 0x172   :  { %v525_v61 = vadd.f32 %v514_v54, %v7925_v17  ;;  %v526_v12 = vadd.f32 %v515_v60, %v7927_v18 }
 0x174   :  { %v510_v24 = vpop.permute.xlu1 %509  ;;  %v512_v25 = vpop.permute.xlu0 %511 }
 0x175   :  { %v517_v17 = vsel %vm513_vm2, %v508_v14, %v510_v24  ;;  %v518_v13 = vsel %vm513_vm2, %v510_v24, %v512_v25  ;;  %v530_v48 = vadd.f32 %v512_v25, %v7935_v22  ;;  %v779_v14 = vadd.f32 %v768_v11, %v525_v61 }
 0x176   :  { %v528_v15 = vadd.f32 %v517_v17, %v7931_v20  ;;  %v529_v24 = vadd.f32 %v518_v13, %v7933_v21 }
 0x178   :  { %v7985_v26 = vpop.permute.xlu1 %763  ;;  %v7987_v27 = vpop.permute.xlu0 %765 }
 0x179   :  { %v772_v18 = vsel %vm767_vm3, %v7985_v26, %v7987_v27 }
 0x17c   :  { %v7989_v28 = vpop.permute.xlu1 %1013  ;;  %v760_v29 = vpop.permute.xlu0 %759 }
 0x17d   :  { %v769_v23 = vsel %vm767_vm3, %v758_v16, %v760_v29 }
 0x17e   :  { %v780_v25 = vadd.f32 %v769_v23, %v526_v12 }
 0x180   :  { %v1010_v30 = vpop.permute.xlu1 %1009  ;;  %v762_v31 = vpop.permute.xlu0 %761 }
 0x181   :  { %v770_v54 = vsel %vm767_vm3, %v760_v29, %v762_v31  ;;  %v771_v19 = vsel %vm767_vm3, %v762_v31, %v7985_v26 }
 0x182   :  { %v781_v31 = vadd.f32 %v770_v54, %v527_v8  ;;  %v782_v57 = vadd.f32 %v771_v19, %v528_v15 }
 0x184   :  { %v7991_v32 = vpop.permute.xlu1 %1263  ;;  %v7993_v33 = vpop.permute.xlu0 %1015 }
 0x185   :  { %v1024_v29 = vsel %vm1021_vm4, %v7989_v28, %v7993_v33 }
 0x186   :  { %v1035_v17 = vadd.f32 %v1024_v29, %v781_v31 }
 0x188   :  { %v7995_v34 = vpop.permute.xlu1 %1017  ;;  %v1012_v35 = vpop.permute.xlu0 %1011 }
 0x189   :  { %v1022_v16 = vsel %vm1021_vm4, %v1010_v30, %v1012_v35  ;;  %v1023_v22 = vsel %vm1021_vm4, %v1012_v35, %v7989_v28  ;;  %v1025_v20 = vsel %vm1021_vm4, %v7993_v33, %v7995_v34  ;;  %v783_v30 = vadd.f32 %v772_v18, %v529_v24 }
 0x18a   :  { %v784_v35 = vadd.f32 %v7987_v27, %v530_v48  ;;  %v1033_v59 = vadd.f32 %v1022_v16, %v779_v14  ;;  %v1034_v28 = vadd.f32 %v1023_v22, %v780_v25  ;;  %v1036_v33 = vadd.f32 %v1025_v20, %v782_v57 }
 0x18c   :  { %v7997_v36 = vpop.permute.xlu1 %1271  ;;  %v7999_v37 = vpop.permute.xlu0 %1265 }
 0x18d   :  { %v1276_v26 = vsel %vm1275_vm5, %v7991_v32, %v7999_v37 }
 0x18e   :  { %v1287_v11 = vadd.f32 %v1276_v26, %v1033_v59 }
 0x190   :  { %v8001_v38 = vpop.permute.xlu1 %1267  ;;  %v8003_v39 = vpop.permute.xlu0 %1019 }
 0x191   :  { %v1277_v21 = vsel %vm1275_vm5, %v7999_v37, %v8001_v38  ;;  %v1026_v27 = vsel %vm1021_vm4, %v7995_v34, %v8003_v39  ;;  %v1038_v13 = vadd.f32 %v8003_v39, %v784_v35 }
 0x192   :  { %v1288_v12 = vadd.f32 %v1277_v21, %v1034_v28  ;;  %v1037_v14 = vadd.f32 %v1026_v27, %v783_v30 }
 0x194   :  { %v8005_v40 = vpop.permute.xlu1 %1521  ;;  %v8007_v41 = vpop.permute.xlu0 %1273 }
 0x198   :  { %v8009_v42 = vpop.permute.xlu1 %1517  ;;  %v8011_v43 = vpop.permute.xlu0 %1269 }
 0x199   :  { %v1278_v37 = vsel %vm1275_vm5, %v8001_v38, %v8011_v43  ;;  %v1279_v34 = vsel %vm1275_vm5, %v8011_v43, %v7997_v36 }
 0x19a   :  { %v1289_v15 = vadd.f32 %v1278_v37, %v1035_v17  ;;  %v1290_v24 = vadd.f32 %v1279_v34, %v1036_v33 }
 0x19c   :  { %v8013_v44 = vpop.permute.xlu1 %1771  ;;  %v8015_v45 = vpop.permute.xlu0 %1523 }
 0x19d   :  { %v1532_v38 = vsel %vm1529_vm6, %v8005_v40, %v8015_v45 }
 0x1a0   :  { %v8017_v46 = vpop.permute.xlu1 %1525  ;;  %v8019_v47 = vpop.permute.xlu0 %1519 }
 0x1a1   :  { %v1530_v8 = vsel %vm1529_vm6, %v8009_v42, %v8019_v47  ;;  %v1531_v32 = vsel %vm1529_vm6, %v8019_v47, %v8005_v40  ;;  %v1280_v42 = vsel %vm1275_vm5, %v7997_v36, %v8007_v41  ;;  %v2334_v36 = vsub.s32 4, %v8025_v51 }
 0x1a2   :  { %v1541_v39 = vadd.f32 %v1530_v8, %v1287_v11  ;;  %v1542_v48 = vadd.f32 %v1531_v32, %v1288_v12  ;;  %v1291_v43 = vadd.f32 %v1280_v42, %v1037_v14  ;;  %v1543_v40 = vadd.f32 %v1532_v38, %v1289_v15 }
 0x1a3   :  { %v8183_v51 = vrot.slane %v8038_v58, %v2334_v36 }
 0x1a4   :  { %v8021_v49 = vpop.permute.xlu1 %1779  ;;  %v8023_v50 = vpop.permute.xlu0 %1773 }
 0x1a5   :  { %v1784_v47 = vsel %vm1783_vm7, %v8013_v44, %v8023_v50 }
 0x1a6   :  { %v1795_v16 = vadd.f32 %v1784_v47, %v1541_v39 }
 0x1a8   :  { %v8027_v52 = vpop.permute.xlu1 %1775  ;;  %v8029_v53 = vpop.permute.xlu0 %1527 }
 0x1a9   :  { %v1785_v23 = vsel %vm1783_vm7, %v8023_v50, %v8027_v52  ;;  %v1292_v50 = vadd.f32 %v8007_v41, %v1038_v13  ;;  %v1534_v29 = vsel %vm1529_vm6, %v8017_v46, %v8029_v53 }
 0x1aa   :  { %v1796_v22 = vadd.f32 %v1785_v23, %v1542_v48  ;;  %v1545_v17 = vadd.f32 %v1534_v29, %v1291_v43 }
 0x1ab   :  { %v1546_v26 = vadd.f32 %v8029_v53, %v1292_v50 }
 0x1ac   :  { %v8043_v62 = vpop.permute.xlu1 %2029  ;;  %v8045_v63 = vpop.permute.xlu0 %1781 }
 0x1b0   :  { %v2026_v55 = vpop.permute.xlu1 %2025  ;;  %v8068_v56 = vpop.permute.xlu0 %1777 }
 0x1b1   :  { %v1786_v25 = vsel %vm1783_vm7, %v8027_v52, %v8068_v56  ;;  %v1787_v53 = vsel %vm1783_vm7, %v8068_v56, %v8021_v49 }
 0x1b2   :  { %v1797_v35 = vadd.f32 %v1786_v25, %v1543_v40 }
 0x1b4   :  { %v2280_v60 = vpop.permute.xlu1 %2279  ;;  %v2032_v61 = vpop.permute.xlu0 %2031 }
 0x1b5   :  { %v2040_v21 = vsel %vm2037_vm8, %v8043_v62, %v2032_v61 }
 0x1b6   :  { %v2051_v33 = vadd.f32 %v2040_v21, %v1797_v35 }
 0x1b8   :  { %v2034_v54 = vpop.permute.xlu1 %2033  ;;  %v2028_v19 = vpop.permute.xlu0 %2027 }
 0x1b9   :  { %v2038_v44 = vsel %vm2037_vm8, %v2026_v55, %v2028_v19  ;;  %v2039_v18 = vsel %vm2037_vm8, %v2028_v19, %v8043_v62  ;;  %v1533_v55 = vsel %vm1529_vm6, %v8015_v45, %v8017_v46  ;;  %v1788_v45 = vsel %vm1783_vm7, %v8021_v49, %v8045_v63 }
 0x1ba   :  { %v2049_v41 = vadd.f32 %v2038_v44, %v1795_v16  ;;  %v2050_v20 = vadd.f32 %v2039_v18, %v1796_v22  ;;  %v1544_v28 = vadd.f32 %v1533_v55, %v1290_v24  ;;  %v8151_v62 = vrot.slane %v8038_v58, %v2338_v10 }
 0x1bb   :  { %v1799_v27 = vadd.f32 %v1788_v45, %v1545_v17  ;;  %v2041_v37 = vsel %vm2037_vm8, %v2032_v61, %v2034_v54  ;;  %v8172_v61 = vrot.slane %v8038_v58, %v2330_v9 }
 0x1bc   :  { %v2284_v31 = vpop.permute.xlu1 %2283  ;;  %v2282_v57 = vpop.permute.xlu0 %2281  ;;  %v1798_v10 = vadd.f32 %v1787_v53, %v1544_v28  ;;  %v7715_v53 = vmov 0  }
 0x1bd   :  { %v2292_v30 = vsel %vm2291_vm9, %v2280_v60, %v2282_v57  ;;  %v2293_v52 = vsel %vm2291_vm9, %v2282_v57, %v2284_v31  ;;  %v1800_v60 = vadd.f32 %v8045_v63, %v1546_v26  ;;  %7559 = vset.pattern.permute.xlu0 %v7715_v53  ;;  %7560 = vset.pattern.permute.xlu1 %v7715_v53 }
 0x1be   :  { %v8141_v59 = vadd.f32 %v2292_v30, %v2049_v41  ;;  %v8143_v46 = vadd.f32 %v2293_v52, %v2050_v20  ;;  %v2052_v38 = vadd.f32 %v2041_v37, %v1798_v10 }
 0x1c0   :  { %v2309_v8 = vmul.f32 %v8141_v59, %v8141_v59  ;;  %v2310_v32 = vmul.f32 %v8143_v46, %v8143_v46  ;;  %v2036_v11 = vpop.permute.xlu1 %2035  ;;  %v2286_v12 = vpop.permute.xlu0 %2285  ;;  %v2346_v63 = vmul.f32 %v8048_v2, %v8141_v59  ;;  %v2347_v13 = vmul.f32 %v8051_v4, %v8143_v46 }
 0x1c1   :  { %v2042_v49 = vsel %vm2037_vm8, %v2034_v54, %v2036_v11  ;;  %v2294_v56 = vsel %vm2291_vm9, %v2284_v31, %v2286_v12  ;;  %v2054_v34 = vadd.f32 %v2036_v11, %v1800_v60 }
 0x1c2   :  { %v8165_v42 = vadd.f32 %v2294_v56, %v2051_v33  ;;  %v2352_v47 = vmul.f32 %v8048_v2, %v2309_v8  ;;  %v2353_v23 = vmul.f32 %v8051_v4, %v2310_v32  ;;  %v2053_v39 = vadd.f32 %v2042_v49, %v1799_v27  ;;  %v2379_v49 = vld [vmem:[%s9024_s5] sm:$0xff] }
 0x1c3   :  { %v2358_v16 = vadd.f32 %v2347_v13, %v2346_v63  ;;  %v2383_v63 = vld [vmem:[%s9025_s6] sm:$0xff] }
 0x1c4   :  { %v2290_v48 = vpop.permute.xlu1 %2289  ;;  %v2311_v54 = vmul.f32 %v8165_v42, %v8165_v42  ;;  %v2348_v19 = vmul.f32 %v8054_v5, %v8165_v42  ;;  %v2288_v14 = vpop.permute.xlu0 %2287  ;;  %v2366_v24 = vadd.f32 %v2353_v23, %v2352_v47 }
 0x1c5   :  { %v8178_v15 = vadd.f32 %v2290_v48, %v2054_v34  ;;  %v2295_v44 = vsel %vm2291_vm9, %v2286_v12, %v2288_v14  ;;  %v2296_v18 = vsel %vm2291_vm9, %v2288_v14, %v2290_v48 }
 0x1c6   :  { %v2306_v9 = vadd.f32 %v2295_v44, %v2052_v38  ;;  %v8185_v50 = vadd.f32 %v2296_v18, %v2053_v39  ;;  %v2354_v22 = vmul.f32 %v8054_v5, %v2311_v54  ;;  %v2359_v55 = vadd.f32 %v2358_v16, %v2348_v19 }
 0x1c7   :  { %v2314_v43 = vmul.f32 %v8178_v15, %v8178_v15  ;;  %v2351_v58 = vmul.f32 %v8151_v62, %v8178_v15 }
 0x1c8   :  { %v2312_v40 = vmul.f32 %v2306_v9, %v2306_v9  ;;  %v2349_v25 = vmul.f32 %v8172_v61, %v2306_v9  ;;  %v2313_v29 = vmul.f32 %v8185_v50, %v8185_v50  ;;  %v2350_v36 = vmul.f32 %v8183_v51, %v8185_v50 }
 0x1c9   :  { %v2367_v31 = vadd.f32 %v2366_v24, %v2354_v22  ;;  %v2357_v57 = vmul.f32 %v8151_v62, %v2314_v43  ;;  %v2362_v52 = vsel %vm60_vm1, %v2351_v58, 0.0 }
 0x1ca   :  { %v2360_v41 = vadd.f32 %v2359_v55, %v2349_v25  ;;  %v2355_v20 = vmul.f32 %v8172_v61, %v2312_v40  ;;  %v2356_v21 = vmul.f32 %v8183_v51, %v2313_v29 }
 0x1cb   :  { %v2370_v28 = vsel %vm60_vm1, %v2357_v57, 0.0 }
 0x1cc   :  { %v2361_v26 = vadd.f32 %v2360_v41, %v2350_v36  ;;  %v2368_v30 = vadd.f32 %v2367_v31, %v2355_v20 }
 0x1ce   :  { %v2363_v45 = vadd.f32 %v2362_v52, %v2361_v26  ;;  %v2369_v35 = vadd.f32 %v2368_v30, %v2356_v21  ;;  %v9039_v52 = vmov 0 }
 0x1cf   :  { %v9040_v52 = vsel %vm8238_vm13, 4294967295, %v9039_v52 }
 0x1d0   :  { %2364 = vadd.xlane.f32.xlu0 %v2363_v45  ;;  %v2371_v17 = vadd.f32 %v2370_v28, %v2369_v35  ;;  %9041 = vst [vmem:[#allocation9_spill] sm:$0xff] %v9040_v52  ;;  %v2471_v45 = vld [vmem:[%s9022_s3] sm:$0xff] }
 0x1d2   :  { %2372 = vadd.xlane.f32.xlu1 %v2371_v17 }
 0x25d   :  { %v2365_v60 = vpop.xlane.xlu0 %2364 }
 0x25e   :  { %v2374_v33 = vmul.f32 0.001953125, %v2365_v60 }
 0x25f   :  { %v2373_v8 = vpop.xlane.xlu1 %2372 }
 0x260   :  { %v2376_v32 = vmul.f32 %v2374_v33, %v2374_v33  ;;  %v2375_v11 = vmul.f32 0.001953125, %v2373_v8 }
 0x262   :  { %v2377_v12 = vsub.f32 %v2375_v11, %v2376_v32  ;;  %v2464_v32 = vld [vmem:[#allocation2 + $0x28] sm:$0xff]  ;;  %v2463_v11 = vld [vmem:[#allocation2 + $0x20] sm:$0xff] }
 0x264   :  { %v2378_v27 = vmax.f32 %v2377_v12, 0.0 }
 0x266   :  { %v2380_v37 = vadd.f32 1e-05, %v2378_v27 }
 0x268   :  { %7561 = vrsqrt.f32 %v2380_v37 }
 0x272   :  { %v7562_v56 = vpop.eup %7561 }
 0x273   :  { %v2382_v10 = vmul.f32 %v7562_v56, %v2379_v49  ;;  %v7260_v49 = vld [vmem:[%s9022_s3 + $0x10] sm:$0xff]  ;;  %v7264_v56 = vld [vmem:[%s9022_s3 + $0x18] sm:$0xff] }
 0x275   :  { %2388 = vperm.xlu0 %7559, %v2382_v10   ;;  %v2384_v13 = vmul.f32 %v2382_v10, %v2374_v33  ;;  %v7268_v10 = vld [vmem:[%s9022_s3 + $0x20] sm:$0xff] }
 0x277   :  { %v2385_v47 = vsub.f32 %v2383_v63, %v2384_v13  ;;  %v7272_v63 = vld [vmem:[%s9022_s3 + $0x28] sm:$0xff]  ;;  %v7276_v13 = vld [vmem:[%s9022_s3 + $0x30] sm:$0xff] }
 0x279   :  { %2399 = vperm.xlu1 %7560, %v2385_v47   ;;  %v7280_v47 = vld [vmem:[%s9022_s3 + $0x38] sm:$0xff] }
 0x2f4   :  { %v2389_v23 = vpop.permute.xlu0 %2388 }
 0x2f5   :  { %v2391_v34 = vmul.f32 %v2389_v23, %v8141_v59  ;;  %v2392_v38 = vmul.f32 %v2389_v23, %v8143_v46  ;;  %v2393_v14 = vmul.f32 %v2389_v23, %v8165_v42  ;;  %v2394_v22 = vmul.f32 %v2389_v23, %v2306_v9 }
 0x2f6   :  { %v2395_v46 = vmul.f32 %v2389_v23, %v8185_v50  ;;  %v2396_v55 = vmul.f32 %v2389_v23, %v8178_v15  ;;  %v7284_v23 = vld [vmem:[%s9022_s3 + $0x40] sm:$0xff] }
 0x2f8   :  { %v2400_v39 = vpop.permute.xlu1 %2399 }
 0x2f9   :  { %v2402_v48 = vadd.f32 %v2400_v39, %v2391_v34  ;;  %v2403_v54 = vadd.f32 %v2400_v39, %v2392_v38  ;;  %v2404_v16 = vadd.f32 %v2400_v39, %v2393_v14  ;;  %v2405_v59 = vadd.f32 %v2400_v39, %v2394_v22 }
 0x2fa   :  { %v2406_v42 = vadd.f32 %v2400_v39, %v2395_v46  ;;  %v2407_v9 = vadd.f32 %v2400_v39, %v2396_v55 }
 0x2fb   :  { %v2408_v19 = vmax.f32 %v2402_v48, 0.0  ;;  %v2409_v18 = vmax.f32 %v2403_v54, 0.0  ;;  %v2410_v24 = vmax.f32 %v2404_v16, 0.0  ;;  %v2411_v25 = vmax.f32 %v2405_v59, 0.0 }
 0x2fc   :  { %v2412_v58 = vmax.f32 %v2406_v42, 0.0  ;;  %v2413_v41 = vmax.f32 %v2407_v9, 0.0 }
 0x2fd   :  { %v2414_v44 = vmul.f32 %v2408_v19, %v8048_v2  ;;  %v2415_v43 = vmul.f32 %v2409_v18, %v8051_v4  ;;  %v2416_v40 = vmul.f32 %v2410_v24, %v8054_v5  ;;  %v2417_v29 = vmul.f32 %v2411_v25, %v8172_v61 }
 0x2fe   :  { %v2418_v36 = vmul.f32 %v2412_v58, %v8183_v51  ;;  %v2419_v50 = vmul.f32 %v2413_v41, %v8151_v62 }
 0x2ff   :  { %2426 = vrot.lane.b32.xlu1 %v2414_v44, %s7716_s18 }
 0x303   :  { %2428 = vrot.lane.b32.xlu1 %v2415_v43, %s7716_s18 }
 0x307   :  { %2430 = vrot.lane.b32.xlu1 %v2416_v40, %s7716_s18 }
 0x30b   :  { %2432 = vrot.lane.b32.xlu1 %v2417_v29, %s7716_s18 }
 0x30f   :  { %2434 = vrot.lane.b32.xlu1 %v2418_v36, %s7716_s18 }
 0x313   :  { %2436 = vrot.lane.b32.xlu1 %v2419_v50, %s7716_s18 }
 0x371   :  { %v2427_v20 = vpop.permute.xlu1 %2426 }
 0x375   :  { %v2429_v31 = vpop.permute.xlu1 %2428 }
 0x376   :  { %v2439_v15 = vsel %vm2438_vm10, %v2427_v20, %v2429_v31 }
 0x377   :  { %v8227_v57 = vpack.c.bf16 %v2439_v15, %v7776_v1  ;;  %v8243_v1 = vpack.c.bf16 %v2427_v20, %v7778_v3 }
 0x379   :  { %v2431_v26 = vpop.permute.xlu1 %2430  ;;  %7328 = vmatprep.subr.bf16.mxu1 %v8227_v57  ;;  %9042 = vst [vmem:[#allocation10_spill] sm:$0xff] %v8243_v1 }
 0x37a   :  { %v2440_v21 = vsel %vm2438_vm10, %v2429_v31, %v2431_v26  ;;  %7570 = vmatpush1.bf16.msk.msra.mxu1 %vm8238_vm13, %v8243_v1 }
 0x37b   :  { %v8258_v3 = vpack.c.bf16 %v2440_v21, %v7791_v7 }
 0x37d   :  { %v2433_v35 = vpop.permute.xlu1 %2432  ;;  %7253 = vmatmul.mubr.msk.f32.vlgmr.msra.gmra.mrb[28].mxu1 %vm2472_vm14, %v2471_v45  ;;  %9044 = vst [vmem:[#allocation12_spill] sm:$0xff] %v8258_v3 }
 0x37e   :  { %v2441_v28 = vsel %vm2438_vm10, %v2431_v26, %v2433_v35  ;;  %2682 = vmatprep.mubr.f32.mxu1 %v9027_v0 }
 0x37f   :  { %v8255_v17 = vpack.c.bf16 %v2441_v28, %v7787_v6  ;;  %v7256_v6 = vld [vmem:[%s9022_s3 + $0x8] sm:$0xff] }
 0x381   :  { %9043 = vst [vmem:[#allocation11_spill] sm:$0xff] %v8255_v17  ;;  %v2435_v53 = vpop.permute.xlu1 %2434  ;;  %7332 = vmatprep.subr.bf16.mxu0 %v8255_v17 }
 0x382   :  { %v2442_v60 = vsel %vm2438_vm10, %v2433_v35, %v2435_v53  ;;  %7334 = vmatpush1.bf16.msra.mxu0 %v8258_v3 }
 0x383   :  { %7340 = vmatprep.subr.bf16.mxu0 %v8227_v57  ;;  %v8279_v37 = vpack.c.bf16 %v2442_v60, %v2463_v11 }
 0x385   :  { %v2437_v33 = vpop.permute.xlu1 %2436  ;;  %7254 = vmatmul.mubr.msk.f32.vlgmr.msra.gmra.mrb[26].mxu0 %vm2472_vm14, %v2471_v45 }
 0x386   :  { %v2443_v8 = vsel %vm2438_vm10, %v2435_v53, %v2437_v33  ;;  %7574 = vmatpush1.bf16.msk.msra.mxu0 %vm8238_vm13, %v8243_v1  ;;  %2758 = vmatprep.mubr.f32.mxu0 %v9027_v0 }
 0x387   :  { %v2452_v7 = vsel %vm2451_vm15, %v2443_v8, 0.0 }
 0x388   :  { %2458 = vst.msk [vmem:[#allocation2 + $0x58] sm:$0xff] %vm50_vm0, %v2452_v7 }
 0x389   :  { %7257 = vmatmul.mubr.msk.f32.vlgmr.msra.gmra.mrb[28].mxu0 %vm2472_vm14, %v7256_v6 }
 0x38a   :  { %2900 = vmatprep.mubr.f32.mxu0 %v9027_v0 }
 0x38f   :  { %v2470_v12 = vld [vmem:[#allocation2 + $0x58] sm:$0xff] }
 0x390   :  { %v8277_v27 = vpack.c.bf16 %v2470_v12, %v2464_v32 }
 0x392   :  { %7336 = vmatprep.subr.bf16.mxu1 %v8277_v27  ;;  %7348 = vmatprep.subr.bf16.mxu0 %v8277_v27 }
 0x393   :  { %7338 = vmatpush1.bf16.msra.mxu1 %v8279_v37  ;;  %7350 = vmatpush1.bf16.msra.mxu0 %v8279_v37 }
 0x394   :  { %7344 = vmatprep.subr.bf16.mxu1 %v8255_v17  ;;  %7356 = vmatprep.subr.bf16.mxu0 %v8255_v17 }
 0x396   :  { %7255 = vmatmul.mubr.msk.f32.vlgmr.msra.gmra.mrb[30].mxu1 %vm2472_vm14, %v2471_v45  ;;  %7259 = vmatmul.mubr.msk.f32.vlgmr.msra.gmra.mrb[30].mxu0 %vm2472_vm14, %v7256_v6 }
 0x397   :  { %7346 = vmatpush1.bf16.msra.mxu1 %v8258_v3  ;;  %7358 = vmatpush1.bf16.msra.mxu0 %v8258_v3 }
 0x398   :  { %7352 = vmatprep.subr.bf16.mxu1 %v8227_v57  ;;  %7364 = vmatprep.subr.bf16.mxu0 %v8227_v57 }
 0x399   :  { %2829 = vmatprep.mubr.f32.mxu1 %v9027_v0  ;;  %3082 = vmatprep.mubr.f32.mxu0 %v9027_v0 }
 0x39a   :  { %7258 = vmatmul.mubr.msk.f32.vlgmr.msra.gmra.mrb[32].mxu1 %vm2472_vm14, %v7256_v6  ;;  %7262 = vmatmul.mubr.msk.f32.vlgmr.msra.gmra.mrb[32].mxu0 %vm2472_vm14, %v7260_v49 }
 0x39b   :  { %7578 = vmatpush1.bf16.msk.msra.mxu1 %vm8238_vm13, %v8243_v1  ;;  %7582 = vmatpush1.bf16.msk.msra.mxu0 %vm8238_vm13, %v8243_v1 }
 0x39c   :  { %7360 = vmatprep.subr.bf16.mxu1 %v8277_v27  ;;  %7372 = vmatprep.subr.bf16.mxu0 %v8277_v27 }
 0x39d   :  { %3011 = vmatprep.mubr.f32.mxu1 %v9027_v0  ;;  %3264 = vmatprep.mubr.f32.mxu0 %v9027_v0 }
 0x39e   :  { %7261 = vmatmul.mubr.msk.f32.vlgmr.msra.gmra.mrb[34].mxu1 %vm2472_vm14, %v7260_v49  ;;  %7265 = vmatmul.mubr.msk.f32.vlgmr.msra.gmra.mrb[34].mxu0 %vm2472_vm14, %v7264_v56 }
 0x39f   :  { %7362 = vmatpush1.bf16.msra.mxu1 %v8279_v37  ;;  %7374 = vmatpush1.bf16.msra.mxu0 %v8279_v37 }
 0x3a0   :  { %7368 = vmatprep.subr.bf16.mxu1 %v8255_v17  ;;  %7380 = vmatprep.subr.bf16.mxu0 %v8255_v17 }
 0x3a1   :  { %3153 = vmatprep.mubr.f32.mxu1 %v9027_v0  ;;  %3406 = vmatprep.mubr.f32.mxu0 %v9027_v0 }
 0x3a2   :  { %7263 = vmatmul.mubr.msk.f32.vlgmr.msra.gmra.mrb[36].mxu1 %vm2472_vm14, %v7260_v49  ;;  %7267 = vmatmul.mubr.msk.f32.vlgmr.msra.gmra.mrb[36].mxu0 %vm2472_vm14, %v7264_v56 }
 0x3a3   :  { %7370 = vmatpush1.bf16.msra.mxu1 %v8258_v3  ;;  %7382 = vmatpush1.bf16.msra.mxu0 %v8258_v3 }
 0x3a4   :  { %7376 = vmatprep.subr.bf16.mxu1 %v8227_v57  ;;  %7388 = vmatprep.subr.bf16.mxu0 %v8227_v57 }
 0x3a5   :  { %3335 = vmatprep.mubr.f32.mxu1 %v9027_v0  ;;  %3588 = vmatprep.mubr.f32.mxu0 %v9027_v0 }
 0x3a6   :  { %7266 = vmatmul.mubr.msk.f32.vlgmr.msra.gmra.mrb[38].mxu1 %vm2472_vm14, %v7264_v56  ;;  %7270 = vmatmul.mubr.msk.f32.vlgmr.msra.gmra.mrb[38].mxu0 %vm2472_vm14, %v7268_v10 }
 0x3a7   :  { %7586 = vmatpush1.bf16.msk.msra.mxu1 %vm8238_vm13, %v8243_v1  ;;  %7590 = vmatpush1.bf16.msk.msra.mxu0 %vm8238_vm13, %v8243_v1 }
 0x3a8   :  { %7384 = vmatprep.subr.bf16.mxu1 %v8277_v27  ;;  %7396 = vmatprep.subr.bf16.mxu0 %v8277_v27 }
 0x3a9   :  { %3517 = vmatprep.mubr.f32.mxu1 %v9027_v0  ;;  %3770 = vmatprep.mubr.f32.mxu0 %v9027_v0 }
 0x3aa   :  { %7269 = vmatmul.mubr.msk.f32.vlgmr.msra.gmra.mrb[40].mxu1 %vm2472_vm14, %v7268_v10  ;;  %7273 = vmatmul.mubr.msk.f32.vlgmr.msra.gmra.mrb[40].mxu0 %vm2472_vm14, %v7272_v63 }
 0x3ab   :  { %7386 = vmatpush1.bf16.msra.mxu1 %v8279_v37  ;;  %7398 = vmatpush1.bf16.msra.mxu0 %v8279_v37 }
 0x3ac   :  { %7392 = vmatprep.subr.bf16.mxu1 %v8255_v17  ;;  %7404 = vmatprep.subr.bf16.mxu0 %v8255_v17 }
 0x3ad   :  { %3659 = vmatprep.mubr.f32.mxu1 %v9027_v0  ;;  %3912 = vmatprep.mubr.f32.mxu0 %v9027_v0 }
 0x3ae   :  { %7271 = vmatmul.mubr.msk.f32.vlgmr.msra.gmra.mrb[42].mxu1 %vm2472_vm14, %v7268_v10  ;;  %7275 = vmatmul.mubr.msk.f32.vlgmr.msra.gmra.mrb[42].mxu0 %vm2472_vm14, %v7272_v63 }
 0x3af   :  { %7394 = vmatpush1.bf16.msra.mxu1 %v8258_v3  ;;  %7406 = vmatpush1.bf16.msra.mxu0 %v8258_v3 }
 0x3b0   :  { %7400 = vmatprep.subr.bf16.mxu1 %v8227_v57  ;;  %7412 = vmatprep.subr.bf16.mxu0 %v8227_v57 }
 0x3b1   :  { %3841 = vmatprep.mubr.f32.mxu1 %v9027_v0  ;;  %4094 = vmatprep.mubr.f32.mxu0 %v9027_v0 }
 0x3b2   :  { %7274 = vmatmul.mubr.msk.f32.vlgmr.msra.gmra.mrb[44].mxu1 %vm2472_vm14, %v7272_v63  ;;  %7278 = vmatmul.mubr.msk.f32.vlgmr.msra.gmra.mrb[44].mxu0 %vm2472_vm14, %v7276_v13 }
 0x3b3   :  { %7594 = vmatpush1.bf16.msk.msra.mxu1 %vm8238_vm13, %v8243_v1  ;;  %7598 = vmatpush1.bf16.msk.msra.mxu0 %vm8238_vm13, %v8243_v1 }
 0x3b4   :  { %7408 = vmatprep.subr.bf16.mxu1 %v8277_v27  ;;  %7420 = vmatprep.subr.bf16.mxu0 %v8277_v27 }
 0x3b5   :  { %4023 = vmatprep.mubr.f32.mxu1 %v9027_v0  ;;  %4276 = vmatprep.mubr.f32.mxu0 %v9027_v0 }
 0x3b6   :  { %7277 = vmatmul.mubr.msk.f32.vlgmr.msra.gmra.mrb[46].mxu1 %vm2472_vm14, %v7276_v13  ;;  %7281 = vmatmul.mubr.msk.f32.vlgmr.msra.gmra.mrb[46].mxu0 %vm2472_vm14, %v7280_v47 }
 0x3b7   :  { %7410 = vmatpush1.bf16.msra.mxu1 %v8279_v37  ;;  %7422 = vmatpush1.bf16.msra.mxu0 %v8279_v37 }
 0x3b8   :  { %7416 = vmatprep.subr.bf16.mxu1 %v8255_v17  ;;  %7428 = vmatprep.subr.bf16.mxu0 %v8255_v17 }
 0x3b9   :  { %4165 = vmatprep.mubr.f32.mxu1 %v9027_v0  ;;  %4418 = vmatprep.mubr.f32.mxu0 %v9027_v0 }
 0x3ba   :  { %7279 = vmatmul.mubr.msk.f32.vlgmr.msra.gmra.mrb[48].mxu1 %vm2472_vm14, %v7276_v13  ;;  %7283 = vmatmul.mubr.msk.f32.vlgmr.msra.gmra.mrb[48].mxu0 %vm2472_vm14, %v7280_v47 }
 0x3bb   :  { %7418 = vmatpush1.bf16.msra.mxu1 %v8258_v3  ;;  %7430 = vmatpush1.bf16.msra.mxu0 %v8258_v3 }
 0x3bc   :  { %7424 = vmatprep.subr.bf16.mxu1 %v8227_v57  ;;  %7436 = vmatprep.subr.bf16.mxu0 %v8227_v57 }
 0x3bd   :  { %4347 = vmatprep.mubr.f32.mxu1 %v9027_v0  ;;  %4600 = vmatprep.mubr.f32.mxu0 %v9027_v0 }
 0x3be   :  { %7282 = vmatmul.mubr.msk.f32.vlgmr.msra.gmra.mrb[50].mxu1 %vm2472_vm14, %v7280_v47  ;;  %7286 = vmatmul.mubr.msk.f32.vlgmr.msra.gmra.mrb[50].mxu0 %vm2472_vm14, %v7284_v23 }
 0x3bf   :  { %7602 = vmatpush1.bf16.msk.msra.mxu1 %vm8238_vm13, %v8243_v1  ;;  %7606 = vmatpush1.bf16.msk.msra.mxu0 %vm8238_vm13, %v8243_v1 }
 0x3c0   :  { %7432 = vmatprep.subr.bf16.mxu1 %v8277_v27  ;;  %4529 = vmatprep.mubr.f32.mxu1 %v9027_v0 }
 0x3c1   :  { %4919 = vmatprep.mubr.f32.mxu0 %v9027_v0 }
 0x3c2   :  { %7285 = vmatmul.mubr.msk.f32.vlgmr.msra.gmra.mrb[52].mxu1 %vm2472_vm14, %v7284_v23 }
 0x3c3   :  { %7434 = vmatpush1.bf16.msra.mxu1 %v8279_v37  ;;  %4671 = vmatprep.mubr.f32.mxu1 %v9027_v0 }
 0x3c4   :  { %7440 = vmatprep.subr.bf16.mxu1 %v8255_v17 }
 0x3c6   :  { %7287 = vmatmul.mubr.msk.f32.vlgmr.msra.gmra.mrb[54].mxu1 %vm2472_vm14, %v7284_v23 }
 0x3c7   :  { %7442 = vmatpush1.bf16.msra.mxu1 %v8258_v3  ;;  %4990 = vmatprep.mubr.f32.mxu1 %v9027_v0 }
 0x450   :  { %v8418_v34 = vpop.f32.mrb[28].mxu1 }
 0x451   :  { %v8420_v38 = vpop.f32.mrb[29].mxu1 }
 0x458   :  { %v8422_v39 = vpop.f32.mrb[26].mxu0 }
 0x459   :  { %v8424_v48 = vpop.f32.mrb[27].mxu0 }
 0x45c   :  { %v2760_v54 = vpop.f32.mrb[28].mxu0 }
 0x45d   :  { %v2762_v19 = vpop.f32.mrb[29].mxu0  ;;  %2913 = vrot.lane.b32.xlu0 %v2760_v54, %s7707_s2 }
 0x45e   :  { %2915 = vrot.lane.b32.xlu1 %v2762_v19, %s7707_s2 }
 0x469   :  { %v8428_v14 = vpop.f32.mrb[30].mxu1  ;;  %v2902_v44 = vpop.f32.mrb[30].mxu0 }
 0x46a   :  { %v8430_v18 = vpop.f32.mrb[31].mxu1  ;;  %2921 = vrot.lane.b32.xlu1 %v2902_v44, %s7707_s2  ;;  %v2904_v16 = vpop.f32.mrb[31].mxu0 }
 0x46d   :  { %v2831_v22 = vpop.f32.mrb[32].mxu1  ;;  %v3084_v43 = vpop.f32.mrb[32].mxu0 }
 0x46e   :  { %2917 = vrot.lane.b32.xlu0 %v2831_v22, %s7707_s2  ;;  %v2833_v24 = vpop.f32.mrb[33].mxu1  ;;  %v3086_v59 = vpop.f32.mrb[33].mxu0 }
 0x46f   :  { %2919 = vrot.lane.b32.xlu1 %v2833_v24, %s7707_s2 }
 0x471   :  { %v3013_v46 = vpop.f32.mrb[34].mxu1  ;;  %v3266_v40 = vpop.f32.mrb[34].mxu0 }
 0x472   :  { %2923 = vrot.lane.b32.xlu0 %v2904_v16, %s7707_s2  ;;  %v3015_v25 = vpop.f32.mrb[35].mxu1  ;;  %v3268_v42 = vpop.f32.mrb[35].mxu0 }
 0x473   :  { %3168 = vrot.lane.b32.xlu1 %v3015_v25, %s7708_s30 }
 0x475   :  { %v3155_v55 = vpop.f32.mrb[36].mxu1  ;;  %v3408_v29 = vpop.f32.mrb[36].mxu0 }
 0x476   :  { %3166 = vrot.lane.b32.xlu0 %v3013_v46, %s7708_s30  ;;  %v3157_v58 = vpop.f32.mrb[37].mxu1  ;;  %v3410_v9 = vpop.f32.mrb[37].mxu0 }
 0x477   :  { %3419 = vrot.lane.b32.xlu1 %v3266_v40, %s7709_s8 }
 0x479   :  { %v3337_v36 = vpop.f32.mrb[38].mxu1  ;;  %v3590_v41 = vpop.f32.mrb[38].mxu0 }
 0x47a   :  { %3170 = vrot.lane.b32.xlu0 %v3084_v43, %s7708_s30  ;;  %v3339_v50 = vpop.f32.mrb[39].mxu1  ;;  %v3592_v20 = vpop.f32.mrb[39].mxu0 }
 0x47b   :  { %3174 = vrot.lane.b32.xlu1 %v3155_v55, %s7708_s30 }
 0x47d   :  { %v3519_v31 = vpop.f32.mrb[40].mxu1  ;;  %v3772_v15 = vpop.f32.mrb[40].mxu0 }
 0x47e   :  { %3172 = vrot.lane.b32.xlu0 %v3086_v59, %s7708_s30  ;;  %v3521_v26 = vpop.f32.mrb[41].mxu1  ;;  %v3774_v21 = vpop.f32.mrb[41].mxu0 }
 0x47f   :  { %3423 = vrot.lane.b32.xlu1 %v3337_v36, %s7709_s8 }
 0x481   :  { %v3661_v45 = vpop.f32.mrb[42].mxu1  ;;  %v3914_v35 = vpop.f32.mrb[42].mxu0 }
 0x482   :  { %3421 = vrot.lane.b32.xlu0 %v3268_v42, %s7709_s8  ;;  %v3663_v28 = vpop.f32.mrb[43].mxu1  ;;  %v3916_v53 = vpop.f32.mrb[43].mxu0 }
 0x483   :  { %3427 = vrot.lane.b32.xlu1 %v3408_v29, %s7709_s8 }
 0x485   :  { %v3843_v60 = vpop.f32.mrb[44].mxu1  ;;  %v4096_v33 = vpop.f32.mrb[44].mxu0 }
 0x486   :  { %3176 = vrot.lane.b32.xlu0 %v3157_v58, %s7708_s30  ;;  %v3845_v8 = vpop.f32.mrb[45].mxu1  ;;  %v4098_v6 = vpop.f32.mrb[45].mxu0 }
 0x487   :  { %3672 = vrot.lane.b32.xlu1 %v3519_v31, %s7710_s9 }
 0x489   :  { %v4025_v7 = vpop.f32.mrb[46].mxu1  ;;  %v4278_v32 = vpop.f32.mrb[46].mxu0 }
 0x48a   :  { %3425 = vrot.lane.b32.xlu0 %v3339_v50, %s7709_s8  ;;  %v4027_v11 = vpop.f32.mrb[47].mxu1  ;;  %v4280_v12 = vpop.f32.mrb[47].mxu0 }
 0x48b   :  { %3676 = vrot.lane.b32.xlu1 %v3590_v41, %s7710_s9 }
 0x48d   :  { %v4167_v49 = vpop.f32.mrb[48].mxu1  ;;  %v4420_v56 = vpop.f32.mrb[48].mxu0 }
 0x48e   :  { %3429 = vrot.lane.b32.xlu0 %v3410_v9, %s7709_s8  ;;  %v4169_v10 = vpop.f32.mrb[49].mxu1  ;;  %v4422_v63 = vpop.f32.mrb[49].mxu0 }
 0x48f   :  { %3925 = vrot.lane.b32.xlu1 %v3772_v15, %s7711_s10 }
 0x491   :  { %v4349_v13 = vpop.f32.mrb[50].mxu1  ;;  %v4602_v47 = vpop.f32.mrb[50].mxu0 }
 0x492   :  { %3674 = vrot.lane.b32.xlu0 %v3521_v26, %s7710_s9  ;;  %v4351_v23 = vpop.f32.mrb[51].mxu1  ;;  %v4604_v54 = vpop.f32.mrb[51].mxu0 }
 0x493   :  { %3680 = vrot.lane.b32.xlu1 %v3661_v45, %s7710_s9 }
 0x495   :  { %v4531_v19 = vpop.f32.mrb[52].mxu1 }
 0x496   :  { %3678 = vrot.lane.b32.xlu0 %v3592_v20, %s7710_s9  ;;  %v4533_v44 = vpop.f32.mrb[53].mxu1 }
 0x497   :  { %3929 = vrot.lane.b32.xlu1 %v3843_v60, %s7711_s10 }
 0x499   :  { %v4673_v16 = vpop.f32.mrb[54].mxu1 }
 0x49a   :  { %3927 = vrot.lane.b32.xlu0 %v3774_v21, %s7711_s10  ;;  %v4675_v22 = vpop.f32.mrb[55].mxu1 }
 0x49b   :  { %3933 = vrot.lane.b32.xlu1 %v3914_v35, %s7711_s10 }
 0x49e   :  { %3682 = vrot.lane.b32.xlu0 %v3663_v28, %s7710_s9 }
 0x49f   :  { %4178 = vrot.lane.b32.xlu1 %v4025_v7, %s7712_s11 }
 0x4a2   :  { %3931 = vrot.lane.b32.xlu0 %v3845_v8, %s7711_s10 }
 0x4a3   :  { %4182 = vrot.lane.b32.xlu1 %v4096_v33, %s7712_s11 }
 0x4a6   :  { %3935 = vrot.lane.b32.xlu0 %v3916_v53, %s7711_s10 }
 0x4a7   :  { %4431 = vrot.lane.b32.xlu1 %v4278_v32, %s7713_s12 }
 0x4aa   :  { %4180 = vrot.lane.b32.xlu0 %v4027_v11, %s7712_s11 }
 0x4ab   :  { %4186 = vrot.lane.b32.xlu1 %v4167_v49, %s7712_s11 }
 0x4ae   :  { %4184 = vrot.lane.b32.xlu0 %v4098_v6, %s7712_s11 }
 0x4af   :  { %4435 = vrot.lane.b32.xlu1 %v4349_v13, %s7713_s12 }
 0x4b2   :  { %4433 = vrot.lane.b32.xlu0 %v4280_v12, %s7713_s12 }
 0x4b3   :  { %4439 = vrot.lane.b32.xlu1 %v4420_v56, %s7713_s12 }
 0x4b6   :  { %4188 = vrot.lane.b32.xlu0 %v4169_v10, %s7712_s11 }
 0x4b7   :  { %4684 = vrot.lane.b32.xlu1 %v4531_v19, %s7714_s0 }
 0x4ba   :  { %4437 = vrot.lane.b32.xlu0 %v4351_v23, %s7713_s12 }
 0x4bb   :  { %4688 = vrot.lane.b32.xlu1 %v4602_v47, %s7714_s0 }
 0x4be   :  { %4686 = vrot.lane.b32.xlu0 %v4533_v44, %s7714_s0 }
 0x4bf   :  { %4441 = vrot.lane.b32.xlu1 %v4422_v63, %s7713_s12 }
 0x4c2   :  { %4690 = vrot.lane.b32.xlu0 %v4604_v54, %s7714_s0 }
 0x4c3   :  { %4694 = vrot.lane.b32.xlu1 %v4675_v22, %s7714_s0 }
 0x4c6   :  { %4692 = vrot.lane.b32.xlu0 %v4673_v16, %s7714_s0 }
 0x4cf   :  { %v2914_v24 = vpop.permute.xlu0 %2913 }
 0x4d0   :  { %v2916_v43 = vpop.permute.xlu1 %2915 }
 0x4d1   :  { %v2925_v13 = vsel %vm513_vm2, %v2914_v24, %v2916_v43 }
 0x4d2   :  { %v2936_v16 = vadd.f32 %v2925_v13, %v8418_v34 }
 0x4dc   :  { %v2922_v59 = vpop.permute.xlu1 %2921 }
 0x4e0   :  { %v2918_v46 = vpop.permute.xlu0 %2917 }
 0x4e1   :  { %v2920_v40 = vpop.permute.xlu1 %2919  ;;  %v2926_v47 = vsel %vm513_vm2, %v2916_v43, %v2918_v46 }
 0x4e2   :  { %v2927_v23 = vsel %vm513_vm2, %v2918_v46, %v2920_v40  ;;  %v2928_v19 = vsel %vm513_vm2, %v2920_v40, %v2922_v59  ;;  %v2937_v0 = vadd.f32 %v2926_v47, %v8420_v38 }
 0x4e3   :  { %v2938_v3 = vadd.f32 %v2927_v23, %v8422_v39  ;;  %v2939_v46 = vadd.f32 %v2928_v19, %v8424_v48 }
 0x4e4   :  { %v2924_v25 = vpop.permute.xlu0 %2923 }
 0x4e5   :  { %v3169_v42 = vpop.permute.xlu1 %3168  ;;  %v2929_v22 = vsel %vm513_vm2, %v2922_v59, %v2924_v25  ;;  %v2941_v17 = vadd.f32 %v2924_v25, %v8430_v18 }
 0x4e6   :  { %v2940_v34 = vadd.f32 %v2929_v22, %v8428_v14 }
 0x4e8   :  { %v3167_v55 = vpop.permute.xlu0 %3166 }
 0x4e9   :  { %v3420_v29 = vpop.permute.xlu1 %3419  ;;  %v3178_v24 = vsel %vm767_vm3, %v3167_v55, %v3169_v42 }
 0x4ec   :  { %v3171_v58 = vpop.permute.xlu0 %3170 }
 0x4ed   :  { %v3175_v9 = vpop.permute.xlu1 %3174  ;;  %v3179_v43 = vsel %vm767_vm3, %v3169_v42, %v3171_v58  ;;  %v3189_v42 = vadd.f32 %v3178_v24, %v2936_v16 }
 0x4ee   :  { %v3190_v13 = vadd.f32 %v3179_v43, %v2937_v0 }
 0x4f0   :  { %v3173_v36 = vpop.permute.xlu0 %3172 }
 0x4f1   :  { %v3424_v41 = vpop.permute.xlu1 %3423  ;;  %v3180_v40 = vsel %vm767_vm3, %v3171_v58, %v3173_v36  ;;  %v3181_v52 = vsel %vm767_vm3, %v3173_v36, %v3175_v9 }
 0x4f2   :  { %v3191_v25 = vadd.f32 %v3180_v40, %v2938_v3  ;;  %v3192_v58 = vadd.f32 %v3181_v52, %v2939_v46 }
 0x4f4   :  { %v3422_v50 = vpop.permute.xlu0 %3421 }
 0x4f5   :  { %v3428_v20 = vpop.permute.xlu1 %3427  ;;  %v3431_v59 = vsel %vm1021_vm4, %v3420_v29, %v3422_v50  ;;  %v3432_v38 = vsel %vm1021_vm4, %v3422_v50, %v3424_v41 }
 0x4f6   :  { %v3442_v47 = vadd.f32 %v3431_v59, %v3189_v42  ;;  %v3443_v29 = vadd.f32 %v3432_v38, %v3190_v13 }
 0x4f8   :  { %v3177_v31 = vpop.permute.xlu0 %3176 }
 0x4f9   :  { %v3673_v15 = vpop.permute.xlu1 %3672  ;;  %v3182_v39 = vsel %vm767_vm3, %v3175_v9, %v3177_v31  ;;  %v3194_v50 = vadd.f32 %v3177_v31, %v2941_v17 }
 0x4fa   :  { %v3193_v23 = vadd.f32 %v3182_v39, %v2940_v34 }
 0x4fc   :  { %v3426_v26 = vpop.permute.xlu0 %3425 }
 0x4fd   :  { %v3677_v21 = vpop.permute.xlu1 %3676  ;;  %v3433_v48 = vsel %vm1021_vm4, %v3424_v41, %v3426_v26  ;;  %v3434_v18 = vsel %vm1021_vm4, %v3426_v26, %v3428_v20 }
 0x4fe   :  { %v3444_v9 = vadd.f32 %v3433_v48, %v3191_v25  ;;  %v3445_v22 = vadd.f32 %v3434_v18, %v3192_v58 }
 0x500   :  { %v3430_v45 = vpop.permute.xlu0 %3429 }
 0x501   :  { %v3926_v35 = vpop.permute.xlu1 %3925  ;;  %v3435_v3 = vsel %vm1021_vm4, %v3428_v20, %v3430_v45 }
 0x504   :  { %v3675_v28 = vpop.permute.xlu0 %3674 }
 0x505   :  { %v8478_v53 = vpop.permute.xlu1 %3680  ;;  %v3684_v36 = vsel %vm1275_vm5, %v3673_v15, %v3675_v28  ;;  %v3685_v14 = vsel %vm1275_vm5, %v3675_v28, %v3677_v21  ;;  %v3447_v28 = vadd.f32 %v3430_v45, %v3194_v50  ;;  %v3446_v45 = vadd.f32 %v3435_v3, %v3193_v23 }
 0x506   :  { %v3695_v52 = vadd.f32 %v3684_v36, %v3442_v47  ;;  %v3696_v26 = vadd.f32 %v3685_v14, %v3443_v29 }
 0x508   :  { %v3679_v60 = vpop.permute.xlu0 %3678 }
 0x509   :  { %v8480_v33 = vpop.permute.xlu1 %3929  ;;  %v3686_v15 = vsel %vm1275_vm5, %v3677_v21, %v3679_v60  ;;  %v3687_v24 = vsel %vm1275_vm5, %v3679_v60, %v8478_v53 }
 0x50a   :  { %v3697_v46 = vadd.f32 %v3686_v15, %v3444_v9 }
 0x50c   :  { %v3928_v8 = vpop.permute.xlu0 %3927 }
 0x50d   :  { %v8482_v6 = vpop.permute.xlu1 %3933  ;;  %v3937_v16 = vsel %vm1529_vm6, %v3926_v35, %v3928_v8  ;;  %v3938_v0 = vsel %vm1529_vm6, %v3928_v8, %v8480_v33 }
 0x50e   :  { %v3948_v35 = vadd.f32 %v3937_v16, %v3695_v52  ;;  %v3949_v43 = vadd.f32 %v3938_v0, %v3696_v26 }
 0x510   :  { %v8484_v7 = vpop.permute.xlu0 %3682 }
 0x511   :  { %v4179_v32 = vpop.permute.xlu1 %4178  ;;  %v3688_v8 = vsel %vm1275_vm5, %v8478_v53, %v8484_v7  ;;  %v3700_v34 = vadd.f32 %v8484_v7, %v3447_v28 }
 0x512   :  { %v3699_v39 = vadd.f32 %v3688_v8, %v3446_v45 }
 0x514   :  { %v8486_v11 = vpop.permute.xlu0 %3931 }
 0x515   :  { %v8488_v12 = vpop.permute.xlu1 %4182  ;;  %v3939_v20 = vsel %vm1529_vm6, %v8480_v33, %v8486_v11  ;;  %v3940_v53 = vsel %vm1529_vm6, %v8486_v11, %v8482_v6 }
 0x516   :  { %v3950_v33 = vadd.f32 %v3939_v20, %v3697_v46 }
 0x518   :  { %v8490_v49 = vpop.permute.xlu0 %3935 }
 0x519   :  { %v4432_v56 = vpop.permute.xlu1 %4431 }
 0x51c   :  { %v4181_v10 = vpop.permute.xlu0 %4180 }
 0x51d   :  { %v8492_v63 = vpop.permute.xlu1 %4186  ;;  %v4190_v17 = vsel %vm1783_vm7, %v4179_v32, %v4181_v10  ;;  %v4191_v31 = vsel %vm1783_vm7, %v4181_v10, %v8488_v12  ;;  %v3698_v10 = vadd.f32 %v3687_v24, %v3445_v22 }
 0x51e   :  { %v4201_v59 = vadd.f32 %v4190_v17, %v3948_v35  ;;  %v4202_v38 = vadd.f32 %v4191_v31, %v3949_v43 }
 0x51f   :  { %v3951_v36 = vadd.f32 %v3940_v53, %v3698_v10 }
 0x520   :  { %v8497_v54 = vpop.permute.xlu0 %4184 }
 0x521   :  { %v8500_v44 = vpop.permute.xlu1 %4435  ;;  %v4192_v42 = vsel %vm1783_vm7, %v8488_v12, %v8497_v54  ;;  %v4193_v18 = vsel %vm1783_vm7, %v8497_v54, %v8492_v63 }
 0x522   :  { %v4203_v14 = vadd.f32 %v4192_v42, %v3950_v33  ;;  %v4204_v54 = vadd.f32 %v4193_v18, %v3951_v36 }
 0x524   :  { %v4434_v1 = vpop.permute.xlu0 %4433 }
 0x525   :  { %v8516_v55 = vpop.permute.xlu1 %4439  ;;  %v4443_v60 = vsel %vm2037_vm8, %v4432_v56, %v4434_v1  ;;  %v4444_v32 = vsel %vm2037_vm8, %v4434_v1, %v8500_v44  ;;  %v3941_v1 = vsel %vm1529_vm6, %v8482_v6, %v8490_v49  ;;  %v3953_v56 = vadd.f32 %v8490_v49, %v3700_v34 }
 0x526   :  { %v4454_v13 = vadd.f32 %v4443_v60, %v4201_v59  ;;  %v4455_v7 = vadd.f32 %v4444_v32, %v4202_v38  ;;  %v3952_v47 = vadd.f32 %v3941_v1, %v3699_v39 }
 0x528   :  { %v4189_v19 = vpop.permute.xlu0 %4188 }
 0x529   :  { %v4685_v41 = vpop.permute.xlu1 %4684  ;;  %v4194_v29 = vsel %vm1783_vm7, %v8492_v63, %v4189_v19  ;;  %v4206_v23 = vadd.f32 %v4189_v19, %v3953_v56 }
 0x52a   :  { %v4205_v19 = vadd.f32 %v4194_v29, %v3952_v47 }
 0x52c   :  { %v4438_v21 = vpop.permute.xlu0 %4437 }
 0x52d   :  { %v4689_v40 = vpop.permute.xlu1 %4688  ;;  %v4445_v11 = vsel %vm2037_vm8, %v8500_v44, %v4438_v21  ;;  %v4446_v16 = vsel %vm2037_vm8, %v4438_v21, %v8516_v55 }
 0x52e   :  { %v4456_v50 = vadd.f32 %v4445_v11, %v4203_v14  ;;  %v4457_v31 = vadd.f32 %v4446_v16, %v4204_v54 }
 0x530   :  { %v4687_v48 = vpop.permute.xlu0 %4686 }
 0x531   :  { %v4696_v25 = vsel %vm2291_vm9, %v4685_v41, %v4687_v48  ;;  %v4697_v12 = vsel %vm2291_vm9, %v4687_v48, %v4689_v40  ;;  %v4442_v58 = vpop.permute.xlu1 %4441 }
 0x532   :  { %v8559_v6 = vadd.f32 %v4696_v25, %v4454_v13  ;;  %v8561_v49 = vadd.f32 %v4697_v12, %v4455_v7  ;;  %v4447_v0 = vsel %vm2037_vm8, %v8516_v55, %v4442_v58  ;;  %v4459_v41 = vadd.f32 %v4442_v58, %v4206_v23 }
 0x533   :  { %v4458_v35 = vadd.f32 %v4447_v0, %v4205_v19 }
 0x534   :  { %v4713_v44 = vmul.f32 %v8559_v6, %v8559_v6  ;;  %v4714_v9 = vmul.f32 %v8561_v49, %v8561_v49  ;;  %v4691_v22 = vpop.permute.xlu0 %4690  ;;  %v4719_v52 = vmul.f32 %v8559_v6, %v8048_v2  ;;  %v4720_v26 = vmul.f32 %v8561_v49, %v8051_v4 }
 0x535   :  { %v4698_v3 = vsel %vm2291_vm9, %v4689_v40, %v4691_v22  ;;  %v4695_v63 = vpop.permute.xlu1 %4694 }
 0x536   :  { %v4709_v15 = vadd.f32 %v4698_v3, %v4456_v50  ;;  %v4725_v28 = vmul.f32 %v4713_v44, %v8048_v2  ;;  %v4726_v24 = vmul.f32 %v4714_v9, %v8051_v4  ;;  %v4712_v17 = vadd.f32 %v4695_v63, %v4459_v41  ;;  %v7289_v41 = vld [vmem:[%s9025_s6 + $0x8] sm:$0xff] }
 0x537   :  { %v4731_v45 = vadd.f32 %v4720_v26, %v4719_v52 }
 0x538   :  { %v4715_v55 = vmul.f32 %v4709_v15, %v4709_v15  ;;  %v4721_v43 = vmul.f32 %v4709_v15, %v8054_v5  ;;  %v4693_v8 = vpop.permute.xlu0 %4692  ;;  %v4739_v40 = vadd.f32 %v4726_v24, %v4725_v28  ;;  %v4718_v10 = vmul.f32 %v4712_v17, %v4712_v17 }
 0x539   :  { %v4699_v20 = vsel %vm2291_vm9, %v4691_v22, %v4693_v8  ;;  %v4700_v21 = vsel %vm2291_vm9, %v4693_v8, %v4695_v63  ;;  %v4724_v53 = vmul.f32 %v4712_v17, %v8151_v62  ;;  %v7288_v22 = vld [vmem:[%s9024_s5 + $0x8] sm:$0xff] }
 0x53a   :  { %v4727_v46 = vmul.f32 %v4715_v55, %v8054_v5  ;;  %v4710_v60 = vadd.f32 %v4699_v20, %v4457_v31  ;;  %v4711_v32 = vadd.f32 %v4700_v21, %v4458_v35  ;;  %v4732_v34 = vadd.f32 %v4731_v45, %v4721_v43 }
 0x53b   :  { %v4730_v13 = vmul.f32 %v4718_v10, %v8151_v62  ;;  %v4735_v11 = vsel %vm60_vm1, %v4724_v53, 0.0 }
 0x53c   :  { %v4716_v59 = vmul.f32 %v4710_v60, %v4710_v60  ;;  %v4717_v38 = vmul.f32 %v4711_v32, %v4711_v32  ;;  %v4722_v39 = vmul.f32 %v4710_v60, %v8172_v61  ;;  %v4723_v33 = vmul.f32 %v4711_v32, %v8183_v51 }
 0x53d   :  { %v4740_v56 = vadd.f32 %v4739_v40, %v4727_v46  ;;  %v4743_v58 = vsel %vm60_vm1, %v4730_v13, 0.0 }
 0x53e   :  { %v4728_v42 = vmul.f32 %v4716_v59, %v8172_v61  ;;  %v4733_v1 = vadd.f32 %v4732_v34, %v4722_v39  ;;  %v4729_v48 = vmul.f32 %v4717_v38, %v8183_v51 }
 0x540   :  { %v4734_v7 = vadd.f32 %v4733_v1, %v4723_v33  ;;  %v4741_v18 = vadd.f32 %v4740_v56, %v4728_v42  ;;  %v4850_v1 = vld [vmem:[%s9023_s4] sm:$0xff] }
 0x542   :  { %v4736_v25 = vadd.f32 %v4735_v11, %v4734_v7  ;;  %v4742_v12 = vadd.f32 %v4741_v18, %v4729_v48  ;;  %v9045_v18 = vmov 0.0  }
 0x544   :  { %4737 = vadd.xlane.f32.xlu0 %v4736_v25  ;;  %v4744_v36 = vadd.f32 %v4743_v58, %v4742_v12 }
 0x546   :  { %4745 = vadd.xlane.f32.xlu1 %v4744_v36  ;;  %v9046_v36 = vld [vmem:[#allocation10_spill] sm:$0xff] }
 0x5d1   :  { %v4738_v14 = vpop.xlane.xlu0 %4737 }
 0x5d2   :  { %v4747_v47 = vmul.f32 0.001953125, %v4738_v14 }
 0x5d3   :  { %v4746_v29 = vpop.xlane.xlu1 %4745 }
 0x5d4   :  { %v4749_v23 = vmul.f32 %v4747_v47, %v4747_v47  ;;  %v4748_v54 = vmul.f32 0.001953125, %v4746_v29  ;;  %v7293_v29 = vld [vmem:[%s9023_s4 + $0x8] sm:$0xff] }
 0x5d6   :  { %v4750_v50 = vsub.f32 %v4748_v54, %v4749_v23  ;;  %v9048_v54 = vld [vmem:[#allocation11_spill] sm:$0xff] }
 0x5d8   :  { %v4751_v44 = vmax.f32 %v4750_v50, 0.0  ;;  %v9049_v50 = vld [vmem:[#allocation12_spill] sm:$0xff] }
 0x5da   :  { %v4754_v9 = vadd.f32 1e-05, %v4751_v44  ;;  %v7297_v44 = vld [vmem:[%s9023_s4 + $0x10] sm:$0xff] }
 0x5dc   :  { %7563 = vrsqrt.f32 %v4754_v9  ;;  %v7301_v9 = vld [vmem:[%s9023_s4 + $0x18] sm:$0xff] }
 0x5e6   :  { %v7564_v16 = vpop.eup %7563 }
 0x5e7   :  { %v4756_v0 = vmul.f32 %v7564_v16, %v7288_v22  ;;  %v7305_v22 = vld [vmem:[%s9023_s4 + $0x20] sm:$0xff]  ;;  %v7309_v16 = vld [vmem:[%s9023_s4 + $0x28] sm:$0xff] }
 0x5e9   :  { %4763 = vperm.xlu0 %7559, %v4756_v0   ;;  %v4759_v3 = vmul.f32 %v4756_v0, %v4747_v47  ;;  %v7313_v0 = vld [vmem:[%s9023_s4 + $0x30] sm:$0xff] }
 0x5eb   :  { %v4760_v63 = vsub.f32 %v7289_v41, %v4759_v3  ;;  %v7317_v41 = vld [vmem:[%s9023_s4 + $0x38] sm:$0xff]  ;;  %v7321_v3 = vld [vmem:[%s9023_s4 + $0x40] sm:$0xff] }
 0x5ed   :  { %4774 = vperm.xlu1 %7560, %v4760_v63  }
 0x668   :  { %v4764_v19 = vpop.permute.xlu0 %4763 }
 0x669   :  { %v4766_v52 = vmul.f32 %v4764_v19, %v8559_v6  ;;  %v4767_v26 = vmul.f32 %v4764_v19, %v8561_v49  ;;  %v4768_v28 = vmul.f32 %v4764_v19, %v4709_v15  ;;  %v4769_v24 = vmul.f32 %v4764_v19, %v4710_v60 }
 0x66a   :  { %v4770_v20 = vmul.f32 %v4764_v19, %v4711_v32  ;;  %v4771_v21 = vmul.f32 %v4764_v19, %v4712_v17 }
 0x66c   :  { %v4775_v31 = vpop.permute.xlu1 %4774 }
 0x66d   :  { %v4778_v35 = vadd.f32 %v4775_v31, %v4767_v26  ;;  %v4777_v55 = vadd.f32 %v4775_v31, %v4766_v52  ;;  %v4780_v43 = vadd.f32 %v4775_v31, %v4769_v24  ;;  %v4779_v8 = vadd.f32 %v4775_v31, %v4768_v28 }
 0x66e   :  { %v4782_v40 = vadd.f32 %v4775_v31, %v4771_v21  ;;  %v4781_v10 = vadd.f32 %v4775_v31, %v4770_v20 }
 0x66f   :  { %v4784_v45 = vmax.f32 %v4778_v35, 0.0  ;;  %v4783_v46 = vmax.f32 %v4777_v55, 0.0  ;;  %v4786_v6 = vmax.f32 %v4780_v43, 0.0  ;;  %v4785_v38 = vmax.f32 %v4779_v8, 0.0 }
 0x670   :  { %v4788_v60 = vmax.f32 %v4782_v40, 0.0  ;;  %v4787_v17 = vmax.f32 %v4781_v10, 0.0 }
 0x671   :  { %v4790_v34 = vmul.f32 %v4784_v45, %v8051_v4  ;;  %v4789_v59 = vmul.f32 %v4783_v46, %v8048_v2  ;;  %v4792_v49 = vmul.f32 %v4786_v6, %v8172_v61  ;;  %v4791_v15 = vmul.f32 %v4785_v38, %v8054_v5 }
 0x672   :  { %v4794_v32 = vmul.f32 %v4788_v60, %v8151_v62  ;;  %v4793_v39 = vmul.f32 %v4787_v17, %v8183_v51 }
 0x673   :  { %4803 = vrot.lane.b32.xlu1 %v4790_v34, %s7716_s18  ;;  %4801 = vrot.lane.b32.xlu0 %v4789_v59, %s7716_s18 }
 0x677   :  { %4807 = vrot.lane.b32.xlu1 %v4792_v49, %s7716_s18  ;;  %4805 = vrot.lane.b32.xlu0 %v4791_v15, %s7716_s18 }
 0x67b   :  { %4811 = vrot.lane.b32.xlu1 %v4794_v32, %s7716_s18  ;;  %4809 = vrot.lane.b32.xlu0 %v4793_v39, %s7716_s18 }
 0x6e5   :  { %v4804_v53 = vpop.permute.xlu1 %4803  ;;  %v8612_v33 = vpop.permute.xlu0 %4801 }
 0x6e6   :  { %v8616_v42 = vsel %vm2438_vm10, %v8612_v33, %v4804_v53 }
 0x6e7   :  { %4859 = vmatprep.subr.mxu0 %v8616_v42 }
 0x6e8   :  { %7608 = vmatpush1.msk.msra.mxu0 %vm8232_vm11, %v8612_v33 }
 0x6e9   :  { %v4808_v56 = vpop.permute.xlu1 %4807  ;;  %v4806_v13 = vpop.permute.xlu0 %4805  ;;  %7444 = vmatprep.subr.bf16.mxu0 %v8277_v27  ;;  %7290 = vmatmul.mubr.msk.f32.vlgmr.msra.gmra.mrb[52].mxu0 %vm4851_vm12, %v4850_v1 }
 0x6ea   :  { %v8628_v7 = vsel %vm2438_vm10, %v4804_v53, %v4806_v13  ;;  %v8631_v48 = vsel %vm2438_vm10, %v4806_v13, %v4808_v56  ;;  %7446 = vmatpush1.bf16.msra.mxu0 %v8279_v37  ;;  %5061 = vmatprep.mubr.f32.mxu0 %v9045_v18 }
 0x6eb   :  { %4930 = vmatprep.subr.mxu1 %v8631_v48 }
 0x6ec   :  { %4931 = vmatpush1.msra.mxu1 %v8628_v7 }
 0x6ed   :  { %v4812_v11 = vpop.permute.xlu1 %4811  ;;  %v4810_v25 = vpop.permute.xlu0 %4809  ;;  %7448 = vmatprep.subr.bf16.mxu1 %v8227_v57  ;;  %7291 = vmatmul.mubr.msk.f32.vlgmr.msra.gmra.mrb[56].mxu1 %vm4851_vm12, %v4850_v1 }
 0x6ee   :  { %v8640_v12 = vsel %vm2438_vm10, %v4808_v56, %v4810_v25  ;;  %v4817_v58 = vsel %vm2438_vm10, %v4810_v25, %v4812_v11  ;;  %7612 = vmatpush1.bf16.msk.msra.mxu1 %vm8238_vm13, %v9046_v36  ;;  %5137 = vmatprep.mubr.f32.mxu1 %v9045_v18 }
 0x6ef   :  { %v4825_v47 = vsel %vm2451_vm15, %v4817_v58, 0.0  ;;  %5077 = vmatprep.subr.mxu1 %v8616_v42 }
 0x6f0   :  { %4831 = vst.msk [vmem:[#allocation2 + $0x88] sm:$0xff] %vm50_vm0, %v4825_v47  ;;  %vm7176_vm0 = vcmask 556032  }
 0x6f2   :  { %7614 = vmatpush1.msk.msra.mxu1 %vm8232_vm11, %v8612_v33 }
 0x6f3   :  { %7294 = vmatmul.mubr.msk.f32.vlgmr.msra.gmra.mrb[58].mxu1 %vm4851_vm12, %v7293_v29  ;;  %7456 = vmatprep.subr.bf16.mxu1 %v8277_v27 }
 0x6f4   :  { %7458 = vmatpush1.bf16.msra.mxu1 %v8279_v37  ;;  %5279 = vmatprep.mubr.f32.mxu1 %v9045_v18 }
 0x6f7   :  { %v8660_v23 = vld [vmem:[#allocation2 + $0x88] sm:$0xff] }
 0x6f8   :  { %5001 = vmatprep.subr.mxu0 %v8660_v23  ;;  %5219 = vmatprep.subr.mxu1 %v8660_v23 }
 0x6f9   :  { %5002 = vmatpush1.msra.mxu0 %v8640_v12  ;;  %5220 = vmatpush1.msra.mxu1 %v8640_v12 }
 0x6fa   :  { %7292 = vmatmul.mubr.msk.f32.vlgmr.msra.gmra.mrb[54].mxu0 %vm4851_vm12, %v4850_v1  ;;  %7452 = vmatprep.subr.bf16.mxu0 %v9048_v54 }
 0x6fb   :  { %7454 = vmatpush1.bf16.msra.mxu0 %v9049_v50  ;;  %5208 = vmatprep.mubr.f32.mxu0 %v9045_v18 }
 0x6fc   :  { %5148 = vmatprep.subr.mxu0 %v8631_v48  ;;  %7296 = vmatmul.mubr.msk.f32.vlgmr.msra.gmra.mrb[60].mxu1 %vm4851_vm12, %v7293_v29 }
 0x6fd   :  { %7464 = vmatprep.subr.bf16.mxu1 %v9048_v54  ;;  %5461 = vmatprep.mubr.f32.mxu1 %v9045_v18 }
 0x6fe   :  { %7466 = vmatpush1.bf16.msra.mxu1 %v9049_v50 }
 0x6ff   :  { %5149 = vmatpush1.msra.mxu0 %v8628_v7  ;;  %5401 = vmatprep.subr.mxu1 %v8631_v48 }
 0x700   :  { %7295 = vmatmul.mubr.msk.f32.vlgmr.msra.gmra.mrb[56].mxu0 %vm4851_vm12, %v7293_v29  ;;  %7460 = vmatprep.subr.bf16.mxu0 %v8227_v57 }
 0x701   :  { %7618 = vmatpush1.bf16.msk.msra.mxu0 %vm8238_vm13, %v9046_v36  ;;  %5390 = vmatprep.mubr.f32.mxu0 %v9045_v18 }
 0x702   :  { %5330 = vmatprep.subr.mxu0 %v8616_v42  ;;  %5402 = vmatpush1.msra.mxu1 %v8628_v7 }
 0x703   :  { %7472 = vmatprep.subr.bf16.mxu1 %v8227_v57  ;;  %7299 = vmatmul.mubr.msk.f32.vlgmr.msra.gmra.mrb[62].mxu1 %vm4851_vm12, %v7297_v44 }
 0x704   :  { %7622 = vmatpush1.bf16.msk.msra.mxu1 %vm8238_vm13, %v9046_v36  ;;  %5643 = vmatprep.mubr.f32.mxu1 %v9045_v18 }
 0x705   :  { %7624 = vmatpush1.msk.msra.mxu0 %vm8232_vm11, %v8612_v33  ;;  %5583 = vmatprep.subr.mxu1 %v8616_v42 }
 0x706   :  { %7468 = vmatprep.subr.bf16.mxu0 %v8277_v27  ;;  %7298 = vmatmul.mubr.msk.f32.vlgmr.msra.gmra.mrb[58].mxu0 %vm4851_vm12, %v7297_v44 }
 0x707   :  { %7470 = vmatpush1.bf16.msra.mxu0 %v8279_v37  ;;  %5532 = vmatprep.mubr.f32.mxu0 %v9045_v18 }
 0x708   :  { %5472 = vmatprep.subr.mxu0 %v8660_v23  ;;  %7626 = vmatpush1.msk.msra.mxu1 %vm8232_vm11, %v8612_v33 }
 0x709   :  { %7302 = vmatmul.mubr.msk.f32.vlgmr.msra.gmra.mrb[64].mxu1 %vm4851_vm12, %v7301_v9  ;;  %7480 = vmatprep.subr.bf16.mxu1 %v8277_v27 }
 0x70a   :  { %7482 = vmatpush1.bf16.msra.mxu1 %v8279_v37  ;;  %5785 = vmatprep.mubr.f32.mxu1 %v9045_v18 }
 0x70b   :  { %5473 = vmatpush1.msra.mxu0 %v8640_v12  ;;  %5725 = vmatprep.subr.mxu1 %v8660_v23 }
 0x70c   :  { %7476 = vmatprep.subr.bf16.mxu0 %v9048_v54  ;;  %7300 = vmatmul.mubr.msk.f32.vlgmr.msra.gmra.mrb[60].mxu0 %vm4851_vm12, %v7297_v44 }
 0x70d   :  { %7478 = vmatpush1.bf16.msra.mxu0 %v9049_v50  ;;  %5714 = vmatprep.mubr.f32.mxu0 %v9045_v18 }
 0x70e   :  { %5654 = vmatprep.subr.mxu0 %v8631_v48  ;;  %5726 = vmatpush1.msra.mxu1 %v8640_v12 }
 0x70f   :  { %7488 = vmatprep.subr.bf16.mxu1 %v9048_v54  ;;  %7304 = vmatmul.mubr.msk.f32.vlgmr.msra.gmra.mrb[66].mxu1 %vm4851_vm12, %v7301_v9 }
 0x710   :  { %7490 = vmatpush1.bf16.msra.mxu1 %v9049_v50  ;;  %5967 = vmatprep.mubr.f32.mxu1 %v9045_v18 }
 0x711   :  { %5655 = vmatpush1.msra.mxu0 %v8628_v7  ;;  %5907 = vmatprep.subr.mxu1 %v8631_v48 }
 0x712   :  { %7484 = vmatprep.subr.bf16.mxu0 %v8227_v57  ;;  %7303 = vmatmul.mubr.msk.f32.vlgmr.msra.gmra.mrb[62].mxu0 %vm4851_vm12, %v7301_v9 }
 0x713   :  { %7630 = vmatpush1.bf16.msk.msra.mxu0 %vm8238_vm13, %v9046_v36  ;;  %5896 = vmatprep.mubr.f32.mxu0 %v9045_v18 }
 0x714   :  { %5836 = vmatprep.subr.mxu0 %v8616_v42  ;;  %5908 = vmatpush1.msra.mxu1 %v8628_v7 }
 0x715   :  { %7496 = vmatprep.subr.bf16.mxu1 %v8227_v57  ;;  %7307 = vmatmul.mubr.msk.f32.vlgmr.msra.gmra.mrb[68].mxu1 %vm4851_vm12, %v7305_v22 }
 0x716   :  { %7634 = vmatpush1.bf16.msk.msra.mxu1 %vm8238_vm13, %v9046_v36  ;;  %6149 = vmatprep.mubr.f32.mxu1 %v9045_v18 }
 0x717   :  { %7636 = vmatpush1.msk.msra.mxu0 %vm8232_vm11, %v8612_v33  ;;  %6089 = vmatprep.subr.mxu1 %v8616_v42 }
 0x718   :  { %7492 = vmatprep.subr.bf16.mxu0 %v8277_v27  ;;  %7306 = vmatmul.mubr.msk.f32.vlgmr.msra.gmra.mrb[64].mxu0 %vm4851_vm12, %v7305_v22 }
 0x719   :  { %7494 = vmatpush1.bf16.msra.mxu0 %v8279_v37  ;;  %6038 = vmatprep.mubr.f32.mxu0 %v9045_v18 }
 0x71a   :  { %5978 = vmatprep.subr.mxu0 %v8660_v23  ;;  %7638 = vmatpush1.msk.msra.mxu1 %vm8232_vm11, %v8612_v33 }
 0x71b   :  { %7504 = vmatprep.subr.bf16.mxu1 %v8277_v27  ;;  %7310 = vmatmul.mubr.msk.f32.vlgmr.msra.gmra.mrb[70].mxu1 %vm4851_vm12, %v7309_v16 }
 0x71c   :  { %7506 = vmatpush1.bf16.msra.mxu1 %v8279_v37  ;;  %6291 = vmatprep.mubr.f32.mxu1 %v9045_v18 }
 0x71d   :  { %5979 = vmatpush1.msra.mxu0 %v8640_v12  ;;  %6231 = vmatprep.subr.mxu1 %v8660_v23 }
 0x71e   :  { %7500 = vmatprep.subr.bf16.mxu0 %v9048_v54  ;;  %7308 = vmatmul.mubr.msk.f32.vlgmr.msra.gmra.mrb[66].mxu0 %vm4851_vm12, %v7305_v22 }
 0x71f   :  { %7502 = vmatpush1.bf16.msra.mxu0 %v9049_v50  ;;  %6220 = vmatprep.mubr.f32.mxu0 %v9045_v18 }
 0x720   :  { %6160 = vmatprep.subr.mxu0 %v8631_v48  ;;  %6232 = vmatpush1.msra.mxu1 %v8640_v12 }
 0x721   :  { %7512 = vmatprep.subr.bf16.mxu1 %v9048_v54  ;;  %7312 = vmatmul.mubr.msk.f32.vlgmr.msra.gmra.mrb[72].mxu1 %vm4851_vm12, %v7309_v16 }
 0x722   :  { %7514 = vmatpush1.bf16.msra.mxu1 %v9049_v50  ;;  %6473 = vmatprep.mubr.f32.mxu1 %v9045_v18 }
 0x723   :  { %6161 = vmatpush1.msra.mxu0 %v8628_v7  ;;  %6413 = vmatprep.subr.mxu1 %v8631_v48 }
 0x724   :  { %7508 = vmatprep.subr.bf16.mxu0 %v8227_v57  ;;  %7311 = vmatmul.mubr.msk.f32.vlgmr.msra.gmra.mrb[68].mxu0 %vm4851_vm12, %v7309_v16 }
 0x725   :  { %7642 = vmatpush1.bf16.msk.msra.mxu0 %vm8238_vm13, %v9046_v36  ;;  %6402 = vmatprep.mubr.f32.mxu0 %v9045_v18 }
 0x726   :  { %6342 = vmatprep.subr.mxu0 %v8616_v42  ;;  %6414 = vmatpush1.msra.mxu1 %v8628_v7 }
 0x727   :  { %7520 = vmatprep.subr.bf16.mxu1 %v8227_v57  ;;  %7315 = vmatmul.mubr.msk.f32.vlgmr.msra.gmra.mrb[74].mxu1 %vm4851_vm12, %v7313_v0 }
 0x728   :  { %7646 = vmatpush1.bf16.msk.msra.mxu1 %vm8238_vm13, %v9046_v36  ;;  %6655 = vmatprep.mubr.f32.mxu1 %v9045_v18 }
 0x729   :  { %7648 = vmatpush1.msk.msra.mxu0 %vm8232_vm11, %v8612_v33  ;;  %6595 = vmatprep.subr.mxu1 %v8616_v42 }
 0x72a   :  { %7516 = vmatprep.subr.bf16.mxu0 %v8277_v27  ;;  %7314 = vmatmul.mubr.msk.f32.vlgmr.msra.gmra.mrb[70].mxu0 %vm4851_vm12, %v7313_v0 }
 0x72b   :  { %7518 = vmatpush1.bf16.msra.mxu0 %v8279_v37  ;;  %6544 = vmatprep.mubr.f32.mxu0 %v9045_v18 }
 0x72c   :  { %6484 = vmatprep.subr.mxu0 %v8660_v23  ;;  %7650 = vmatpush1.msk.msra.mxu1 %vm8232_vm11, %v8612_v33 }
 0x72d   :  { %7528 = vmatprep.subr.bf16.mxu1 %v8277_v27  ;;  %7318 = vmatmul.mubr.msk.f32.vlgmr.msra.gmra.mrb[76].mxu1 %vm4851_vm12, %v7317_v41 }
 0x72e   :  { %7530 = vmatpush1.bf16.msra.mxu1 %v8279_v37  ;;  %6797 = vmatprep.mubr.f32.mxu1 %v9045_v18 }
 0x72f   :  { %6485 = vmatpush1.msra.mxu0 %v8640_v12  ;;  %6737 = vmatprep.subr.mxu1 %v8660_v23 }
 0x730   :  { %7524 = vmatprep.subr.bf16.mxu0 %v9048_v54  ;;  %7316 = vmatmul.mubr.msk.f32.vlgmr.msra.gmra.mrb[72].mxu0 %vm4851_vm12, %v7313_v0 }
 0x731   :  { %7526 = vmatpush1.bf16.msra.mxu0 %v9049_v50  ;;  %6726 = vmatprep.mubr.f32.mxu0 %v9045_v18 }
 0x732   :  { %6666 = vmatprep.subr.mxu0 %v8631_v48  ;;  %6738 = vmatpush1.msra.mxu1 %v8640_v12 }
 0x733   :  { %7536 = vmatprep.subr.bf16.mxu1 %v9048_v54  ;;  %7320 = vmatmul.mubr.msk.f32.vlgmr.msra.gmra.mrb[78].mxu1 %vm4851_vm12, %v7317_v41 }
 0x734   :  { %7538 = vmatpush1.bf16.msra.mxu1 %v9049_v50  ;;  %6979 = vmatprep.mubr.f32.mxu1 %v9045_v18 }
 0x735   :  { %6667 = vmatpush1.msra.mxu0 %v8628_v7  ;;  %6919 = vmatprep.subr.mxu1 %v8631_v48 }
 0x736   :  { %7532 = vmatprep.subr.bf16.mxu0 %v8227_v57  ;;  %7319 = vmatmul.mubr.msk.f32.vlgmr.msra.gmra.mrb[74].mxu0 %vm4851_vm12, %v7317_v41 }
 0x737   :  { %7654 = vmatpush1.bf16.msk.msra.mxu0 %vm8238_vm13, %v9046_v36  ;;  %6908 = vmatprep.mubr.f32.mxu0 %v9045_v18 }
 0x738   :  { %6848 = vmatprep.subr.mxu0 %v8616_v42  ;;  %6920 = vmatpush1.msra.mxu1 %v8628_v7 }
 0x739   :  { %7323 = vmatmul.mubr.msk.f32.vlgmr.msra.gmra.mrb[80].mxu1 %vm4851_vm12, %v7321_v3 }
 0x73b   :  { %7656 = vmatpush1.msk.msra.mxu0 %vm8232_vm11, %v8612_v33 }
 0x73c   :  { %7540 = vmatprep.subr.bf16.mxu0 %v8277_v27  ;;  %7322 = vmatmul.mubr.msk.f32.vlgmr.msra.gmra.mrb[76].mxu0 %vm4851_vm12, %v7321_v3 }
 0x73d   :  { %7542 = vmatpush1.bf16.msra.mxu0 %v8279_v37  ;;  %7050 = vmatprep.mubr.f32.mxu0 %v9045_v18 }
 0x73e   :  { %6990 = vmatprep.subr.mxu0 %v8660_v23 }
 0x741   :  { %6991 = vmatpush1.msra.mxu0 %v8640_v12 }
 0x742   :  { %7324 = vmatmul.mubr.msk.f32.vlgmr.msra.gmra.mrb[78].mxu0 %vm4851_vm12, %v7321_v3 }
 0x7bc   :  { %v8849_v57 = vpop.f32.mrb[52].mxu0 }
 0x7bd   :  { %v8851_v63 = vpop.f32.mrb[53].mxu0 }
 0x7c0   :  { %v8853_v30 = vpop.f32.mrb[56].mxu1 }
 0x7c1   :  { %v8855_v19 = vpop.f32.mrb[57].mxu1 }
 0x7c6   :  { %v5139_v27 = vpop.f32.mrb[58].mxu1 }
 0x7c7   :  { %v5141_v52 = vpop.f32.mrb[59].mxu1  ;;  %5292 = vrot.lane.b32.xlu0 %v5139_v27, %s7707_s2 }
 0x7c8   :  { %5294 = vrot.lane.b32.xlu1 %v5141_v52, %s7707_s2 }
 0x7cd   :  { %v8859_v37 = vpop.f32.mrb[54].mxu0 }
 0x7ce   :  { %v8861_v26 = vpop.f32.mrb[55].mxu0 }
 0x7cf   :  { %v5281_v28 = vpop.f32.mrb[60].mxu1 }
 0x7d0   :  { %5300 = vrot.lane.b32.xlu1 %v5281_v28, %s7707_s2  ;;  %v5283_v24 = vpop.f32.mrb[61].mxu1 }
 0x7d3   :  { %v5210_v31 = vpop.f32.mrb[56].mxu0 }
 0x7d4   :  { %5296 = vrot.lane.b32.xlu0 %v5210_v31, %s7707_s2  ;;  %v5212_v35 = vpop.f32.mrb[57].mxu0 }
 0x7d5   :  { %5298 = vrot.lane.b32.xlu1 %v5212_v35, %s7707_s2 }
 0x7d6   :  { %v5463_v55 = vpop.f32.mrb[62].mxu1 }
 0x7d7   :  { %v5465_v43 = vpop.f32.mrb[63].mxu1 }
 0x7d8   :  { %5302 = vrot.lane.b32.xlu0 %v5283_v24, %s7707_s2 }
 0x7d9   :  { %v5392_v8 = vpop.f32.mrb[58].mxu0 }
 0x7da   :  { %v5394_v20 = vpop.f32.mrb[59].mxu0 }
 0x7db   :  { %5547 = vrot.lane.b32.xlu1 %v5394_v20, %s7708_s30 }
 0x7dc   :  { %5545 = vrot.lane.b32.xlu0 %v5392_v8, %s7708_s30  ;;  %v5645_v21 = vpop.f32.mrb[64].mxu1 }
 0x7dd   :  { %v5647_v45 = vpop.f32.mrb[65].mxu1 }
 0x7df   :  { %5798 = vrot.lane.b32.xlu1 %v5645_v21, %s7709_s8  ;;  %v5534_v46 = vpop.f32.mrb[60].mxu0 }
 0x7e0   :  { %5549 = vrot.lane.b32.xlu0 %v5463_v55, %s7708_s30  ;;  %v5536_v40 = vpop.f32.mrb[61].mxu0 }
 0x7e2   :  { %v5787_v10 = vpop.f32.mrb[66].mxu1 }
 0x7e3   :  { %5553 = vrot.lane.b32.xlu1 %v5534_v46, %s7708_s30  ;;  %v5789_v34 = vpop.f32.mrb[67].mxu1 }
 0x7e4   :  { %5551 = vrot.lane.b32.xlu0 %v5465_v43, %s7708_s30 }
 0x7e5   :  { %v5716_v59 = vpop.f32.mrb[62].mxu0 }
 0x7e6   :  { %v5718_v6 = vpop.f32.mrb[63].mxu0 }
 0x7e7   :  { %5802 = vrot.lane.b32.xlu1 %v5716_v59, %s7709_s8 }
 0x7e8   :  { %5800 = vrot.lane.b32.xlu0 %v5647_v45, %s7709_s8  ;;  %v5969_v38 = vpop.f32.mrb[68].mxu1 }
 0x7e9   :  { %v5971_v49 = vpop.f32.mrb[69].mxu1 }
 0x7eb   :  { %5806 = vrot.lane.b32.xlu1 %v5787_v10, %s7709_s8  ;;  %v5898_v15 = vpop.f32.mrb[64].mxu0 }
 0x7ec   :  { %5555 = vrot.lane.b32.xlu0 %v5536_v40, %s7708_s30  ;;  %v5900_v60 = vpop.f32.mrb[65].mxu0 }
 0x7ee   :  { %v6151_v17 = vpop.f32.mrb[70].mxu1 }
 0x7ef   :  { %6051 = vrot.lane.b32.xlu1 %v5898_v15, %s7710_s9  ;;  %v6153_v32 = vpop.f32.mrb[71].mxu1 }
 0x7f0   :  { %5804 = vrot.lane.b32.xlu0 %v5718_v6, %s7709_s8 }
 0x7f1   :  { %v6040_v39 = vpop.f32.mrb[66].mxu0 }
 0x7f2   :  { %v6042_v53 = vpop.f32.mrb[67].mxu0 }
 0x7f3   :  { %6055 = vrot.lane.b32.xlu1 %v5969_v38, %s7710_s9 }
 0x7f4   :  { %5808 = vrot.lane.b32.xlu0 %v5789_v34, %s7709_s8  ;;  %v6293_v33 = vpop.f32.mrb[72].mxu1 }
 0x7f5   :  { %v6295_v42 = vpop.f32.mrb[73].mxu1 }
 0x7f7   :  { %6304 = vrot.lane.b32.xlu1 %v6151_v17, %s7711_s10  ;;  %v6222_v1 = vpop.f32.mrb[68].mxu0 }
 0x7f8   :  { %6053 = vrot.lane.b32.xlu0 %v5900_v60, %s7710_s9  ;;  %v6224_v56 = vpop.f32.mrb[69].mxu0 }
 0x7fa   :  { %v6475_v13 = vpop.f32.mrb[74].mxu1 }
 0x7fb   :  { %6059 = vrot.lane.b32.xlu1 %v6040_v39, %s7710_s9  ;;  %v6477_v7 = vpop.f32.mrb[75].mxu1 }
 0x7fc   :  { %6057 = vrot.lane.b32.xlu0 %v5971_v49, %s7710_s9 }
 0x7fd   :  { %v6404_v48 = vpop.f32.mrb[70].mxu0 }
 0x7fe   :  { %v6406_v18 = vpop.f32.mrb[71].mxu0 }
 0x7ff   :  { %6308 = vrot.lane.b32.xlu1 %v6222_v1, %s7711_s10 }
 0x800   :  { %6306 = vrot.lane.b32.xlu0 %v6153_v32, %s7711_s10  ;;  %v6657_v11 = vpop.f32.mrb[76].mxu1 }
 0x801   :  { %v6659_v25 = vpop.f32.mrb[77].mxu1 }
 0x803   :  { %6312 = vrot.lane.b32.xlu1 %v6293_v33, %s7711_s10  ;;  %v6546_v12 = vpop.f32.mrb[72].mxu0 }
 0x804   :  { %6061 = vrot.lane.b32.xlu0 %v6042_v53, %s7710_s9  ;;  %v6548_v58 = vpop.f32.mrb[73].mxu0 }
 0x806   :  { %v6799_v36 = vpop.f32.mrb[78].mxu1 }
 0x807   :  { %6557 = vrot.lane.b32.xlu1 %v6404_v48, %s7712_s11  ;;  %v6801_v14 = vpop.f32.mrb[79].mxu1 }
 0x808   :  { %6310 = vrot.lane.b32.xlu0 %v6224_v56, %s7711_s10 }
 0x809   :  { %v6728_v47 = vpop.f32.mrb[74].mxu0 }
 0x80a   :  { %v6730_v29 = vpop.f32.mrb[75].mxu0 }
 0x80b   :  { %6561 = vrot.lane.b32.xlu1 %v6475_v13, %s7712_s11 }
 0x80c   :  { %6314 = vrot.lane.b32.xlu0 %v6295_v42, %s7711_s10  ;;  %v6981_v23 = vpop.f32.mrb[80].mxu1 }
 0x80d   :  { %v6983_v54 = vpop.f32.mrb[81].mxu1 }
 0x80f   :  { %6810 = vrot.lane.b32.xlu1 %v6657_v11, %s7713_s12  ;;  %v6910_v50 = vpop.f32.mrb[76].mxu0 }
 0x810   :  { %6559 = vrot.lane.b32.xlu0 %v6406_v18, %s7712_s11  ;;  %v6912_v44 = vpop.f32.mrb[77].mxu0 }
 0x813   :  { %6565 = vrot.lane.b32.xlu1 %v6546_v12, %s7712_s11 }
 0x814   :  { %6563 = vrot.lane.b32.xlu0 %v6477_v7, %s7712_s11 }
 0x815   :  { %v7052_v9 = vpop.f32.mrb[78].mxu0 }
 0x816   :  { %v7054_v22 = vpop.f32.mrb[79].mxu0 }
 0x817   :  { %6814 = vrot.lane.b32.xlu1 %v6728_v47, %s7713_s12 }
 0x818   :  { %6812 = vrot.lane.b32.xlu0 %v6659_v25, %s7713_s12 }
 0x81b   :  { %6818 = vrot.lane.b32.xlu1 %v6799_v36, %s7713_s12 }
 0x81c   :  { %6567 = vrot.lane.b32.xlu0 %v6548_v58, %s7712_s11 }
 0x81f   :  { %7063 = vrot.lane.b32.xlu1 %v6910_v50, %s7714_s0 }
 0x820   :  { %6816 = vrot.lane.b32.xlu0 %v6730_v29, %s7713_s12 }
 0x823   :  { %7067 = vrot.lane.b32.xlu1 %v6981_v23, %s7714_s0 }
 0x824   :  { %7065 = vrot.lane.b32.xlu0 %v6912_v44, %s7714_s0 }
 0x827   :  { %6820 = vrot.lane.b32.xlu1 %v6801_v14, %s7713_s12 }
 0x828   :  { %7069 = vrot.lane.b32.xlu0 %v6983_v54, %s7714_s0 }
 0x82b   :  { %7073 = vrot.lane.b32.xlu1 %v7054_v22, %s7714_s0 }
 0x82c   :  { %7071 = vrot.lane.b32.xlu0 %v7052_v9, %s7714_s0 }
 0x839   :  { %v5293_v16 = vpop.permute.xlu0 %5292 }
 0x83a   :  { %v5295_v0 = vpop.permute.xlu1 %5294 }
 0x83b   :  { %v5304_v41 = vsel %vm513_vm2, %v5293_v16, %v5295_v0 }
 0x83c   :  { %v5315_v3 = vadd.f32 %v5304_v41, %v8849_v57 }
 0x842   :  { %v5301_v27 = vpop.permute.xlu1 %5300 }
 0x846   :  { %v5297_v52 = vpop.permute.xlu0 %5296 }
 0x847   :  { %v5305_v28 = vsel %vm513_vm2, %v5295_v0, %v5297_v52  ;;  %v5299_v24 = vpop.permute.xlu1 %5298 }
 0x848   :  { %v5316_v31 = vadd.f32 %v5305_v28, %v8851_v63  ;;  %v5306_v35 = vsel %vm513_vm2, %v5297_v52, %v5299_v24  ;;  %v5307_v55 = vsel %vm513_vm2, %v5299_v24, %v5301_v27 }
 0x849   :  { %v5317_v43 = vadd.f32 %v5306_v35, %v8853_v30  ;;  %v5318_v8 = vadd.f32 %v5307_v55, %v8855_v19 }
 0x84a   :  { %v5303_v20 = vpop.permute.xlu0 %5302 }
 0x84b   :  { %v5308_v21 = vsel %vm513_vm2, %v5301_v27, %v5303_v20  ;;  %v5320_v57 = vadd.f32 %v5303_v20, %v8861_v26 }
 0x84c   :  { %v5319_v45 = vadd.f32 %v5308_v21, %v8859_v37 }
 0x84d   :  { %v5548_v46 = vpop.permute.xlu1 %5547 }
 0x84e   :  { %v5546_v40 = vpop.permute.xlu0 %5545 }
 0x84f   :  { %v5557_v10 = vsel %vm767_vm3, %v5546_v40, %v5548_v46 }
 0x850   :  { %v5568_v63 = vadd.f32 %v5557_v10, %v5315_v3 }
 0x851   :  { %v5799_v34 = vpop.permute.xlu1 %5798 }
 0x852   :  { %v5550_v59 = vpop.permute.xlu0 %5549 }
 0x853   :  { %v5558_v14 = vsel %vm767_vm3, %v5548_v46, %v5550_v59 }
 0x854   :  { %v5569_v22 = vadd.f32 %v5558_v14, %v5316_v31 }
 0x855   :  { %v5554_v6 = vpop.permute.xlu1 %5553 }
 0x856   :  { %v5552_v38 = vpop.permute.xlu0 %5551 }
 0x857   :  { %v5559_v29 = vsel %vm767_vm3, %v5550_v59, %v5552_v38  ;;  %v5560_v23 = vsel %vm767_vm3, %v5552_v38, %v5554_v6 }
 0x858   :  { %v5570_v41 = vadd.f32 %v5559_v29, %v5317_v43  ;;  %v5571_v3 = vadd.f32 %v5560_v23, %v5318_v8 }
 0x859   :  { %v5803_v49 = vpop.permute.xlu1 %5802 }
 0x85a   :  { %v5801_v30 = vpop.permute.xlu0 %5800 }
 0x85b   :  { %v5810_v50 = vsel %vm1021_vm4, %v5799_v34, %v5801_v30  ;;  %v5811_v44 = vsel %vm1021_vm4, %v5801_v30, %v5803_v49 }
 0x85c   :  { %v5821_v24 = vadd.f32 %v5810_v50, %v5568_v63  ;;  %v5822_v35 = vadd.f32 %v5811_v44, %v5569_v22 }
 0x85d   :  { %v5807_v15 = vpop.permute.xlu1 %5806 }
 0x85e   :  { %v5556_v19 = vpop.permute.xlu0 %5555 }
 0x85f   :  { %v5561_v9 = vsel %vm767_vm3, %v5554_v6, %v5556_v19  ;;  %v5573_v20 = vadd.f32 %v5556_v19, %v5320_v57 }
 0x860   :  { %v5572_v55 = vadd.f32 %v5561_v9, %v5319_v45 }
 0x861   :  { %v6052_v60 = vpop.permute.xlu1 %6051 }
 0x862   :  { %v5805_v17 = vpop.permute.xlu0 %5804 }
 0x863   :  { %v5812_v16 = vsel %vm1021_vm4, %v5803_v49, %v5805_v17  ;;  %v5813_v0 = vsel %vm1021_vm4, %v5805_v17, %v5807_v15 }
 0x864   :  { %v5823_v46 = vadd.f32 %v5812_v16, %v5570_v41  ;;  %v5824_v40 = vadd.f32 %v5813_v0, %v5571_v3 }
 0x865   :  { %v6056_v32 = vpop.permute.xlu1 %6055 }
 0x866   :  { %v5809_v39 = vpop.permute.xlu0 %5808 }
 0x867   :  { %v5814_v43 = vsel %vm1021_vm4, %v5807_v15, %v5809_v39  ;;  %v5826_v6 = vadd.f32 %v5809_v39, %v5573_v20 }
 0x868   :  { %v5825_v15 = vadd.f32 %v5814_v43, %v5572_v55 }
 0x869   :  { %v6305_v26 = vpop.permute.xlu1 %6304 }
 0x86a   :  { %v6054_v53 = vpop.permute.xlu0 %6053 }
 0x86b   :  { %v6063_v27 = vsel %vm1275_vm5, %v6052_v60, %v6054_v53  ;;  %v6064_v52 = vsel %vm1275_vm5, %v6054_v53, %v6056_v32 }
 0x86c   :  { %v6074_v8 = vadd.f32 %v6063_v27, %v5821_v24  ;;  %v6075_v34 = vadd.f32 %v6064_v52, %v5822_v35 }
 0x86d   :  { %v6060_v37 = vpop.permute.xlu1 %6059 }
 0x86e   :  { %v6058_v33 = vpop.permute.xlu0 %6057 }
 0x86f   :  { %v6065_v59 = vsel %vm1275_vm5, %v6056_v32, %v6058_v33  ;;  %v6066_v38 = vsel %vm1275_vm5, %v6058_v33, %v6060_v37 }
 0x870   :  { %v6077_v39 = vadd.f32 %v6066_v38, %v5824_v40 }
 0x871   :  { %v6309_v42 = vpop.permute.xlu1 %6308 }
 0x872   :  { %v6307_v1 = vpop.permute.xlu0 %6306 }
 0x873   :  { %v6316_v31 = vsel %vm1529_vm6, %v6305_v26, %v6307_v1  ;;  %v6317_v10 = vsel %vm1529_vm6, %v6307_v1, %v6309_v42  ;;  %v6076_v26 = vadd.f32 %v6065_v59, %v5823_v46 }
 0x874   :  { %v6327_v49 = vadd.f32 %v6316_v31, %v6074_v8  ;;  %v6328_v30 = vadd.f32 %v6317_v10, %v6075_v34 }
 0x875   :  { %v8921_v56 = vpop.permute.xlu1 %6312 }
 0x876   :  { %v6062_v13 = vpop.permute.xlu0 %6061 }
 0x877   :  { %v6067_v19 = vsel %vm1275_vm5, %v6060_v37, %v6062_v13  ;;  %v6079_v33 = vadd.f32 %v6062_v13, %v5826_v6 }
 0x878   :  { %v6078_v14 = vadd.f32 %v6067_v19, %v5825_v15 }
 0x879   :  { %v6558_v7 = vpop.permute.xlu1 %6557 }
 0x87a   :  { %v6311_v48 = vpop.permute.xlu0 %6310 }
 0x87b   :  { %v6318_v60 = vsel %vm1529_vm6, %v6309_v42, %v6311_v48 }
 0x87c   :  { %v6329_v29 = vadd.f32 %v6318_v60, %v6076_v26 }
 0x87d   :  { %v6562_v18 = vpop.permute.xlu1 %6561 }
 0x87e   :  { %v6315_v11 = vpop.permute.xlu0 %6314 }
 0x87f   :  { %v6320_v42 = vsel %vm1529_vm6, %v8921_v56, %v6315_v11  ;;  %v6332_v50 = vadd.f32 %v6315_v11, %v6079_v33 }
 0x880   :  { %v6331_v41 = vadd.f32 %v6320_v42, %v6078_v14 }
 0x881   :  { %v6811_v25 = vpop.permute.xlu1 %6810 }
 0x882   :  { %v6560_v12 = vpop.permute.xlu0 %6559 }
 0x883   :  { %v6569_v63 = vsel %vm1783_vm7, %v6558_v7, %v6560_v12  ;;  %v6570_v57 = vsel %vm1783_vm7, %v6560_v12, %v6562_v18  ;;  %v6319_v12 = vsel %vm1529_vm6, %v6311_v48, %v8921_v56 }
 0x884   :  { %v6580_v1 = vadd.f32 %v6569_v63, %v6327_v49  ;;  %v6581_v7 = vadd.f32 %v6570_v57, %v6328_v30  ;;  %v6330_v11 = vadd.f32 %v6319_v12, %v6077_v39 }
 0x885   :  { %v8923_v58 = vpop.permute.xlu1 %6565 }
 0x886   :  { %v6564_v36 = vpop.permute.xlu0 %6563 }
 0x887   :  { %v6571_v37 = vsel %vm1783_vm7, %v6562_v18, %v6564_v36  ;;  %v6572_v13 = vsel %vm1783_vm7, %v6564_v36, %v8923_v58 }
 0x888   :  { %v6582_v16 = vadd.f32 %v6571_v37, %v6329_v29 }
 0x889   :  { %v6815_v47 = vpop.permute.xlu1 %6814 }
 0x88a   :  { %v6813_v54 = vpop.permute.xlu0 %6812 }
 0x88b   :  { %v6822_v53 = vsel %vm2037_vm8, %v6811_v25, %v6813_v54  ;;  %v6823_v32 = vsel %vm2037_vm8, %v6813_v54, %v6815_v47 }
 0x88c   :  { %v6833_v44 = vadd.f32 %v6822_v53, %v6580_v1  ;;  %v6834_v25 = vadd.f32 %v6823_v32, %v6581_v7 }
 0x88d   :  { %v8935_v28 = vpop.permute.xlu1 %6818 }
 0x88e   :  { %v6568_v21 = vpop.permute.xlu0 %6567 }
 0x88f   :  { %v6573_v18 = vsel %vm1783_vm7, %v8923_v58, %v6568_v21  ;;  %v6585_v3 = vadd.f32 %v6568_v21, %v6332_v50  ;;  %v6583_v58 = vadd.f32 %v6572_v13, %v6330_v11 }
 0x890   :  { %v6584_v55 = vadd.f32 %v6573_v18, %v6331_v41 }
 0x891   :  { %v7064_v45 = vpop.permute.xlu1 %7063 }
 0x892   :  { %v6817_v17 = vpop.permute.xlu0 %6816 }
 0x893   :  { %v6824_v54 = vsel %vm2037_vm8, %v6815_v47, %v6817_v17  ;;  %v6825_v36 = vsel %vm2037_vm8, %v6817_v17, %v8935_v28 }
 0x894   :  { %v6835_v47 = vadd.f32 %v6824_v54, %v6582_v16  ;;  %v6836_v43 = vadd.f32 %v6825_v36, %v6583_v58  ;;  %v7325_v36 = vld [vmem:[%s9024_s5 + $0x10] sm:$0xff]  ;;  %s7718_s5 = smov 60  }
 0x895   :  { %v7068_v23 = vpop.permute.xlu1 %7067 }
 0x896   :  { %v7066_v9 = vpop.permute.xlu0 %7065 }
 0x897   :  { %v7075_v22 = vsel %vm2291_vm9, %v7064_v45, %v7066_v9  ;;  %v7076_v48 = vsel %vm2291_vm9, %v7066_v9, %v7068_v23 }
 0x898   :  { %v8960_v0 = vadd.f32 %v7075_v22, %v6833_v44  ;;  %v8962_v56 = vadd.f32 %v7076_v48, %v6834_v25 }
 0x899   :  { %v6821_v27 = vpop.permute.xlu1 %6820 }
 0x89a   :  { %v7092_v52 = vmul.f32 %v8960_v0, %v8960_v0  ;;  %v7093_v24 = vmul.f32 %v8962_v56, %v8962_v56  ;;  %v7070_v35 = vpop.permute.xlu0 %7069  ;;  %v6826_v46 = vsel %vm2037_vm8, %v8935_v28, %v6821_v27  ;;  %v7098_v21 = vmul.f32 %v8960_v0, %v8048_v2 }
 0x89b   :  { %v7077_v20 = vsel %vm2291_vm9, %v7068_v23, %v7070_v35  ;;  %v7099_v40 = vmul.f32 %v8962_v56, %v8051_v4  ;;  %v6838_v10 = vadd.f32 %v6821_v27, %v6585_v3  ;;  %v6837_v63 = vadd.f32 %v6826_v46, %v6584_v55 }
 0x89c   :  { %v7088_v31 = vadd.f32 %v7077_v20, %v6835_v47  ;;  %v7104_v8 = vmul.f32 %v7092_v52, %v8048_v2  ;;  %v7105_v34 = vmul.f32 %v7093_v24, %v8051_v4  ;;  %v7326_v24 = vld [vmem:[%s9025_s6 + $0x10] sm:$0xff]  ;;  %s7719_s6 = smov [#allocation6]  }
 0x89d   :  { %v7074_v59 = vpop.permute.xlu1 %7073  ;;  %v7110_v30 = vadd.f32 %v7099_v40, %v7098_v21  ;;  %s7206_s9 = sshll.u32 %s7719_s6, 4  ;;  %s7207_s9 = int_to_ptr.vmem [resolvable:$true] %s7206_s9 }
 0x89e   :  { %v7094_v6 = vmul.f32 %v7088_v31, %v7088_v31  ;;  %v7100_v38 = vmul.f32 %v7088_v31, %v8054_v5  ;;  %v7072_v57 = vpop.permute.xlu0 %7071  ;;  %v7091_v28 = vadd.f32 %v7074_v59, %v6838_v10  ;;  %v7118_v15 = vadd.f32 %v7105_v34, %v7104_v8  ;;  %s7679_s10 = scalar_lea.vmem %s7207_s9, 768  ;;  %p7684_p9 = scmp.lt.s32.totalorder %s7207_s9, %s7207_s9 }
 0x89f   :  { %v7078_v45 = vsel %vm2291_vm9, %v7070_v35, %v7072_v57  ;;  %v7079_v49 = vsel %vm2291_vm9, %v7072_v57, %v7074_v59  ;;  %p7680_p8 = scmp.ne.s32.totalorder %s7207_s9, %s7679_s10  ;;  %p7685_p10 = scmp.lt.s32.totalorder %s7679_s10, %s7679_s10 }
 0x8a0   :  { %v7106_v19 = vmul.f32 %v7094_v6, %v8054_v5  ;;  %v7089_v60 = vadd.f32 %v7078_v45, %v6836_v43  ;;  %v7090_v17 = vadd.f32 %v7079_v49, %v6837_v63  ;;  %v7097_v26 = vmul.f32 %v7091_v28, %v7091_v28 }
 0x8a1   :  { %v7111_v53 = vadd.f32 %v7110_v30, %v7100_v38  ;;  %v7103_v1 = vmul.f32 %v7091_v28, %v8151_v62  ;;  %p7686_p11 = por %p7685_p10, %p7684_p9 }
 0x8a2   :  { %v7095_v32 = vmul.f32 %v7089_v60, %v7089_v60  ;;  %v7101_v39 = vmul.f32 %v7089_v60, %v8172_v61  ;;  %v7096_v33 = vmul.f32 %v7090_v17, %v7090_v17  ;;  %v7102_v14 = vmul.f32 %v7090_v17, %v8183_v51 }
 0x8a3   :  { %v7119_v29 = vadd.f32 %v7118_v15, %v7106_v19  ;;  %v7109_v37 = vmul.f32 %v7097_v26, %v8151_v62  ;;  %v7114_v44 = vsel %vm60_vm1, %v7103_v1, 0.0  ;;  %p7687_p12 = pnand %p7686_p11, %p7680_p8 }
 0x8a4   :  { %v7107_v7 = vmul.f32 %v7095_v32, %v8172_v61  ;;  %v7112_v12 = vadd.f32 %v7111_v53, %v7101_v39  ;;  %v7108_v42 = vmul.f32 %v7096_v33, %v8183_v51 }
 0x8a5   :  { %v7122_v13 = vsel %vm60_vm1, %v7109_v37, 0.0  ;;  %vm7190_vm1 = vcmask 490496  }
 0x8a6   :  { %v7113_v23 = vadd.f32 %v7112_v12, %v7102_v14  ;;  %v7120_v50 = vadd.f32 %v7119_v29, %v7107_v7 }
 0x8a8   :  { %v7115_v25 = vadd.f32 %v7114_v44, %v7113_v23  ;;  %v7121_v9 = vadd.f32 %v7120_v50, %v7108_v42 }
 0x8aa   :  { %7116 = vadd.xlane.f32.xlu0 %v7115_v25  ;;  %v7123_v54 = vadd.f32 %v7122_v13, %v7121_v9 }
 0x8ac   :  { %7124 = vadd.xlane.f32.xlu1 %v7123_v54 }
 0x937   :  { %v7117_v22 = vpop.xlane.xlu0 %7116 }
 0x938   :  { %v7126_v48 = vmul.f32 0.001953125, %v7117_v22 }
 0x939   :  { %v7125_v16 = vpop.xlane.xlu1 %7124 }
 0x93a   :  { %v7128_v18 = vmul.f32 %v7126_v48, %v7126_v48  ;;  %v7127_v11 = vmul.f32 0.001953125, %v7125_v16 }
 0x93c   :  { %v7129_v41 = vsub.f32 %v7127_v11, %v7128_v18 }
 0x93e   :  { %v7130_v3 = vmax.f32 %v7129_v41, 0.0 }
 0x940   :  { %v7133_v27 = vadd.f32 1e-05, %v7130_v3 }
 0x942   :  { %7565 = vrsqrt.f32 %v7133_v27 }
 0x94c   :  { %v7566_v47 = vpop.eup %7565 }
 0x94d   :  { %v7135_v52 = vmul.f32 %v7566_v47, %v7325_v36 }
 0x94f   :  { %7142 = vperm.xlu0 %7559, %v7135_v52   ;;  %v7138_v35 = vmul.f32 %v7135_v52, %v7126_v48 }
 0x951   :  { %v7139_v58 = vsub.f32 %v7326_v24, %v7138_v35 }
 0x953   :  { %7153 = vperm.xlu1 %7560, %v7139_v58  }
 0x9ce   :  { %v7143_v55 = vpop.permute.xlu0 %7142 }
 0x9cf   :  { %v7145_v20 = vmul.f32 %v7143_v55, %v8960_v0  ;;  %v7146_v46 = vmul.f32 %v7143_v55, %v8962_v56  ;;  %v7147_v21 = vmul.f32 %v7143_v55, %v7088_v31  ;;  %v7148_v40 = vmul.f32 %v7143_v55, %v7089_v60 }
 0x9d0   :  { %v7149_v10 = vmul.f32 %v7143_v55, %v7090_v17  ;;  %v7150_v43 = vmul.f32 %v7143_v55, %v7091_v28 }
 0x9d2   :  { %v7154_v8 = vpop.permute.xlu1 %7153 }
 0x9d3   :  { %v7156_v34 = vadd.f32 %v7154_v8, %v7145_v20  ;;  %v7157_v59 = vadd.f32 %v7154_v8, %v7146_v46  ;;  %v7159_v6 = vadd.f32 %v7154_v8, %v7148_v40  ;;  %v7158_v38 = vadd.f32 %v7154_v8, %v7147_v21 }
 0x9d4   :  { %v7161_v63 = vadd.f32 %v7154_v8, %v7150_v43  ;;  %v7160_v57 = vadd.f32 %v7154_v8, %v7149_v10 }
 0x9d5   :  { %v7162_v45 = vmax.f32 %v7156_v34, 0.0  ;;  %v7163_v49 = vmax.f32 %v7157_v59, 0.0  ;;  %v7165_v30 = vmax.f32 %v7159_v6, 0.0  ;;  %v7164_v19 = vmax.f32 %v7158_v38, 0.0 }
 0x9d6   :  { %v7167_v15 = vmax.f32 %v7161_v63, 0.0  ;;  %v7166_v26 = vmax.f32 %v7160_v57, 0.0 }
 0x9d7   :  { %v7168_v0 = vmul.f32 %v7162_v45, %v8048_v2  ;;  %v7169_v56 = vmul.f32 %v7163_v49, %v8051_v4  ;;  %v7171_v31 = vmul.f32 %v7165_v30, %v8172_v61  ;;  %v7170_v28 = vmul.f32 %v7164_v19, %v8054_v5 }
 0x9d8   :  { %v7173_v60 = vmul.f32 %v7167_v15, %v8151_v62  ;;  %v7172_v17 = vmul.f32 %v7166_v26, %v8183_v51 }
 0x9d9   :  { %7174 = vst [vmem:[#allocation6] sm:$0xff] %v7168_v0  ;;  %7175 = vst [vmem:[#allocation6 + $0x8] sm:$0xff] %v7169_v56  ;;  %7184 = vrot.lane.b32.xlu1 %v7171_v31, %s7718_s5  ;;  %7182 = vrot.lane.b32.xlu0 %v7170_v28, %s7718_s5 }
 0x9da   :  { %7177 = vst.msk [vmem:[#allocation6 + $0x10] sm:$0xff] %vm7176_vm0, %v7170_v28 }
 0x9dd   :  { %7188 = vrot.lane.b32.xlu1 %v7173_v60, %s7718_s5  ;;  %7186 = vrot.lane.b32.xlu0 %v7172_v17, %s7718_s5 }
 0xa4b   :  { %v7185_v2 = vpop.permute.xlu1 %7184  ;;  %v7183_v4 = vpop.permute.xlu0 %7182 }
 0xa4c   :  { %v7191_v53 = vsel %vm7190_vm1, %v7183_v4, %v7185_v2 }
 0xa4d   :  { %7198 = vst [vmem:[#allocation6 + $0x18] sm:$0xff] %v7191_v53 }
 0xa4f   :  { %v7189_v5 = vpop.permute.xlu1 %7188  ;;  %v7187_v61 = vpop.permute.xlu0 %7186 }
 0xa50   :  { %v7192_v32 = vsel %vm7190_vm1, %v7185_v2, %v7187_v61  ;;  %v7193_v39 = vsel %vm7190_vm1, %v7187_v61, %v7189_v5 }
 0xa51   :  { %7199 = vst [vmem:[#allocation6 + $0x20] sm:$0xff] %v7192_v32  ;;  %7200 = vst.msk [vmem:[#allocation6 + $0x28] sm:$0xff] %vm7176_vm0, %v7193_v39 }
 0xa52   :  { %7690 = shalt.err (!%p7687_p12)
}
 0xa53   :  { %s7691_s0 = scalar_lea.hbm %s9026_s7, 768 }
 0xa54   :  { %p7692_p13 = scmp.ne.s32.totalorder %s9026_s7, %s7691_s0  ;;  %p7695_p0 = scmp.lt.u32.totalorder %s7691_s0, %s9026_s7 }
 0xa56   :  { %p7697_p1 = pnand %p7695_p0, %p7692_p13 }
 0xa58   :  { %7700 = shalt.err (!%p7697_p1)
}
 0xa59   :  { %s7720_s25 = smov 384   ;;  %s7721_s26 = smov 24  }
 0xa5a   :  { %7212 = dma.vmem_to_hbm [thread:$0]  %s7207_s9, 768, %s9026_s7, [#allocation5], %s7720_s25, %s7720_s25, %s7721_s26  }
 0xa5b   :  { %7703 = dma.done.wait [#allocation5], 768  }
 0xa5c   :  { %7704 = vsyncadd [#allocation5], 4294966528 }
 0xa5d   :  { %7216 = vsyncpa [#allocation4], 1 }
 0xa5e   :  { %7217 = vsyncpa [#allocation5], 1 }

</bundles_post_ra>
